<compile_context>
chip_gen: v7x
topology: tpu7x:2x2x1
jax: 0.10.0
libtpu: 0.0.40
codegen_flags: <defaults>
</compile_context>

<pallas_src>
import math
import functools

import jax
import jax.numpy as jnp
from jax.experimental import pallas as pl
from jax.experimental.pallas import tpu as pltpu


# ---------------------------------------------------------------------------
# Layout helpers
# ---------------------------------------------------------------------------
def _round_up(n, m):
    return ((n + m - 1) // m) * m


def _nbytes(a):
    return int(a.size) * a.dtype.itemsize


def choose_row_stride(H, W):
    """Smallest row stride S >= W+2 such that H*S is a multiple of 128."""
    for s in range(W + 2, W + 2 + 129):
        if (H * s) % 128 == 0:
            return s
    return W + 2


def slab_width(H, S):
    # (H+2) padded rows of stride S, +2 so the largest im2col shift (2*S + 2)
    # never runs past the end, rounded up to a lane-aligned width.
    return _round_up((H + 2) * S + 2, 128)


def wide_mask(H, W, S):
    """(1, H*S) f32 mask: 1 at valid output columns (x < W), 0 at garbage cols."""
    col = jnp.arange(H * S, dtype=jnp.int32) % S
    return (col < W).astype(jnp.float32).reshape(1, H * S)


def to_padded_slab(x_nchw, S, SLAB, dtype=jnp.bfloat16):
    """(N, C, H, W) -> (N, C, SLAB) channels-first padded-flat slab (zero pads)."""
    N, C, H, W = x_nchw.shape
    xp = jnp.pad(x_nchw, ((0, 0), (0, 0), (1, 1), (1, S - W - 1)))
    xp = xp.reshape(N, C, (H + 2) * S)
    xp = jnp.pad(xp, ((0, 0), (0, 0), (0, SLAB - (H + 2) * S)))
    return xp.astype(dtype)


# ---------------------------------------------------------------------------
# Fused head kernel:
#   Conv1 -> Conv2 -> D x RDB -> GlobalBottleneck -> Conv3 -> (+Conv1) -> UpConv
# ---------------------------------------------------------------------------
def make_head_kernel(H, W, S, SLAB, D, C, G0, G):
    WIDE = H * S                                     # lane axis, multiple of 128
    OFFS = [dy * S + dx for dy in range(3) for dx in range(3)]
    PAD_L = S + 1                                    # wide -> padded-flat offset
    PAD_R = SLAB - PAD_L - WIDE

    def kernel(x_ref, mask_ref, *rest):
        feat_ref = rest[-1]          # VMEM scratch: RDB dense-connection buffer
        o_ref = rest[-2]
        wit = iter(rest[:-2])
        nxt = lambda: (next(wit), next(wit))         # (weight_ref, bias_ref)

        mask = mask_ref[...]                         # (1, WIDE) f32

        def conv3x3(slab, w_ref, b_ref, relu):
            # slab: (Cin, SLAB) bf16 -> (Cout, WIDE) f32 ("wide" form)
            rhs = jnp.concatenate([slab[:, o:o + WIDE] for o in OFFS], axis=0)
            y = jnp.dot(w_ref[...], rhs, preferred_element_type=jnp.float32)
            y = y + b_ref[...]
            return jnp.maximum(y, 0.0) if relu else y

        def conv1x1(slab, w_ref, b_ref):
            # 1x1 conv on the interior window of the slab -> (Cout, WIDE) f32
            y = jnp.dot(w_ref[...], slab[:, PAD_L:PAD_L + WIDE],
                        preferred_element_type=jnp.float32)
            return y + b_ref[...]

        def embed(y_masked):
            # masked "wide" (Cc, WIDE) f32 -> bf16 padded-flat slab (Cc, SLAB)
            y = y_masked.astype(jnp.bfloat16)
            c = y.shape[0]
            return jnp.concatenate(
                [jnp.zeros((c, PAD_L), jnp.bfloat16), y,
                 jnp.zeros((c, PAD_R), jnp.bfloat16)], axis=1)

        x_slab = x_ref[...]                          # (3, SLAB) bf16

        w, b = nxt()
        f0_w = conv3x3(x_slab, w, b, relu=False) * mask        # Conv1 -> F_
        w, b = nxt()
        cur_w = conv3x3(embed(f0_w), w, b, relu=False) * mask  # Conv2 -> F[0]
        cur = embed(cur_w)

        wg_ref, bg_ref = nxt()                       # GlobalBottleneck (1x1) params
        gff = jnp.zeros((G0, WIDE), jnp.float32)     # incremental GFF accumulator

        for d in range(D):                           # residual dense blocks
            feat_ref[0:G0, :] = cur
            for i in range(C):
                w, b = nxt()
                rows = G0 + i * G
                y = conv3x3(feat_ref[0:rows, :], w, b, relu=True)
                feat_ref[rows:rows + G, :] = embed(y * mask)
            w, b = nxt()                             # RDB 1x1 bottleneck + residual
            y = conv1x1(feat_ref[0:G0 + C * G, :], w, b)
            cur_w = (y + cur[:, PAD_L:PAD_L + WIDE].astype(jnp.float32)) * mask
            cur = embed(cur_w)
            # GFF over cat(F[1:]) == sum_d Wg[d] @ F[d+1]   (1x1 conv is linear)
            gff = gff + jnp.dot(wg_ref[d], cur[:, PAD_L:PAD_L + WIDE],
                                preferred_element_type=jnp.float32)

        gff = (gff + bg_ref[...]) * mask
        w, b = nxt()
        fdf_w = (conv3x3(embed(gff), w, b, relu=False) + f0_w) * mask  # Conv3 + F_
        w, b = nxt()
        o_ref[...] = conv3x3(embed(fdf_w), w, b, relu=False)           # upsample conv

    return kernel


def rdn_head(x_slab, mask, flat_params, *, H, W, S, SLAB, D, C, G0, G):
    """x_slab: (N, 3, SLAB) bf16 -> (N, 4*G0, H*S) f32 ("wide" form)."""
    N, cin0, _ = x_slab.shape
    WIDE = H * S
    cup = 4 * G0

    def const_spec(a):
        r = a.ndim
        return pl.BlockSpec(a.shape, lambda n, _r=r: (0,) * _r)

    in_specs = [pl.BlockSpec((None, cin0, SLAB), lambda n: (n, 0, 0)),
                const_spec(mask)]
    in_specs += [const_spec(a) for a in flat_params]

    raw_bytes = sum(_nbytes(a) for a in (x_slab, mask, *flat_params))
    raw_bytes += cup * WIDE * 4 + (G0 + C * G) * SLAB * 2
    vmem_limit = int(min(max(4 * raw_bytes, 32 << 20), 48 << 20))

    return pl.pallas_call(
        make_head_kernel(H, W, S, SLAB, D, C, G0, G),
        out_shape=jax.ShapeDtypeStruct((N, cup, WIDE), jnp.float32),
        grid=(N,),
        in_specs=in_specs,
        out_specs=pl.BlockSpec((None, cup, WIDE), lambda n: (n, 0, 0)),
        scratch_shapes=[pltpu.VMEM((G0 + C * G, SLAB), jnp.bfloat16)],
        compiler_params=pltpu.CompilerParams(
            dimension_semantics=("parallel",),
            vmem_limit_bytes=vmem_limit),
    )(x_slab, mask, *flat_params)


# ---------------------------------------------------------------------------
# Reconstruction conv (3x3, G0 -> 3) on the pixel-shuffled 2H x 2W image.
# ---------------------------------------------------------------------------
def make_recon_kernel(H, W, S, SLAB):
    WIDE = H * S
    OFFS = [dy * S + dx for dy in range(3) for dx in range(3)]

    def kernel(x_ref, w_ref, b_ref, o_ref):
        slab = x_ref[...]                            # (Cin, SLAB) bf16
        rhs = jnp.concatenate([slab[:, o:o + WIDE] for o in OFFS], axis=0)
        o_ref[...] = jnp.dot(w_ref[...], rhs,
                             preferred_element_type=jnp.float32) + b_ref[...]

    return kernel


def recon_conv(x_slab, w, b, *, H, W, S, SLAB):
    N, cin, _ = x_slab.shape
    WIDE = H * S
    cout = w.shape[0]
    raw_bytes = _nbytes(x_slab) + _nbytes(w) + _nbytes(b) + cout * WIDE * 4
    vmem_limit = int(min(max(4 * raw_bytes, 32 << 20), 48 << 20))
    return pl.pallas_call(
        make_recon_kernel(H, W, S, SLAB),
        out_shape=jax.ShapeDtypeStruct((N, cout, WIDE), jnp.float32),
        grid=(N,),
        in_specs=[pl.BlockSpec((None, cin, SLAB), lambda n: (n, 0, 0)),
                  pl.BlockSpec(w.shape, lambda n: (0, 0)),
                  pl.BlockSpec(b.shape, lambda n: (0, 0))],
        out_specs=pl.BlockSpec((None, cout, WIDE), lambda n: (n, 0, 0)),
        compiler_params=pltpu.CompilerParams(
            dimension_semantics=("parallel",),
            vmem_limit_bytes=vmem_limit),
    )(x_slab, w, b)


# ---------------------------------------------------------------------------
# Parameters: raw f32 (PyTorch layout, for the reference) + packed kernel layout
#   kernel weight: (Cout, k*k*Cin) bf16, column index (ky*k+kx)*Cin + ci
#   kernel bias  : (Cout, 1) f32
# ---------------------------------------------------------------------------
def make_raw_params(key, D, G0, G, C):
    specs = [(3, G0, 3), (G0, G0, 3)]
    for _ in range(D):
        for i in range(C):
            specs.append((G0 + i * G, G, 3))
        specs.append((G0 + C * G, G0, 1))
    specs += [(D * G0, G0, 1),     # GlobalBottleneck
              (G0, G0, 3),         # Conv3
              (G0, 4 * G0, 3),     # UpsampleBlock_x2 conv
              (G0, 3, 3)]          # Reconstruction
    keys = jax.random.split(key, len(specs))
    raw = []
    for k, (cin, cout, ksz) in zip(keys, specs):
        wk, bk = jax.random.split(k)
        w = jax.random.normal(wk, (cout, cin, ksz, ksz), jnp.float32)
        w = w / math.sqrt(ksz * ksz * cin)
        b = jax.random.normal(bk, (cout,), jnp.float32) * 0.01
        raw.append((w, b))
    return raw


def _pack_w(w):
    co, ci, k, _ = w.shape
    return jnp.transpose(w, (0, 2, 3, 1)).reshape(co, k * k * ci).astype(jnp.bfloat16)


def _pack_b(b):
    return b.reshape(-1, 1).astype(jnp.float32)


def pack_params(raw, D, G0, G, C):
    """Head param order: conv1, conv2, GFF, D*(C convs + bottleneck), conv3, upconv."""
    it = iter(raw)
    conv1 = next(it)
    conv2 = next(it)
    rdbs = [next(it) for _ in range(D * (C + 1))]
    gff = next(it)
    conv3 = next(it)
    upc = next(it)
    recon = next(it)

    head = []
    for w, b in (conv1, conv2):
        head += [_pack_w(w), _pack_b(b)]
    wg, bg = gff                                     # (G0, D*G0, 1, 1)
    wg = jnp.transpose(wg.reshape(G0, D, G0), (1, 0, 2)).astype(jnp.bfloat16)
    head += [wg, _pack_b(bg)]
    for w, b in rdbs:
        head += [_pack_w(w), _pack_b(b)]
    for w, b in (conv3, upc):
        head += [_pack_w(w), _pack_b(b)]
    rw, rb = recon
    return head, _pack_w(rw), _pack_b(rb)


# ---------------------------------------------------------------------------
# Forward pass (mirrors PyTorch RDN.forward, NCHW in / NCHW out, scale=2)
# ---------------------------------------------------------------------------
def rdn_forward(x_nchw, head, recon_w, recon_b, *, D, C, G0, G, scale=2):
    assert scale == 2  # TODO(synk): x3/x4/x8 UpNet variants not implemented
    N, cin, H, W = x_nchw.shape
    S = choose_row_stride(H, W)
    SLAB = slab_width(H, S)
    x_slab = to_padded_slab(x_nchw, S, SLAB)
    mask = wide_mask(H, W, S)

    up = rdn_head(x_slab, mask, head, H=H, W=W, S=S, SLAB=SLAB,
                  D=D, C=C, G0=G0, G=G)
    up = up.reshape(N, 4 * G0, H, S)[:, :, :, :W]    # drop garbage stride columns

    # PixelShuffle(2) -- pure layout glue in plain JAX.
    # TODO(synk): fuse into the reconstruction kernel via sub-pixel taps.
    r = scale
    ps = up.reshape(N, G0, r, r, H, W).transpose(0, 1, 4, 2, 5, 3)
    ps = ps.reshape(N, G0, H * r, W * r)

    H2, W2 = H * r, W * r
    S2 = choose_row_stride(H2, W2)
    SLAB2 = slab_width(H2, S2)
    ps_slab = to_padded_slab(ps, S2, SLAB2)
    out = recon_conv(ps_slab, recon_w, recon_b, H=H2, W=W2, S=S2, SLAB=SLAB2)
    return out.reshape(N, 3, H2, S2)[:, :, :, :W2]


# ---------------------------------------------------------------------------
# Pure-JAX reference (same math as the PyTorch module) for a sanity check.
# ---------------------------------------------------------------------------
def _conv2d(x, w, b, pad):
    y = jax.lax.conv_general_dilated(
        x, w, window_strides=(1, 1), padding=[(pad, pad), (pad, pad)],
        dimension_numbers=('NCHW', 'OIHW', 'NCHW'))
    return y + b[None, :, None, None]


def rdn_reference(x, raw, *, D, C, G0, G, scale=2):
    it = iter(raw)
    w, b = next(it); F_ = _conv2d(x, w, b, 1)
    w, b = next(it); cur = _conv2d(F_, w, b, 1)
    feats = []
    for _ in range(D):
        xin = cur
        conv_out = []
        for _i in range(C):
            w, b = next(it)
            inp = jnp.concatenate([xin] + conv_out, axis=1)
            conv_out.append(jax.nn.relu(_conv2d(inp, w, b, 1)))
        w, b = next(it)
        cur = _conv2d(jnp.concatenate([xin] + conv_out, axis=1), w, b, 0) + xin
        feats.append(cur)
    w, b = next(it); gff = _conv2d(jnp.concatenate(feats, axis=1), w, b, 0)
    w, b = next(it); fdf = _conv2d(gff, w, b, 1) + F_
    w, b = next(it); up = _conv2d(fdf, w, b, 1)
    r = scale
    N, C4, H, W = up.shape
    ps = up.reshape(N, C4 // (r * r), r, r, H, W).transpose(0, 1, 4, 2, 5, 3)
    ps = ps.reshape(N, C4 // (r * r), H * r, W * r)
    w, b = next(it)
    return _conv2d(ps, w, b, 1)


# ---------------------------------------------------------------------------
if __name__ == "__main__":
    # Small forward-consistent config: scale=2, D=2 RDBs, G0=G=16, C=2 convs
    # per RDB, input (N=2, C=3, H=16, W=16) NCHW like the PyTorch module.
    scale, D, G0, G, C = 2, 2, 16, 16, 2
    N, H, W = 2, 16, 16

    key = jax.random.PRNGKey(0)
    pkey, xkey = jax.random.split(key)
    raw = make_raw_params(pkey, D, G0, G, C)
    head, recon_w, recon_b = pack_params(raw, D, G0, G, C)
    x = jax.random.normal(xkey, (N, 3, H, W), jnp.float32)

    fwd = jax.jit(functools.partial(rdn_forward, D=D, C=C, G0=G0, G=G, scale=scale))
    out = fwd(x, head, recon_w, recon_b)
    jax.block_until_ready(out)

    assert out.shape == (N, 3, H * scale, W * scale), out.shape
    assert bool(jnp.all(jnp.isfinite(out)))

    # Sanity check vs. a plain-JAX reference with bf16-rounded weights/input
    # (isolates layout/indexing correctness from the intended bf16 casts).
    raw_r = [(w.astype(jnp.bfloat16).astype(jnp.float32), b) for w, b in raw]
    x_r = x.astype(jnp.bfloat16).astype(jnp.float32)
    ref = rdn_reference(x_r, raw_r, D=D, C=C, G0=G0, G=G, scale=scale)
    err = jnp.linalg.norm(out - ref) / (jnp.linalg.norm(ref) + 1e-6)
    assert float(err) < 5e-2, float(err)

    print("KERNEL_OK")
</pallas_src>

<mosaic_0001>
module attributes {stable_mosaic.version = 11 : i64} {
  func.func @kernel(%arg0: i32, %arg1: memref<1x3x512xbf16, #tpu.memory_space<vmem>>, %arg2: memref<1x384xf32, #tpu.memory_space<vmem>>, %arg3: memref<16x27xbf16, #tpu.memory_space<vmem>>, %arg4: memref<16x1xf32, #tpu.memory_space<vmem>>, %arg5: memref<16x144xbf16, #tpu.memory_space<vmem>>, %arg6: memref<16x1xf32, #tpu.memory_space<vmem>>, %arg7: memref<2x16x16xbf16, #tpu.memory_space<vmem>>, %arg8: memref<16x1xf32, #tpu.memory_space<vmem>>, %arg9: memref<16x144xbf16, #tpu.memory_space<vmem>>, %arg10: memref<16x1xf32, #tpu.memory_space<vmem>>, %arg11: memref<16x288xbf16, #tpu.memory_space<vmem>>, %arg12: memref<16x1xf32, #tpu.memory_space<vmem>>, %arg13: memref<16x48xbf16, #tpu.memory_space<vmem>>, %arg14: memref<16x1xf32, #tpu.memory_space<vmem>>, %arg15: memref<16x144xbf16, #tpu.memory_space<vmem>>, %arg16: memref<16x1xf32, #tpu.memory_space<vmem>>, %arg17: memref<16x288xbf16, #tpu.memory_space<vmem>>, %arg18: memref<16x1xf32, #tpu.memory_space<vmem>>, %arg19: memref<16x48xbf16, #tpu.memory_space<vmem>>, %arg20: memref<16x1xf32, #tpu.memory_space<vmem>>, %arg21: memref<16x144xbf16, #tpu.memory_space<vmem>>, %arg22: memref<16x1xf32, #tpu.memory_space<vmem>>, %arg23: memref<64x144xbf16, #tpu.memory_space<vmem>>, %arg24: memref<64x1xf32, #tpu.memory_space<vmem>>, %arg25: memref<1x64x384xf32, #tpu.memory_space<vmem>>, %arg26: memref<48x512xbf16, #tpu.memory_space<vmem>>) attributes {dimension_semantics = [#tpu.dimension_semantics<parallel>], iteration_bounds = array<i64: 2>, scalar_prefetch = 0 : i64, scratch_operands = 1 : i64, tpu.core_type = #tpu.core_type<tc>, window_params = [{transform_indices = @transform_0, window_bounds = array<i64: 1, 3, 512>}, {pipeline_mode = #tpu.pipeline_mode<synchronous>, transform_indices = @transform_1, window_bounds = array<i64: 1, 384>}, {pipeline_mode = #tpu.pipeline_mode<synchronous>, transform_indices = @transform_2, window_bounds = array<i64: 16, 27>}, {pipeline_mode = #tpu.pipeline_mode<synchronous>, transform_indices = @transform_3, window_bounds = array<i64: 16, 1>}, {pipeline_mode = #tpu.pipeline_mode<synchronous>, transform_indices = @transform_4, window_bounds = array<i64: 16, 144>}, {pipeline_mode = #tpu.pipeline_mode<synchronous>, transform_indices = @transform_5, window_bounds = array<i64: 16, 1>}, {pipeline_mode = #tpu.pipeline_mode<synchronous>, transform_indices = @transform_6, window_bounds = array<i64: 2, 16, 16>}, {pipeline_mode = #tpu.pipeline_mode<synchronous>, transform_indices = @transform_7, window_bounds = array<i64: 16, 1>}, {pipeline_mode = #tpu.pipeline_mode<synchronous>, transform_indices = @transform_8, window_bounds = array<i64: 16, 144>}, {pipeline_mode = #tpu.pipeline_mode<synchronous>, transform_indices = @transform_9, window_bounds = array<i64: 16, 1>}, {pipeline_mode = #tpu.pipeline_mode<synchronous>, transform_indices = @transform_10, window_bounds = array<i64: 16, 288>}, {pipeline_mode = #tpu.pipeline_mode<synchronous>, transform_indices = @transform_11, window_bounds = array<i64: 16, 1>}, {pipeline_mode = #tpu.pipeline_mode<synchronous>, transform_indices = @transform_12, window_bounds = array<i64: 16, 48>}, {pipeline_mode = #tpu.pipeline_mode<synchronous>, transform_indices = @transform_13, window_bounds = array<i64: 16, 1>}, {pipeline_mode = #tpu.pipeline_mode<synchronous>, transform_indices = @transform_14, window_bounds = array<i64: 16, 144>}, {pipeline_mode = #tpu.pipeline_mode<synchronous>, transform_indices = @transform_15, window_bounds = array<i64: 16, 1>}, {pipeline_mode = #tpu.pipeline_mode<synchronous>, transform_indices = @transform_16, window_bounds = array<i64: 16, 288>}, {pipeline_mode = #tpu.pipeline_mode<synchronous>, transform_indices = @transform_17, window_bounds = array<i64: 16, 1>}, {pipeline_mode = #tpu.pipeline_mode<synchronous>, transform_indices = @transform_18, window_bounds = array<i64: 16, 48>}, {pipeline_mode = #tpu.pipeline_mode<synchronous>, transform_indices = @transform_19, window_bounds = array<i64: 16, 1>}, {pipeline_mode = #tpu.pipeline_mode<synchronous>, transform_indices = @transform_20, window_bounds = array<i64: 16, 144>}, {pipeline_mode = #tpu.pipeline_mode<synchronous>, transform_indices = @transform_21, window_bounds = array<i64: 16, 1>}, {pipeline_mode = #tpu.pipeline_mode<synchronous>, transform_indices = @transform_22, window_bounds = array<i64: 64, 144>}, {pipeline_mode = #tpu.pipeline_mode<synchronous>, transform_indices = @transform_23, window_bounds = array<i64: 64, 1>}, {transform_indices = @transform_24, window_bounds = array<i64: 1, 64, 384>}]} {
    %c0 = arith.constant 0 : index
    %c0_0 = arith.constant 0 : index
    %0 = vector.load %arg2[%c0, %c0_0] : memref<1x384xf32, #tpu.memory_space<vmem>>, vector<1x384xf32>
    %c0_1 = arith.constant 0 : index
    %c0_2 = arith.constant 0 : index
    %c0_3 = arith.constant 0 : index
    %1 = vector.load %arg1[%c0_1, %c0_2, %c0_3] : memref<1x3x512xbf16, #tpu.memory_space<vmem>>, vector<1x3x512xbf16>
    %2 = vector.shape_cast %1 : vector<1x3x512xbf16> to vector<3x512xbf16>
    %3 = vector.extract_strided_slice %2 {offsets = [0, 0], sizes = [3, 384], strides = [1, 1]} : vector<3x512xbf16> to vector<3x384xbf16>
    %4 = vector.extract_strided_slice %2 {offsets = [0, 1], sizes = [3, 384], strides = [1, 1]} : vector<3x512xbf16> to vector<3x384xbf16>
    %5 = vector.extract_strided_slice %2 {offsets = [0, 2], sizes = [3, 384], strides = [1, 1]} : vector<3x512xbf16> to vector<3x384xbf16>
    %6 = vector.extract_strided_slice %2 {offsets = [0, 24], sizes = [3, 384], strides = [1, 1]} : vector<3x512xbf16> to vector<3x384xbf16>
    %7 = vector.extract_strided_slice %2 {offsets = [0, 25], sizes = [3, 384], strides = [1, 1]} : vector<3x512xbf16> to vector<3x384xbf16>
    %8 = vector.extract_strided_slice %2 {offsets = [0, 26], sizes = [3, 384], strides = [1, 1]} : vector<3x512xbf16> to vector<3x384xbf16>
    %9 = vector.extract_strided_slice %2 {offsets = [0, 48], sizes = [3, 384], strides = [1, 1]} : vector<3x512xbf16> to vector<3x384xbf16>
    %10 = vector.extract_strided_slice %2 {offsets = [0, 49], sizes = [3, 384], strides = [1, 1]} : vector<3x512xbf16> to vector<3x384xbf16>
    %11 = vector.extract_strided_slice %2 {offsets = [0, 50], sizes = [3, 384], strides = [1, 1]} : vector<3x512xbf16> to vector<3x384xbf16>
    %12 = tpu.concatenate %3, %4, %5, %6, %7, %8, %9, %10, %11 in 0 : vector<3x384xbf16>, vector<3x384xbf16>, vector<3x384xbf16>, vector<3x384xbf16>, vector<3x384xbf16>, vector<3x384xbf16>, vector<3x384xbf16>, vector<3x384xbf16>, vector<3x384xbf16> -> vector<27x384xbf16>
    %c0_4 = arith.constant 0 : index
    %c0_5 = arith.constant 0 : index
    %13 = vector.load %arg3[%c0_4, %c0_5] : memref<16x27xbf16, #tpu.memory_space<vmem>>, vector<16x27xbf16>
    %cst = arith.constant dense<0.000000e+00> : vector<16x384xf32>
    %14 = tpu.matmul %13, %12, %cst {dimension_numbers = #tpu.dot_dimension_numbers<[1], [0], [0], [1], [0, 0, 1, 1], [], []>} : vector<16x27xbf16>, vector<27x384xbf16>, vector<16x384xf32> -> vector<16x384xf32>
    %c0_6 = arith.constant 0 : index
    %c0_7 = arith.constant 0 : index
    %15 = vector.load %arg4[%c0_6, %c0_7] : memref<16x1xf32, #tpu.memory_space<vmem>>, vector<16x1xf32>
    %16 = vector.broadcast %15 : vector<16x1xf32> to vector<16x384xf32>
    %17 = arith.addf %14, %16 : vector<16x384xf32>
    %18 = vector.broadcast %0 : vector<1x384xf32> to vector<16x384xf32>
    %19 = arith.mulf %17, %18 : vector<16x384xf32>
    %20 = arith.truncf %19 : vector<16x384xf32> to vector<16x384xbf16>
    %cst_8 = arith.constant 0.000000e+00 : bf16
    %21 = vector.broadcast %cst_8 : bf16 to vector<16x25xbf16>
    %cst_9 = arith.constant 0.000000e+00 : bf16
    %22 = vector.broadcast %cst_9 : bf16 to vector<16x103xbf16>
    %23 = tpu.concatenate %21, %20, %22 in 1 : vector<16x25xbf16>, vector<16x384xbf16>, vector<16x103xbf16> -> vector<16x512xbf16>
    %24 = vector.extract_strided_slice %23 {offsets = [0, 0], sizes = [16, 384], strides = [1, 1]} : vector<16x512xbf16> to vector<16x384xbf16>
    %25 = vector.extract_strided_slice %23 {offsets = [0, 1], sizes = [16, 384], strides = [1, 1]} : vector<16x512xbf16> to vector<16x384xbf16>
    %26 = vector.extract_strided_slice %23 {offsets = [0, 2], sizes = [16, 384], strides = [1, 1]} : vector<16x512xbf16> to vector<16x384xbf16>
    %27 = vector.extract_strided_slice %23 {offsets = [0, 24], sizes = [16, 384], strides = [1, 1]} : vector<16x512xbf16> to vector<16x384xbf16>
    %28 = vector.extract_strided_slice %23 {offsets = [0, 25], sizes = [16, 384], strides = [1, 1]} : vector<16x512xbf16> to vector<16x384xbf16>
    %29 = vector.extract_strided_slice %23 {offsets = [0, 26], sizes = [16, 384], strides = [1, 1]} : vector<16x512xbf16> to vector<16x384xbf16>
    %30 = vector.extract_strided_slice %23 {offsets = [0, 48], sizes = [16, 384], strides = [1, 1]} : vector<16x512xbf16> to vector<16x384xbf16>
    %31 = vector.extract_strided_slice %23 {offsets = [0, 49], sizes = [16, 384], strides = [1, 1]} : vector<16x512xbf16> to vector<16x384xbf16>
    %32 = vector.extract_strided_slice %23 {offsets = [0, 50], sizes = [16, 384], strides = [1, 1]} : vector<16x512xbf16> to vector<16x384xbf16>
    %33 = tpu.concatenate %24, %25, %26, %27, %28, %29, %30, %31, %32 in 0 : vector<16x384xbf16>, vector<16x384xbf16>, vector<16x384xbf16>, vector<16x384xbf16>, vector<16x384xbf16>, vector<16x384xbf16>, vector<16x384xbf16>, vector<16x384xbf16>, vector<16x384xbf16> -> vector<144x384xbf16>
    %c0_10 = arith.constant 0 : index
    %c0_11 = arith.constant 0 : index
    %34 = vector.load %arg5[%c0_10, %c0_11] : memref<16x144xbf16, #tpu.memory_space<vmem>>, vector<16x144xbf16>
    %cst_12 = arith.constant dense<0.000000e+00> : vector<16x384xf32>
    %35 = tpu.matmul %34, %33, %cst_12 {dimension_numbers = #tpu.dot_dimension_numbers<[1], [0], [0], [1], [0, 0, 1, 1], [], []>} : vector<16x144xbf16>, vector<144x384xbf16>, vector<16x384xf32> -> vector<16x384xf32>
    %c0_13 = arith.constant 0 : index
    %c0_14 = arith.constant 0 : index
    %36 = vector.load %arg6[%c0_13, %c0_14] : memref<16x1xf32, #tpu.memory_space<vmem>>, vector<16x1xf32>
    %37 = vector.broadcast %36 : vector<16x1xf32> to vector<16x384xf32>
    %38 = arith.addf %35, %37 : vector<16x384xf32>
    %39 = vector.broadcast %0 : vector<1x384xf32> to vector<16x384xf32>
    %40 = arith.mulf %38, %39 : vector<16x384xf32>
    %41 = arith.truncf %40 : vector<16x384xf32> to vector<16x384xbf16>
    %cst_15 = arith.constant 0.000000e+00 : bf16
    %42 = vector.broadcast %cst_15 : bf16 to vector<16x25xbf16>
    %cst_16 = arith.constant 0.000000e+00 : bf16
    %43 = vector.broadcast %cst_16 : bf16 to vector<16x103xbf16>
    %44 = tpu.concatenate %42, %41, %43 in 1 : vector<16x25xbf16>, vector<16x384xbf16>, vector<16x103xbf16> -> vector<16x512xbf16>
    %cst_17 = arith.constant 0.000000e+00 : f32
    %45 = vector.broadcast %cst_17 : f32 to vector<16x384xf32>
    %c0_18 = arith.constant 0 : index
    %c0_19 = arith.constant 0 : index
    %46 = vector.load %arg26[%c0_18, %c0_19] : memref<48x512xbf16, #tpu.memory_space<vmem>>, vector<16x512xbf16>
    tpu.vector_store %arg26[%c0_18, %c0_19], %44 {strides = array<i32>} : memref<48x512xbf16, #tpu.memory_space<vmem>>, vector<16x512xbf16>,
    %c0_20 = arith.constant 0 : index
    %c0_21 = arith.constant 0 : index
    %47 = vector.load %arg26[%c0_20, %c0_21] : memref<48x512xbf16, #tpu.memory_space<vmem>>, vector<16x512xbf16>
    %48 = vector.extract_strided_slice %47 {offsets = [0, 0], sizes = [16, 384], strides = [1, 1]} : vector<16x512xbf16> to vector<16x384xbf16>
    %49 = vector.extract_strided_slice %47 {offsets = [0, 1], sizes = [16, 384], strides = [1, 1]} : vector<16x512xbf16> to vector<16x384xbf16>
    %50 = vector.extract_strided_slice %47 {offsets = [0, 2], sizes = [16, 384], strides = [1, 1]} : vector<16x512xbf16> to vector<16x384xbf16>
    %51 = vector.extract_strided_slice %47 {offsets = [0, 24], sizes = [16, 384], strides = [1, 1]} : vector<16x512xbf16> to vector<16x384xbf16>
    %52 = vector.extract_strided_slice %47 {offsets = [0, 25], sizes = [16, 384], strides = [1, 1]} : vector<16x512xbf16> to vector<16x384xbf16>
    %53 = vector.extract_strided_slice %47 {offsets = [0, 26], sizes = [16, 384], strides = [1, 1]} : vector<16x512xbf16> to vector<16x384xbf16>
    %54 = vector.extract_strided_slice %47 {offsets = [0, 48], sizes = [16, 384], strides = [1, 1]} : vector<16x512xbf16> to vector<16x384xbf16>
    %55 = vector.extract_strided_slice %47 {offsets = [0, 49], sizes = [16, 384], strides = [1, 1]} : vector<16x512xbf16> to vector<16x384xbf16>
    %56 = vector.extract_strided_slice %47 {offsets = [0, 50], sizes = [16, 384], strides = [1, 1]} : vector<16x512xbf16> to vector<16x384xbf16>
    %57 = tpu.concatenate %48, %49, %50, %51, %52, %53, %54, %55, %56 in 0 : vector<16x384xbf16>, vector<16x384xbf16>, vector<16x384xbf16>, vector<16x384xbf16>, vector<16x384xbf16>, vector<16x384xbf16>, vector<16x384xbf16>, vector<16x384xbf16>, vector<16x384xbf16> -> vector<144x384xbf16>
    %c0_22 = arith.constant 0 : index
    %c0_23 = arith.constant 0 : index
    %58 = vector.load %arg9[%c0_22, %c0_23] : memref<16x144xbf16, #tpu.memory_space<vmem>>, vector<16x144xbf16>
    %cst_24 = arith.constant dense<0.000000e+00> : vector<16x384xf32>
    %59 = tpu.matmul %58, %57, %cst_24 {dimension_numbers = #tpu.dot_dimension_numbers<[1], [0], [0], [1], [0, 0, 1, 1], [], []>} : vector<16x144xbf16>, vector<144x384xbf16>, vector<16x384xf32> -> vector<16x384xf32>
    %c0_25 = arith.constant 0 : index
    %c0_26 = arith.constant 0 : index
    %60 = vector.load %arg10[%c0_25, %c0_26] : memref<16x1xf32, #tpu.memory_space<vmem>>, vector<16x1xf32>
    %61 = vector.broadcast %60 : vector<16x1xf32> to vector<16x384xf32>
    %62 = arith.addf %59, %61 : vector<16x384xf32>
    %cst_27 = arith.constant 0.000000e+00 : f32
    %63 = vector.broadcast %cst_27 : f32 to vector<16x384xf32>
    %64 = arith.maximumf %62, %63 : vector<16x384xf32>
    %65 = vector.broadcast %0 : vector<1x384xf32> to vector<16x384xf32>
    %66 = arith.mulf %64, %65 : vector<16x384xf32>
    %67 = arith.truncf %66 : vector<16x384xf32> to vector<16x384xbf16>
    %cst_28 = arith.constant 0.000000e+00 : bf16
    %68 = vector.broadcast %cst_28 : bf16 to vector<16x25xbf16>
    %cst_29 = arith.constant 0.000000e+00 : bf16
    %69 = vector.broadcast %cst_29 : bf16 to vector<16x103xbf16>
    %70 = tpu.concatenate %68, %67, %69 in 1 : vector<16x25xbf16>, vector<16x384xbf16>, vector<16x103xbf16> -> vector<16x512xbf16>
    %c16 = arith.constant 16 : index
    %c0_30 = arith.constant 0 : index
    %71 = vector.load %arg26[%c16, %c0_30] : memref<48x512xbf16, #tpu.memory_space<vmem>>, vector<16x512xbf16>
    tpu.vector_store %arg26[%c16, %c0_30], %70 {strides = array<i32>} : memref<48x512xbf16, #tpu.memory_space<vmem>>, vector<16x512xbf16>,
    %c0_31 = arith.constant 0 : index
    %c0_32 = arith.constant 0 : index
    %72 = vector.load %arg26[%c0_31, %c0_32] : memref<48x512xbf16, #tpu.memory_space<vmem>>, vector<32x512xbf16>
    %73 = vector.extract_strided_slice %72 {offsets = [0, 0], sizes = [32, 384], strides = [1, 1]} : vector<32x512xbf16> to vector<32x384xbf16>
    %74 = vector.extract_strided_slice %72 {offsets = [0, 1], sizes = [32, 384], strides = [1, 1]} : vector<32x512xbf16> to vector<32x384xbf16>
    %75 = vector.extract_strided_slice %72 {offsets = [0, 2], sizes = [32, 384], strides = [1, 1]} : vector<32x512xbf16> to vector<32x384xbf16>
    %76 = vector.extract_strided_slice %72 {offsets = [0, 24], sizes = [32, 384], strides = [1, 1]} : vector<32x512xbf16> to vector<32x384xbf16>
    %77 = vector.extract_strided_slice %72 {offsets = [0, 25], sizes = [32, 384], strides = [1, 1]} : vector<32x512xbf16> to vector<32x384xbf16>
    %78 = vector.extract_strided_slice %72 {offsets = [0, 26], sizes = [32, 384], strides = [1, 1]} : vector<32x512xbf16> to vector<32x384xbf16>
    %79 = vector.extract_strided_slice %72 {offsets = [0, 48], sizes = [32, 384], strides = [1, 1]} : vector<32x512xbf16> to vector<32x384xbf16>
    %80 = vector.extract_strided_slice %72 {offsets = [0, 49], sizes = [32, 384], strides = [1, 1]} : vector<32x512xbf16> to vector<32x384xbf16>
    %81 = vector.extract_strided_slice %72 {offsets = [0, 50], sizes = [32, 384], strides = [1, 1]} : vector<32x512xbf16> to vector<32x384xbf16>
    %82 = tpu.concatenate %73, %74, %75, %76, %77, %78, %79, %80, %81 in 0 : vector<32x384xbf16>, vector<32x384xbf16>, vector<32x384xbf16>, vector<32x384xbf16>, vector<32x384xbf16>, vector<32x384xbf16>, vector<32x384xbf16>, vector<32x384xbf16>, vector<32x384xbf16> -> vector<288x384xbf16>
    %c0_33 = arith.constant 0 : index
    %c0_34 = arith.constant 0 : index
    %83 = vector.load %arg11[%c0_33, %c0_34] : memref<16x288xbf16, #tpu.memory_space<vmem>>, vector<16x288xbf16>
    %cst_35 = arith.constant dense<0.000000e+00> : vector<16x384xf32>
    %84 = tpu.matmul %83, %82, %cst_35 {dimension_numbers = #tpu.dot_dimension_numbers<[1], [0], [0], [1], [0, 0, 1, 1], [], []>} : vector<16x288xbf16>, vector<288x384xbf16>, vector<16x384xf32> -> vector<16x384xf32>
    %c0_36 = arith.constant 0 : index
    %c0_37 = arith.constant 0 : index
    %85 = vector.load %arg12[%c0_36, %c0_37] : memref<16x1xf32, #tpu.memory_space<vmem>>, vector<16x1xf32>
    %86 = vector.broadcast %85 : vector<16x1xf32> to vector<16x384xf32>
    %87 = arith.addf %84, %86 : vector<16x384xf32>
    %cst_38 = arith.constant 0.000000e+00 : f32
    %88 = vector.broadcast %cst_38 : f32 to vector<16x384xf32>
    %89 = arith.maximumf %87, %88 : vector<16x384xf32>
    %90 = vector.broadcast %0 : vector<1x384xf32> to vector<16x384xf32>
    %91 = arith.mulf %89, %90 : vector<16x384xf32>
    %92 = arith.truncf %91 : vector<16x384xf32> to vector<16x384xbf16>
    %cst_39 = arith.constant 0.000000e+00 : bf16
    %93 = vector.broadcast %cst_39 : bf16 to vector<16x25xbf16>
    %cst_40 = arith.constant 0.000000e+00 : bf16
    %94 = vector.broadcast %cst_40 : bf16 to vector<16x103xbf16>
    %95 = tpu.concatenate %93, %92, %94 in 1 : vector<16x25xbf16>, vector<16x384xbf16>, vector<16x103xbf16> -> vector<16x512xbf16>
    %c32 = arith.constant 32 : index
    %c0_41 = arith.constant 0 : index
    %96 = vector.load %arg26[%c32, %c0_41] : memref<48x512xbf16, #tpu.memory_space<vmem>>, vector<16x512xbf16>
    tpu.vector_store %arg26[%c32, %c0_41], %95 {strides = array<i32>} : memref<48x512xbf16, #tpu.memory_space<vmem>>, vector<16x512xbf16>,
    %c0_42 = arith.constant 0 : index
    %c0_43 = arith.constant 0 : index
    %97 = vector.load %arg26[%c0_42, %c0_43] : memref<48x512xbf16, #tpu.memory_space<vmem>>, vector<48x512xbf16>
    %c0_44 = arith.constant 0 : index
    %c0_45 = arith.constant 0 : index
    %98 = vector.load %arg13[%c0_44, %c0_45] : memref<16x48xbf16, #tpu.memory_space<vmem>>, vector<16x48xbf16>
    %99 = vector.extract_strided_slice %97 {offsets = [0, 25], sizes = [48, 384], strides = [1, 1]} : vector<48x512xbf16> to vector<48x384xbf16>
    %cst_46 = arith.constant dense<0.000000e+00> : vector<16x384xf32>
    %100 = tpu.matmul %98, %99, %cst_46 {dimension_numbers = #tpu.dot_dimension_numbers<[1], [0], [0], [1], [0, 0, 1, 1], [], []>} : vector<16x48xbf16>, vector<48x384xbf16>, vector<16x384xf32> -> vector<16x384xf32>
    %c0_47 = arith.constant 0 : index
    %c0_48 = arith.constant 0 : index
    %101 = vector.load %arg14[%c0_47, %c0_48] : memref<16x1xf32, #tpu.memory_space<vmem>>, vector<16x1xf32>
    %102 = vector.broadcast %101 : vector<16x1xf32> to vector<16x384xf32>
    %103 = arith.addf %100, %102 : vector<16x384xf32>
    %104 = vector.extract_strided_slice %44 {offsets = [0, 25], sizes = [16, 384], strides = [1, 1]} : vector<16x512xbf16> to vector<16x384xbf16>
    %105 = arith.extf %104 : vector<16x384xbf16> to vector<16x384xf32>
    %106 = arith.addf %103, %105 : vector<16x384xf32>
    %107 = vector.broadcast %0 : vector<1x384xf32> to vector<16x384xf32>
    %108 = arith.mulf %106, %107 : vector<16x384xf32>
    %109 = arith.truncf %108 : vector<16x384xf32> to vector<16x384xbf16>
    %cst_49 = arith.constant 0.000000e+00 : bf16
    %110 = vector.broadcast %cst_49 : bf16 to vector<16x25xbf16>
    %cst_50 = arith.constant 0.000000e+00 : bf16
    %111 = vector.broadcast %cst_50 : bf16 to vector<16x103xbf16>
    %112 = tpu.concatenate %110, %109, %111 in 1 : vector<16x25xbf16>, vector<16x384xbf16>, vector<16x103xbf16> -> vector<16x512xbf16>
    %c0_51 = arith.constant 0 : index
    %c0_52 = arith.constant 0 : index
    %c0_53 = arith.constant 0 : index
    %113 = vector.load %arg7[%c0_51, %c0_52, %c0_53] : memref<2x16x16xbf16, #tpu.memory_space<vmem>>, vector<1x16x16xbf16>
    %114 = vector.shape_cast %113 : vector<1x16x16xbf16> to vector<16x16xbf16>
    %115 = vector.extract_strided_slice %112 {offsets = [0, 25], sizes = [16, 384], strides = [1, 1]} : vector<16x512xbf16> to vector<16x384xbf16>
    %cst_54 = arith.constant dense<0.000000e+00> : vector<16x384xf32>
    %116 = tpu.matmul %114, %115, %cst_54 {dimension_numbers = #tpu.dot_dimension_numbers<[1], [0], [0], [1], [0, 0, 1, 1], [], []>} : vector<16x16xbf16>, vector<16x384xbf16>, vector<16x384xf32> -> vector<16x384xf32>
    %117 = arith.addf %45, %116 : vector<16x384xf32>
    %c0_55 = arith.constant 0 : index
    %c0_56 = arith.constant 0 : index
    %118 = vector.load %arg26[%c0_55, %c0_56] : memref<48x512xbf16, #tpu.memory_space<vmem>>, vector<16x512xbf16>
    tpu.vector_store %arg26[%c0_55, %c0_56], %112 {strides = array<i32>} : memref<48x512xbf16, #tpu.memory_space<vmem>>, vector<16x512xbf16>,
    %c0_57 = arith.constant 0 : index
    %c0_58 = arith.constant 0 : index
    %119 = vector.load %arg26[%c0_57, %c0_58] : memref<48x512xbf16, #tpu.memory_space<vmem>>, vector<16x512xbf16>
    %120 = vector.extract_strided_slice %119 {offsets = [0, 0], sizes = [16, 384], strides = [1, 1]} : vector<16x512xbf16> to vector<16x384xbf16>
    %121 = vector.extract_strided_slice %119 {offsets = [0, 1], sizes = [16, 384], strides = [1, 1]} : vector<16x512xbf16> to vector<16x384xbf16>
    %122 = vector.extract_strided_slice %119 {offsets = [0, 2], sizes = [16, 384], strides = [1, 1]} : vector<16x512xbf16> to vector<16x384xbf16>
    %123 = vector.extract_strided_slice %119 {offsets = [0, 24], sizes = [16, 384], strides = [1, 1]} : vector<16x512xbf16> to vector<16x384xbf16>
    %124 = vector.extract_strided_slice %119 {offsets = [0, 25], sizes = [16, 384], strides = [1, 1]} : vector<16x512xbf16> to vector<16x384xbf16>
    %125 = vector.extract_strided_slice %119 {offsets = [0, 26], sizes = [16, 384], strides = [1, 1]} : vector<16x512xbf16> to vector<16x384xbf16>
    %126 = vector.extract_strided_slice %119 {offsets = [0, 48], sizes = [16, 384], strides = [1, 1]} : vector<16x512xbf16> to vector<16x384xbf16>
    %127 = vector.extract_strided_slice %119 {offsets = [0, 49], sizes = [16, 384], strides = [1, 1]} : vector<16x512xbf16> to vector<16x384xbf16>
    %128 = vector.extract_strided_slice %119 {offsets = [0, 50], sizes = [16, 384], strides = [1, 1]} : vector<16x512xbf16> to vector<16x384xbf16>
    %129 = tpu.concatenate %120, %121, %122, %123, %124, %125, %126, %127, %128 in 0 : vector<16x384xbf16>, vector<16x384xbf16>, vector<16x384xbf16>, vector<16x384xbf16>, vector<16x384xbf16>, vector<16x384xbf16>, vector<16x384xbf16>, vector<16x384xbf16>, vector<16x384xbf16> -> vector<144x384xbf16>
    %c0_59 = arith.constant 0 : index
    %c0_60 = arith.constant 0 : index
    %130 = vector.load %arg15[%c0_59, %c0_60] : memref<16x144xbf16, #tpu.memory_space<vmem>>, vector<16x144xbf16>
    %cst_61 = arith.constant dense<0.000000e+00> : vector<16x384xf32>
    %131 = tpu.matmul %130, %129, %cst_61 {dimension_numbers = #tpu.dot_dimension_numbers<[1], [0], [0], [1], [0, 0, 1, 1], [], []>} : vector<16x144xbf16>, vector<144x384xbf16>, vector<16x384xf32> -> vector<16x384xf32>
    %c0_62 = arith.constant 0 : index
    %c0_63 = arith.constant 0 : index
    %132 = vector.load %arg16[%c0_62, %c0_63] : memref<16x1xf32, #tpu.memory_space<vmem>>, vector<16x1xf32>
    %133 = vector.broadcast %132 : vector<16x1xf32> to vector<16x384xf32>
    %134 = arith.addf %131, %133 : vector<16x384xf32>
    %cst_64 = arith.constant 0.000000e+00 : f32
    %135 = vector.broadcast %cst_64 : f32 to vector<16x384xf32>
    %136 = arith.maximumf %134, %135 : vector<16x384xf32>
    %137 = vector.broadcast %0 : vector<1x384xf32> to vector<16x384xf32>
    %138 = arith.mulf %136, %137 : vector<16x384xf32>
    %139 = arith.truncf %138 : vector<16x384xf32> to vector<16x384xbf16>
    %cst_65 = arith.constant 0.000000e+00 : bf16
    %140 = vector.broadcast %cst_65 : bf16 to vector<16x25xbf16>
    %cst_66 = arith.constant 0.000000e+00 : bf16
    %141 = vector.broadcast %cst_66 : bf16 to vector<16x103xbf16>
    %142 = tpu.concatenate %140, %139, %141 in 1 : vector<16x25xbf16>, vector<16x384xbf16>, vector<16x103xbf16> -> vector<16x512xbf16>
    %c16_67 = arith.constant 16 : index
    %c0_68 = arith.constant 0 : index
    %143 = vector.load %arg26[%c16_67, %c0_68] : memref<48x512xbf16, #tpu.memory_space<vmem>>, vector<16x512xbf16>
    tpu.vector_store %arg26[%c16_67, %c0_68], %142 {strides = array<i32>} : memref<48x512xbf16, #tpu.memory_space<vmem>>, vector<16x512xbf16>,
    %c0_69 = arith.constant 0 : index
    %c0_70 = arith.constant 0 : index
    %144 = vector.load %arg26[%c0_69, %c0_70] : memref<48x512xbf16, #tpu.memory_space<vmem>>, vector<32x512xbf16>
    %145 = vector.extract_strided_slice %144 {offsets = [0, 0], sizes = [32, 384], strides = [1, 1]} : vector<32x512xbf16> to vector<32x384xbf16>
    %146 = vector.extract_strided_slice %144 {offsets = [0, 1], sizes = [32, 384], strides = [1, 1]} : vector<32x512xbf16> to vector<32x384xbf16>
    %147 = vector.extract_strided_slice %144 {offsets = [0, 2], sizes = [32, 384], strides = [1, 1]} : vector<32x512xbf16> to vector<32x384xbf16>
    %148 = vector.extract_strided_slice %144 {offsets = [0, 24], sizes = [32, 384], strides = [1, 1]} : vector<32x512xbf16> to vector<32x384xbf16>
    %149 = vector.extract_strided_slice %144 {offsets = [0, 25], sizes = [32, 384], strides = [1, 1]} : vector<32x512xbf16> to vector<32x384xbf16>
    %150 = vector.extract_strided_slice %144 {offsets = [0, 26], sizes = [32, 384], strides = [1, 1]} : vector<32x512xbf16> to vector<32x384xbf16>
    %151 = vector.extract_strided_slice %144 {offsets = [0, 48], sizes = [32, 384], strides = [1, 1]} : vector<32x512xbf16> to vector<32x384xbf16>
    %152 = vector.extract_strided_slice %144 {offsets = [0, 49], sizes = [32, 384], strides = [1, 1]} : vector<32x512xbf16> to vector<32x384xbf16>
    %153 = vector.extract_strided_slice %144 {offsets = [0, 50], sizes = [32, 384], strides = [1, 1]} : vector<32x512xbf16> to vector<32x384xbf16>
    %154 = tpu.concatenate %145, %146, %147, %148, %149, %150, %151, %152, %153 in 0 : vector<32x384xbf16>, vector<32x384xbf16>, vector<32x384xbf16>, vector<32x384xbf16>, vector<32x384xbf16>, vector<32x384xbf16>, vector<32x384xbf16>, vector<32x384xbf16>, vector<32x384xbf16> -> vector<288x384xbf16>
    %c0_71 = arith.constant 0 : index
    %c0_72 = arith.constant 0 : index
    %155 = vector.load %arg17[%c0_71, %c0_72] : memref<16x288xbf16, #tpu.memory_space<vmem>>, vector<16x288xbf16>
    %cst_73 = arith.constant dense<0.000000e+00> : vector<16x384xf32>
    %156 = tpu.matmul %155, %154, %cst_73 {dimension_numbers = #tpu.dot_dimension_numbers<[1], [0], [0], [1], [0, 0, 1, 1], [], []>} : vector<16x288xbf16>, vector<288x384xbf16>, vector<16x384xf32> -> vector<16x384xf32>
    %c0_74 = arith.constant 0 : index
    %c0_75 = arith.constant 0 : index
    %157 = vector.load %arg18[%c0_74, %c0_75] : memref<16x1xf32, #tpu.memory_space<vmem>>, vector<16x1xf32>
    %158 = vector.broadcast %157 : vector<16x1xf32> to vector<16x384xf32>
    %159 = arith.addf %156, %158 : vector<16x384xf32>
    %cst_76 = arith.constant 0.000000e+00 : f32
    %160 = vector.broadcast %cst_76 : f32 to vector<16x384xf32>
    %161 = arith.maximumf %159, %160 : vector<16x384xf32>
    %162 = vector.broadcast %0 : vector<1x384xf32> to vector<16x384xf32>
    %163 = arith.mulf %161, %162 : vector<16x384xf32>
    %164 = arith.truncf %163 : vector<16x384xf32> to vector<16x384xbf16>
    %cst_77 = arith.constant 0.000000e+00 : bf16
    %165 = vector.broadcast %cst_77 : bf16 to vector<16x25xbf16>
    %cst_78 = arith.constant 0.000000e+00 : bf16
    %166 = vector.broadcast %cst_78 : bf16 to vector<16x103xbf16>
    %167 = tpu.concatenate %165, %164, %166 in 1 : vector<16x25xbf16>, vector<16x384xbf16>, vector<16x103xbf16> -> vector<16x512xbf16>
    %c32_79 = arith.constant 32 : index
    %c0_80 = arith.constant 0 : index
    %168 = vector.load %arg26[%c32_79, %c0_80] : memref<48x512xbf16, #tpu.memory_space<vmem>>, vector<16x512xbf16>
    tpu.vector_store %arg26[%c32_79, %c0_80], %167 {strides = array<i32>} : memref<48x512xbf16, #tpu.memory_space<vmem>>, vector<16x512xbf16>,
    %c0_81 = arith.constant 0 : index
    %c0_82 = arith.constant 0 : index
    %169 = vector.load %arg26[%c0_81, %c0_82] : memref<48x512xbf16, #tpu.memory_space<vmem>>, vector<48x512xbf16>
    %c0_83 = arith.constant 0 : index
    %c0_84 = arith.constant 0 : index
    %170 = vector.load %arg19[%c0_83, %c0_84] : memref<16x48xbf16, #tpu.memory_space<vmem>>, vector<16x48xbf16>
    %171 = vector.extract_strided_slice %169 {offsets = [0, 25], sizes = [48, 384], strides = [1, 1]} : vector<48x512xbf16> to vector<48x384xbf16>
    %cst_85 = arith.constant dense<0.000000e+00> : vector<16x384xf32>
    %172 = tpu.matmul %170, %171, %cst_85 {dimension_numbers = #tpu.dot_dimension_numbers<[1], [0], [0], [1], [0, 0, 1, 1], [], []>} : vector<16x48xbf16>, vector<48x384xbf16>, vector<16x384xf32> -> vector<16x384xf32>
    %c0_86 = arith.constant 0 : index
    %c0_87 = arith.constant 0 : index
    %173 = vector.load %arg20[%c0_86, %c0_87] : memref<16x1xf32, #tpu.memory_space<vmem>>, vector<16x1xf32>
    %174 = vector.broadcast %173 : vector<16x1xf32> to vector<16x384xf32>
    %175 = arith.addf %172, %174 : vector<16x384xf32>
    %176 = vector.extract_strided_slice %112 {offsets = [0, 25], sizes = [16, 384], strides = [1, 1]} : vector<16x512xbf16> to vector<16x384xbf16>
    %177 = arith.extf %176 : vector<16x384xbf16> to vector<16x384xf32>
    %178 = arith.addf %175, %177 : vector<16x384xf32>
    %179 = vector.broadcast %0 : vector<1x384xf32> to vector<16x384xf32>
    %180 = arith.mulf %178, %179 : vector<16x384xf32>
    %181 = arith.truncf %180 : vector<16x384xf32> to vector<16x384xbf16>
    %cst_88 = arith.constant 0.000000e+00 : bf16
    %182 = vector.broadcast %cst_88 : bf16 to vector<16x25xbf16>
    %cst_89 = arith.constant 0.000000e+00 : bf16
    %183 = vector.broadcast %cst_89 : bf16 to vector<16x103xbf16>
    %184 = tpu.concatenate %182, %181, %183 in 1 : vector<16x25xbf16>, vector<16x384xbf16>, vector<16x103xbf16> -> vector<16x512xbf16>
    %c1 = arith.constant 1 : index
    %c0_90 = arith.constant 0 : index
    %c0_91 = arith.constant 0 : index
    %185 = vector.load %arg7[%c1, %c0_90, %c0_91] : memref<2x16x16xbf16, #tpu.memory_space<vmem>>, vector<1x16x16xbf16>
    %186 = vector.shape_cast %185 : vector<1x16x16xbf16> to vector<16x16xbf16>
    %187 = vector.extract_strided_slice %184 {offsets = [0, 25], sizes = [16, 384], strides = [1, 1]} : vector<16x512xbf16> to vector<16x384xbf16>
    %cst_92 = arith.constant dense<0.000000e+00> : vector<16x384xf32>
    %188 = tpu.matmul %186, %187, %cst_92 {dimension_numbers = #tpu.dot_dimension_numbers<[1], [0], [0], [1], [0, 0, 1, 1], [], []>} : vector<16x16xbf16>, vector<16x384xbf16>, vector<16x384xf32> -> vector<16x384xf32>
    %189 = arith.addf %117, %188 : vector<16x384xf32>
    %c0_93 = arith.constant 0 : index
    %c0_94 = arith.constant 0 : index
    %190 = vector.load %arg8[%c0_93, %c0_94] : memref<16x1xf32, #tpu.memory_space<vmem>>, vector<16x1xf32>
    %191 = vector.broadcast %190 : vector<16x1xf32> to vector<16x384xf32>
    %192 = arith.addf %189, %191 : vector<16x384xf32>
    %193 = vector.broadcast %0 : vector<1x384xf32> to vector<16x384xf32>
    %194 = arith.mulf %192, %193 : vector<16x384xf32>
    %195 = arith.truncf %194 : vector<16x384xf32> to vector<16x384xbf16>
    %cst_95 = arith.constant 0.000000e+00 : bf16
    %196 = vector.broadcast %cst_95 : bf16 to vector<16x25xbf16>
    %cst_96 = arith.constant 0.000000e+00 : bf16
    %197 = vector.broadcast %cst_96 : bf16 to vector<16x103xbf16>
    %198 = tpu.concatenate %196, %195, %197 in 1 : vector<16x25xbf16>, vector<16x384xbf16>, vector<16x103xbf16> -> vector<16x512xbf16>
    %199 = vector.extract_strided_slice %198 {offsets = [0, 0], sizes = [16, 384], strides = [1, 1]} : vector<16x512xbf16> to vector<16x384xbf16>
    %200 = vector.extract_strided_slice %198 {offsets = [0, 1], sizes = [16, 384], strides = [1, 1]} : vector<16x512xbf16> to vector<16x384xbf16>
    %201 = vector.extract_strided_slice %198 {offsets = [0, 2], sizes = [16, 384], strides = [1, 1]} : vector<16x512xbf16> to vector<16x384xbf16>
    %202 = vector.extract_strided_slice %198 {offsets = [0, 24], sizes = [16, 384], strides = [1, 1]} : vector<16x512xbf16> to vector<16x384xbf16>
    %203 = vector.extract_strided_slice %198 {offsets = [0, 25], sizes = [16, 384], strides = [1, 1]} : vector<16x512xbf16> to vector<16x384xbf16>
    %204 = vector.extract_strided_slice %198 {offsets = [0, 26], sizes = [16, 384], strides = [1, 1]} : vector<16x512xbf16> to vector<16x384xbf16>
    %205 = vector.extract_strided_slice %198 {offsets = [0, 48], sizes = [16, 384], strides = [1, 1]} : vector<16x512xbf16> to vector<16x384xbf16>
    %206 = vector.extract_strided_slice %198 {offsets = [0, 49], sizes = [16, 384], strides = [1, 1]} : vector<16x512xbf16> to vector<16x384xbf16>
    %207 = vector.extract_strided_slice %198 {offsets = [0, 50], sizes = [16, 384], strides = [1, 1]} : vector<16x512xbf16> to vector<16x384xbf16>
    %208 = tpu.concatenate %199, %200, %201, %202, %203, %204, %205, %206, %207 in 0 : vector<16x384xbf16>, vector<16x384xbf16>, vector<16x384xbf16>, vector<16x384xbf16>, vector<16x384xbf16>, vector<16x384xbf16>, vector<16x384xbf16>, vector<16x384xbf16>, vector<16x384xbf16> -> vector<144x384xbf16>
    %c0_97 = arith.constant 0 : index
    %c0_98 = arith.constant 0 : index
    %209 = vector.load %arg21[%c0_97, %c0_98] : memref<16x144xbf16, #tpu.memory_space<vmem>>, vector<16x144xbf16>
    %cst_99 = arith.constant dense<0.000000e+00> : vector<16x384xf32>
    %210 = tpu.matmul %209, %208, %cst_99 {dimension_numbers = #tpu.dot_dimension_numbers<[1], [0], [0], [1], [0, 0, 1, 1], [], []>} : vector<16x144xbf16>, vector<144x384xbf16>, vector<16x384xf32> -> vector<16x384xf32>
    %c0_100 = arith.constant 0 : index
    %c0_101 = arith.constant 0 : index
    %211 = vector.load %arg22[%c0_100, %c0_101] : memref<16x1xf32, #tpu.memory_space<vmem>>, vector<16x1xf32>
    %212 = vector.broadcast %211 : vector<16x1xf32> to vector<16x384xf32>
    %213 = arith.addf %210, %212 : vector<16x384xf32>
    %214 = arith.addf %213, %19 : vector<16x384xf32>
    %215 = vector.broadcast %0 : vector<1x384xf32> to vector<16x384xf32>
    %216 = arith.mulf %214, %215 : vector<16x384xf32>
    %217 = arith.truncf %216 : vector<16x384xf32> to vector<16x384xbf16>
    %cst_102 = arith.constant 0.000000e+00 : bf16
    %218 = vector.broadcast %cst_102 : bf16 to vector<16x25xbf16>
    %cst_103 = arith.constant 0.000000e+00 : bf16
    %219 = vector.broadcast %cst_103 : bf16 to vector<16x103xbf16>
    %220 = tpu.concatenate %218, %217, %219 in 1 : vector<16x25xbf16>, vector<16x384xbf16>, vector<16x103xbf16> -> vector<16x512xbf16>
    %221 = vector.extract_strided_slice %220 {offsets = [0, 0], sizes = [16, 384], strides = [1, 1]} : vector<16x512xbf16> to vector<16x384xbf16>
    %222 = vector.extract_strided_slice %220 {offsets = [0, 1], sizes = [16, 384], strides = [1, 1]} : vector<16x512xbf16> to vector<16x384xbf16>
    %223 = vector.extract_strided_slice %220 {offsets = [0, 2], sizes = [16, 384], strides = [1, 1]} : vector<16x512xbf16> to vector<16x384xbf16>
    %224 = vector.extract_strided_slice %220 {offsets = [0, 24], sizes = [16, 384], strides = [1, 1]} : vector<16x512xbf16> to vector<16x384xbf16>
    %225 = vector.extract_strided_slice %220 {offsets = [0, 25], sizes = [16, 384], strides = [1, 1]} : vector<16x512xbf16> to vector<16x384xbf16>
    %226 = vector.extract_strided_slice %220 {offsets = [0, 26], sizes = [16, 384], strides = [1, 1]} : vector<16x512xbf16> to vector<16x384xbf16>
    %227 = vector.extract_strided_slice %220 {offsets = [0, 48], sizes = [16, 384], strides = [1, 1]} : vector<16x512xbf16> to vector<16x384xbf16>
    %228 = vector.extract_strided_slice %220 {offsets = [0, 49], sizes = [16, 384], strides = [1, 1]} : vector<16x512xbf16> to vector<16x384xbf16>
    %229 = vector.extract_strided_slice %220 {offsets = [0, 50], sizes = [16, 384], strides = [1, 1]} : vector<16x512xbf16> to vector<16x384xbf16>
    %230 = tpu.concatenate %221, %222, %223, %224, %225, %226, %227, %228, %229 in 0 : vector<16x384xbf16>, vector<16x384xbf16>, vector<16x384xbf16>, vector<16x384xbf16>, vector<16x384xbf16>, vector<16x384xbf16>, vector<16x384xbf16>, vector<16x384xbf16>, vector<16x384xbf16> -> vector<144x384xbf16>
    %c0_104 = arith.constant 0 : index
    %c0_105 = arith.constant 0 : index
    %231 = vector.load %arg23[%c0_104, %c0_105] : memref<64x144xbf16, #tpu.memory_space<vmem>>, vector<64x144xbf16>
    %cst_106 = arith.constant dense<0.000000e+00> : vector<64x384xf32>
    %232 = tpu.matmul %231, %230, %cst_106 {dimension_numbers = #tpu.dot_dimension_numbers<[1], [0], [0], [1], [0, 0, 1, 1], [], []>} : vector<64x144xbf16>, vector<144x384xbf16>, vector<64x384xf32> -> vector<64x384xf32>
    %c0_107 = arith.constant 0 : index
    %c0_108 = arith.constant 0 : index
    %233 = vector.load %arg24[%c0_107, %c0_108] : memref<64x1xf32, #tpu.memory_space<vmem>>, vector<64x1xf32>
    %234 = vector.broadcast %233 : vector<64x1xf32> to vector<64x384xf32>
    %235 = arith.addf %232, %234 : vector<64x384xf32>
    %c0_109 = arith.constant 0 : index
    %c0_110 = arith.constant 0 : index
    %c0_111 = arith.constant 0 : index
    %236 = vector.load %arg25[%c0_109, %c0_110, %c0_111] : memref<1x64x384xf32, #tpu.memory_space<vmem>>, vector<1x64x384xf32>
    %237 = vector.shape_cast %236 : vector<1x64x384xf32> to vector<64x384xf32>
    %238 = vector.shape_cast %235 : vector<64x384xf32> to vector<1x64x384xf32>
    tpu.vector_store %arg25[%c0_109, %c0_110, %c0_111], %238 {strides = array<i32>} : memref<1x64x384xf32, #tpu.memory_space<vmem>>, vector<1x64x384xf32>,
    return
  }
  func.func @transform_0(%arg0: i32) -> (i32, i32, i32) {
    %c0_i32 = arith.constant 0 : i32
    %c0_i32_0 = arith.constant 0 : i32
    %c0_i32_1 = arith.constant 0 : i32
    return %arg0, %c0_i32, %c0_i32_0 : i32, i32, i32
  }
  func.func @transform_1(%arg0: i32) -> (i32, i32) {
    %c0_i32 = arith.constant 0 : i32
    %c0_i32_0 = arith.constant 0 : i32
    %c0_i32_1 = arith.constant 0 : i32
    return %c0_i32, %c0_i32_0 : i32, i32
  }
  func.func @transform_2(%arg0: i32) -> (i32, i32) {
    %c0_i32 = arith.constant 0 : i32
    %c0_i32_0 = arith.constant 0 : i32
    %c0_i32_1 = arith.constant 0 : i32
    return %c0_i32, %c0_i32_0 : i32, i32
  }
  func.func @transform_3(%arg0: i32) -> (i32, i32) {
    %c0_i32 = arith.constant 0 : i32
    %c0_i32_0 = arith.constant 0 : i32
    %c0_i32_1 = arith.constant 0 : i32
    return %c0_i32, %c0_i32_0 : i32, i32
  }
  func.func @transform_4(%arg0: i32) -> (i32, i32) {
    %c0_i32 = arith.constant 0 : i32
    %c0_i32_0 = arith.constant 0 : i32
    %c0_i32_1 = arith.constant 0 : i32
    return %c0_i32, %c0_i32_0 : i32, i32
  }
  func.func @transform_5(%arg0: i32) -> (i32, i32) {
    %c0_i32 = arith.constant 0 : i32
    %c0_i32_0 = arith.constant 0 : i32
    %c0_i32_1 = arith.constant 0 : i32
    return %c0_i32, %c0_i32_0 : i32, i32
  }
  func.func @transform_6(%arg0: i32) -> (i32, i32, i32) {
    %c0_i32 = arith.constant 0 : i32
    %c0_i32_0 = arith.constant 0 : i32
    %c0_i32_1 = arith.constant 0 : i32
    %c0_i32_2 = arith.constant 0 : i32
    return %c0_i32, %c0_i32_0, %c0_i32_1 : i32, i32, i32
  }
  func.func @transform_7(%arg0: i32) -> (i32, i32) {
    %c0_i32 = arith.constant 0 : i32
    %c0_i32_0 = arith.constant 0 : i32
    %c0_i32_1 = arith.constant 0 : i32
    return %c0_i32, %c0_i32_0 : i32, i32
  }
  func.func @transform_8(%arg0: i32) -> (i32, i32) {
    %c0_i32 = arith.constant 0 : i32
    %c0_i32_0 = arith.constant 0 : i32
    %c0_i32_1 = arith.constant 0 : i32
    return %c0_i32, %c0_i32_0 : i32, i32
  }
  func.func @transform_9(%arg0: i32) -> (i32, i32) {
    %c0_i32 = arith.constant 0 : i32
    %c0_i32_0 = arith.constant 0 : i32
    %c0_i32_1 = arith.constant 0 : i32
    return %c0_i32, %c0_i32_0 : i32, i32
  }
  func.func @transform_10(%arg0: i32) -> (i32, i32) {
    %c0_i32 = arith.constant 0 : i32
    %c0_i32_0 = arith.constant 0 : i32
    %c0_i32_1 = arith.constant 0 : i32
    return %c0_i32, %c0_i32_0 : i32, i32
  }
  func.func @transform_11(%arg0: i32) -> (i32, i32) {
    %c0_i32 = arith.constant 0 : i32
    %c0_i32_0 = arith.constant 0 : i32
    %c0_i32_1 = arith.constant 0 : i32
    return %c0_i32, %c0_i32_0 : i32, i32
  }
  func.func @transform_12(%arg0: i32) -> (i32, i32) {
    %c0_i32 = arith.constant 0 : i32
    %c0_i32_0 = arith.constant 0 : i32
    %c0_i32_1 = arith.constant 0 : i32
    return %c0_i32, %c0_i32_0 : i32, i32
  }
  func.func @transform_13(%arg0: i32) -> (i32, i32) {
    %c0_i32 = arith.constant 0 : i32
    %c0_i32_0 = arith.constant 0 : i32
    %c0_i32_1 = arith.constant 0 : i32
    return %c0_i32, %c0_i32_0 : i32, i32
  }
  func.func @transform_14(%arg0: i32) -> (i32, i32) {
    %c0_i32 = arith.constant 0 : i32
    %c0_i32_0 = arith.constant 0 : i32
    %c0_i32_1 = arith.constant 0 : i32
    return %c0_i32, %c0_i32_0 : i32, i32
  }
  func.func @transform_15(%arg0: i32) -> (i32, i32) {
    %c0_i32 = arith.constant 0 : i32
    %c0_i32_0 = arith.constant 0 : i32
    %c0_i32_1 = arith.constant 0 : i32
    return %c0_i32, %c0_i32_0 : i32, i32
  }
  func.func @transform_16(%arg0: i32) -> (i32, i32) {
    %c0_i32 = arith.constant 0 : i32
    %c0_i32_0 = arith.constant 0 : i32
    %c0_i32_1 = arith.constant 0 : i32
    return %c0_i32, %c0_i32_0 : i32, i32
  }
  func.func @transform_17(%arg0: i32) -> (i32, i32) {
    %c0_i32 = arith.constant 0 : i32
    %c0_i32_0 = arith.constant 0 : i32
    %c0_i32_1 = arith.constant 0 : i32
    return %c0_i32, %c0_i32_0 : i32, i32
  }
  func.func @transform_18(%arg0: i32) -> (i32, i32) {
    %c0_i32 = arith.constant 0 : i32
    %c0_i32_0 = arith.constant 0 : i32
    %c0_i32_1 = arith.constant 0 : i32
    return %c0_i32, %c0_i32_0 : i32, i32
  }
  func.func @transform_19(%arg0: i32) -> (i32, i32) {
    %c0_i32 = arith.constant 0 : i32
    %c0_i32_0 = arith.constant 0 : i32
    %c0_i32_1 = arith.constant 0 : i32
    return %c0_i32, %c0_i32_0 : i32, i32
  }
  func.func @transform_20(%arg0: i32) -> (i32, i32) {
    %c0_i32 = arith.constant 0 : i32
    %c0_i32_0 = arith.constant 0 : i32
    %c0_i32_1 = arith.constant 0 : i32
    return %c0_i32, %c0_i32_0 : i32, i32
  }
  func.func @transform_21(%arg0: i32) -> (i32, i32) {
    %c0_i32 = arith.constant 0 : i32
    %c0_i32_0 = arith.constant 0 : i32
    %c0_i32_1 = arith.constant 0 : i32
    return %c0_i32, %c0_i32_0 : i32, i32
  }
  func.func @transform_22(%arg0: i32) -> (i32, i32) {
    %c0_i32 = arith.constant 0 : i32
    %c0_i32_0 = arith.constant 0 : i32
    %c0_i32_1 = arith.constant 0 : i32
    return %c0_i32, %c0_i32_0 : i32, i32
  }
  func.func @transform_23(%arg0: i32) -> (i32, i32) {
    %c0_i32 = arith.constant 0 : i32
    %c0_i32_0 = arith.constant 0 : i32
    %c0_i32_1 = arith.constant 0 : i32
    return %c0_i32, %c0_i32_0 : i32, i32
  }
  func.func @transform_24(%arg0: i32) -> (i32, i32, i32) {
    %c0_i32 = arith.constant 0 : i32
    %c0_i32_0 = arith.constant 0 : i32
    %c0_i32_1 = arith.constant 0 : i32
    return %arg0, %c0_i32, %c0_i32_0 : i32, i32, i32
  }
}

module attributes {stable_mosaic.version = 11 : i64} {
  func.func @kernel(%arg0: i32, %arg1: memref<1x16x1280xbf16, #tpu.memory_space<vmem>>, %arg2: memref<3x144xbf16, #tpu.memory_space<vmem>>, %arg3: memref<3x1xf32, #tpu.memory_space<vmem>>, %arg4: memref<1x3x1152xf32, #tpu.memory_space<vmem>>) attributes {dimension_semantics = [#tpu.dimension_semantics<parallel>], iteration_bounds = array<i64: 2>, scalar_prefetch = 0 : i64, scratch_operands = 0 : i64, tpu.core_type = #tpu.core_type<tc>, window_params = [{transform_indices = @transform_0, window_bounds = array<i64: 1, 16, 1280>}, {pipeline_mode = #tpu.pipeline_mode<synchronous>, transform_indices = @transform_1, window_bounds = array<i64: 3, 144>}, {pipeline_mode = #tpu.pipeline_mode<synchronous>, transform_indices = @transform_2, window_bounds = array<i64: 3, 1>}, {transform_indices = @transform_3, window_bounds = array<i64: 1, 3, 1152>}]} {
    %c0 = arith.constant 0 : index
    %c0_0 = arith.constant 0 : index
    %c0_1 = arith.constant 0 : index
    %0 = vector.load %arg1[%c0, %c0_0, %c0_1] : memref<1x16x1280xbf16, #tpu.memory_space<vmem>>, vector<1x16x1280xbf16>
    %1 = vector.shape_cast %0 : vector<1x16x1280xbf16> to vector<16x1280xbf16>
    %2 = vector.extract_strided_slice %1 {offsets = [0, 0], sizes = [16, 1152], strides = [1, 1]} : vector<16x1280xbf16> to vector<16x1152xbf16>
    %3 = vector.extract_strided_slice %1 {offsets = [0, 1], sizes = [16, 1152], strides = [1, 1]} : vector<16x1280xbf16> to vector<16x1152xbf16>
    %4 = vector.extract_strided_slice %1 {offsets = [0, 2], sizes = [16, 1152], strides = [1, 1]} : vector<16x1280xbf16> to vector<16x1152xbf16>
    %5 = vector.extract_strided_slice %1 {offsets = [0, 36], sizes = [16, 1152], strides = [1, 1]} : vector<16x1280xbf16> to vector<16x1152xbf16>
    %6 = vector.extract_strided_slice %1 {offsets = [0, 37], sizes = [16, 1152], strides = [1, 1]} : vector<16x1280xbf16> to vector<16x1152xbf16>
    %7 = vector.extract_strided_slice %1 {offsets = [0, 38], sizes = [16, 1152], strides = [1, 1]} : vector<16x1280xbf16> to vector<16x1152xbf16>
    %8 = vector.extract_strided_slice %1 {offsets = [0, 72], sizes = [16, 1152], strides = [1, 1]} : vector<16x1280xbf16> to vector<16x1152xbf16>
    %9 = vector.extract_strided_slice %1 {offsets = [0, 73], sizes = [16, 1152], strides = [1, 1]} : vector<16x1280xbf16> to vector<16x1152xbf16>
    %10 = vector.extract_strided_slice %1 {offsets = [0, 74], sizes = [16, 1152], strides = [1, 1]} : vector<16x1280xbf16> to vector<16x1152xbf16>
    %11 = tpu.concatenate %2, %3, %4, %5, %6, %7, %8, %9, %10 in 0 : vector<16x1152xbf16>, vector<16x1152xbf16>, vector<16x1152xbf16>, vector<16x1152xbf16>, vector<16x1152xbf16>, vector<16x1152xbf16>, vector<16x1152xbf16>, vector<16x1152xbf16>, vector<16x1152xbf16> -> vector<144x1152xbf16>
    %c0_2 = arith.constant 0 : index
    %c0_3 = arith.constant 0 : index
    %12 = vector.load %arg2[%c0_2, %c0_3] : memref<3x144xbf16, #tpu.memory_space<vmem>>, vector<3x144xbf16>
    %cst = arith.constant dense<0.000000e+00> : vector<3x1152xf32>
    %13 = tpu.matmul %12, %11, %cst {dimension_numbers = #tpu.dot_dimension_numbers<[1], [0], [0], [1], [0, 0, 1, 1], [], []>} : vector<3x144xbf16>, vector<144x1152xbf16>, vector<3x1152xf32> -> vector<3x1152xf32>
    %c0_4 = arith.constant 0 : index
    %c0_5 = arith.constant 0 : index
    %14 = vector.load %arg3[%c0_4, %c0_5] : memref<3x1xf32, #tpu.memory_space<vmem>>, vector<3x1xf32>
    %15 = vector.broadcast %14 : vector<3x1xf32> to vector<3x1152xf32>
    %16 = arith.addf %13, %15 : vector<3x1152xf32>
    %c0_6 = arith.constant 0 : index
    %c0_7 = arith.constant 0 : index
    %c0_8 = arith.constant 0 : index
    %17 = vector.load %arg4[%c0_6, %c0_7, %c0_8] : memref<1x3x1152xf32, #tpu.memory_space<vmem>>, vector<1x3x1152xf32>
    %18 = vector.shape_cast %17 : vector<1x3x1152xf32> to vector<3x1152xf32>
    %19 = vector.shape_cast %16 : vector<3x1152xf32> to vector<1x3x1152xf32>
    tpu.vector_store %arg4[%c0_6, %c0_7, %c0_8], %19 {strides = array<i32>} : memref<1x3x1152xf32, #tpu.memory_space<vmem>>, vector<1x3x1152xf32>,
    return
  }
  func.func @transform_0(%arg0: i32) -> (i32, i32, i32) {
    %c0_i32 = arith.constant 0 : i32
    %c0_i32_0 = arith.constant 0 : i32
    %c0_i32_1 = arith.constant 0 : i32
    return %arg0, %c0_i32, %c0_i32_0 : i32, i32, i32
  }
  func.func @transform_1(%arg0: i32) -> (i32, i32) {
    %c0_i32 = arith.constant 0 : i32
    %c0_i32_0 = arith.constant 0 : i32
    %c0_i32_1 = arith.constant 0 : i32
    return %c0_i32, %c0_i32_0 : i32, i32
  }
  func.func @transform_2(%arg0: i32) -> (i32, i32) {
    %c0_i32 = arith.constant 0 : i32
    %c0_i32_0 = arith.constant 0 : i32
    %c0_i32_1 = arith.constant 0 : i32
    return %c0_i32, %c0_i32_0 : i32, i32
  }
  func.func @transform_3(%arg0: i32) -> (i32, i32, i32) {
    %c0_i32 = arith.constant 0 : i32
    %c0_i32_0 = arith.constant 0 : i32
    %c0_i32_1 = arith.constant 0 : i32
    return %arg0, %c0_i32, %c0_i32_0 : i32, i32, i32
  }
}

</mosaic_0001>

<bundles_post_ra>
// kernel: rdn_forward.2
= control target key start
LH: loop header
LB: loop body
LE: loop exit
PB: predicated region body
PF: predicated region fallthrough
CT: control target
= control target key end

     0   :  { %s6655_s0 = inlined_call_operand.vmem [shape: bf16[2,3,512], index: 0, kind: input, shape index: {}]   ;;  %s6656_s1 = inlined_call_operand.vmem [shape: f32[1,384], index: 1, kind: input, shape index: {}]   ;;  %s6657_s2 = inlined_call_operand.vmem [shape: bf16[16,27], index: 2, kind: input, shape index: {}]   ;;  %s6658_s3 = inlined_call_operand.vmem [shape: f32[16,1], index: 3, kind: input, shape index: {}]   ;;  %s6659_s4 = inlined_call_operand.vmem [shape: bf16[16,144], index: 4, kind: input, shape index: {}]   ;;  %s6660_s5 = inlined_call_operand.vmem [shape: f32[16,1], index: 5, kind: input, shape index: {}]   ;;  %s6661_s6 = inlined_call_operand.vmem [shape: bf16[2,16,16], index: 6, kind: input, shape index: {}]   ;;  %s6662_s7 = inlined_call_operand.vmem [shape: f32[16,1], index: 7, kind: input, shape index: {}]   ;;  %s6663_s8 = inlined_call_operand.vmem [shape: bf16[16,144], index: 8, kind: input, shape index: {}]   ;;  %s6664_s9 = inlined_call_operand.vmem [shape: f32[16,1], index: 9, kind: input, shape index: {}]   ;;  %s6665_s10 = inlined_call_operand.vmem [shape: bf16[16,288], index: 10, kind: input, shape index: {}]   ;;  %s6666_s11 = inlined_call_operand.vmem [shape: f32[16,1], index: 11, kind: input, shape index: {}]   ;;  %s6667_s12 = inlined_call_operand.vmem [shape: bf16[16,48], index: 12, kind: input, shape index: {}]   ;;  %s6668_s13 = inlined_call_operand.vmem [shape: f32[16,1], index: 13, kind: input, shape index: {}]   ;;  %s6669_s14 = inlined_call_operand.vmem [shape: bf16[16,144], index: 14, kind: input, shape index: {}]   ;;  %s6670_s15 = inlined_call_operand.vmem [shape: f32[16,1], index: 15, kind: input, shape index: {}]   ;;  %s6671_s16 = inlined_call_operand.vmem [shape: bf16[16,288], index: 16, kind: input, shape index: {}]   ;;  %s6672_s17 = inlined_call_operand.vmem [shape: f32[16,1], index: 17, kind: input, shape index: {}]   ;;  %s6673_s18 = inlined_call_operand.vmem [shape: bf16[16,48], index: 18, kind: input, shape index: {}]   ;;  %s6674_s19 = inlined_call_operand.vmem [shape: f32[16,1], index: 19, kind: input, shape index: {}]   ;;  %s6675_s20 = inlined_call_operand.vmem [shape: bf16[16,144], index: 20, kind: input, shape index: {}]   ;;  %s6676_s21 = inlined_call_operand.vmem [shape: f32[16,1], index: 21, kind: input, shape index: {}]   ;;  %s6677_s22 = inlined_call_operand.vmem [shape: bf16[64,144], index: 22, kind: input, shape index: {}]   ;;  %s6678_s23 = inlined_call_operand.vmem [shape: f32[64,1], index: 23, kind: input, shape index: {}]   ;;  %s6679_s24 = inlined_call_operand.vmem [shape: f32[2,64,384], index: 24, kind: output, shape index: {}]  }
   0x1   :  { %6707 = sst [smem:[#allocation3_spill]] %s6655_s0 }
   0x2   :  { %6708 = sst [smem:[#allocation4_spill]] %s6656_s1 }
   0x3   :  { %6709 = sst [smem:[#allocation5_spill]] %s6657_s2 }
   0x4   :  { %6710 = sst [smem:[#allocation6_spill]] %s6658_s3 }
   0x5   :  { %6711 = sst [smem:[#allocation7_spill]] %s6659_s4 }
   0x6   :  { %6712 = sst [smem:[#allocation8_spill]] %s6660_s5  ;;  %s4903_s5 = smov 0  }
   0x7   :  { %6713 = sst [smem:[#allocation9_spill]] %s6661_s6 }
   0x8   :  { %6714 = sst [smem:[#allocation10_spill]] %s6662_s7 }
   0x9   :  { %6715 = sst [smem:[#allocation11_spill]] %s6663_s8 }
   0xa   :  { %6716 = sst [smem:[#allocation12_spill]] %s6664_s9 }
   0xb   :  { %6717 = sst [smem:[#allocation13_spill]] %s6665_s10 }
   0xc   :  { %6718 = sst [smem:[#allocation14_spill]] %s6666_s11 }
   0xd LB: > { %s4413_s26 = sadd.s32 4294967295, %s4762_s5   ;;  %p4417_p0 = scmp.ge.s32.totalorder %s4762_s5, 1  ;;  %s4762_s5 = sphi %s4903_s5, %s34_s5  }
   0xe   : > { %p662_p1 = scmp.lt.s32.totalorder %s4762_s5, 3 }
  0x10   : > { %p663_p2 = pnand %p4417_p0, %p662_p1 }
  0x11   : > { %p728_p3 = scmp.lt.s32.totalorder (!%p663_p2), %s4413_s26, 1  ;;  %v746_v0 = vlaneseq (!%p663_p2)  ;;  %v4764_v1 = vmov (!%p663_p2), 1983009808   ;;  %s6719_s2 = sld [smem:[#allocation3_spill]] (!%p663_p2)  ;;  %v4770_v58 = vmov (!%p663_p2), 0.0   ;;  %vm4775_vm0 = vmmov (!%p663_p2), 0  }
  0x12   : > { %666 = sbr.rel (%p663_p2) target bundleno = 5541 (0x15a5), region = 116  ;;  %v744_v2 = vunpack.c.l.s4 (!%p663_p2), %v4764_v1  ;;  %s6696_s0 = smov (!%p663_p2), 126   ;;  %4566 = vmatprep.subr.bf16.mxu1 (!%p663_p2), %v4770_v58  ;;  %4570 = vmatprep.mubr.msk.bf16.mxu1 (!%p663_p2), %vm4775_vm0, %v4770_v58  ;;  %vm802_vm1 = vcmask (!%p663_p2), 1039360   ;;  %vm964_vm2 = vcmask (!%p663_p2), 1041408   ;;  %vm965_vm3 = vsmask.f32 (!%p663_p2), 1280 }
  0x13   : > { %v4913_v3 = vshrl.u32 (!%p663_p2), %v746_v0, 7  ;;  %s6702_s7 = smov (!%p663_p2), 127   ;;  %s6700_s30 = smov (!%p663_p2), 104   ;;  %vm845_vm4 = vcmask (!%p663_p2), 850944   ;;  %vm983_vm5 = vcmask (!%p663_p2), 1044480   ;;  %vm5054_vm7 = vmand (!%p663_p2), %vm964_vm2, %vm965_vm3  ;;  %vm870_vm8 = vcmask (!%p663_p2), 842752  }
  0x14   : > { %v745_v4 = vunpack.c.0.s8 (!%p663_p2), %v744_v2  ;;  %s6694_s3 = smov (!%p663_p2), 103   ;;  %s6692_s25 = smov (!%p663_p2), 102   ;;  %vm984_vm6 = vsmask.f32 (!%p663_p2), 4352  ;;  %vm1002_vm9 = vcmask (!%p663_p2), 1047552   ;;  %vm821_vm11 = vcmask (!%p663_p2), 1031168  }
  0x15   : > { %s6690_s8 = smov (!%p663_p2), 80   ;;  %s6688_s4 = smov (!%p663_p2), 79   ;;  %vm1003_vm10 = vsmask.f32 (!%p663_p2), 7424  ;;  %vm970_vm12 = vcmask (!%p663_p2), 1042432   ;;  %vm5063_vm13 = vmand (!%p663_p2), %vm983_vm5, %vm984_vm6  ;;  %vm898_vm14 = vcmask (!%p663_p2), 834560  }
  0x16   : > { %v748_v5 = vsub.s32 (!%p663_p2), %v745_v4, %v4913_v3  ;;  %s6686_s1 = smov (!%p663_p2), 78   ;;  %s6720_s6 = sld [smem:[#allocation6_spill]] (!%p663_p2)  ;;  %vm989_vm15 = vcmask (!%p663_p2), 1045504   ;;  %vm5070_vm2 = vmand (!%p663_p2), %vm1002_vm9, %vm1003_vm10  ;;  %vm920_vm3 = vcmask (!%p663_p2), 654336   ;;  %vm944_vm6 = vcmask (!%p663_p2), 646144  }
  0x17   : > { %vm1008_vm9 = vcmask (!%p663_p2), 1040384   ;;  %s6736_s28 = sld [smem:[#allocation8_spill]] (!%p663_p2)  ;;  %s6741_s9 = sld [smem:[#allocation12_spill]] (!%p663_p2) }
  0x18   : > { %s6746_s10 = sld [smem:[#allocation13_spill]] (!%p663_p2)  ;;  %s6747_s11 = sld [smem:[#allocation14_spill]] (!%p663_p2) }
  0x19   : > { %s6751_s26 = smov (!%p728_p3, %s4413_s26), 1 }
  0x1a   : > { %s4488_s27 = sshll.u32 %s6751_s26, 3 }
  0x1b   : > { %s732_s29 = scalar_lea.vmem %s6719_s2, %s4488_s27  ;;  %s6729_s2 = sld [smem:[#allocation5_spill]] }
  0x1c   : > { %v740_v6 = vld [vmem:[%s732_s29] sm:$0xff]  ;;  %s6735_s29 = smov 78   ;;  %s6738_s27 = smov 102  }
  0x1d   : > { %v4920_v7 = vrot.slane %v740_v6, %v748_v5  ;;  %v742_v8 = vcombine.high %v740_v6, %v740_v6  ;;  %v852_v44 = vcombine.low %v740_v6, %v740_v6 }
  0x1f   : > { %v809_v9 = vrot.slane %v4920_v7, 5  ;;  %v4925_v10 = vcombine.high %v4920_v7, %v4920_v7  ;;  %v4927_v11 = vrot.slane %v742_v8, %v748_v5  ;;  %v4930_v12 = vshrl.u32 %v4920_v7, 16 }
  0x20   : > { %v4933_v13 = vshll.u32 %v4920_v7, 16  ;;  %v859_v46 = vrot.slane %v852_v44, %v748_v5  ;;  %v4989_v49 = vcombine.low %v4920_v7, %v4920_v7  ;;  %v908_v2 = vrot.slane %v4920_v7, 7 }
  0x21   : > { %813 = vrot.lane.b32.xlu0 %v809_v9, %s6696_s0  ;;  %v810_v14 = vrot.slane %v4925_v10, 5  ;;  %v811_v15 = vrot.slane %v4927_v11, 5  ;;  %v765_v16 = vrot.slane %v4930_v12, 6  ;;  %v4940_v17 = vshrl.u32 %v4925_v10, 16 }
  0x22   : > { %v768_v18 = vrot.slane %v4933_v13, 7  ;;  %v4944_v19 = vshll.u32 %v4925_v10, 16  ;;  %v4947_v20 = vshrl.u32 %v4927_v11, 16  ;;  %v4953_v22 = vcombine.high %v4927_v11, %v4927_v11 }
  0x23   : > { %815 = vrot.lane.b32.xlu1 %v810_v14, %s6696_s0  ;;  %v773_v21 = vrot.slane %v4940_v17, 6  ;;  %v4956_v23 = vshll.u32 %v4927_v11, 16  ;;  %v828_v29 = vrot.slane %v4940_v17, 3  ;;  %v825_v41 = vrot.slane %v4930_v12, 3 }
  0x24   : > { %v769_v24 = vor.u32 %v768_v18, %v765_v16  ;;  %v776_v25 = vrot.slane %v4944_v19, 7  ;;  %v781_v26 = vrot.slane %v4947_v20, 6  ;;  %v812_v30 = vrot.slane %v4953_v22, 5 }
  0x25   : > { %817 = vrot.lane.b32.xlu0 %v811_v15, %s6696_s0  ;;  %v784_v27 = vrot.slane %v4956_v23, 7  ;;  %v829_v31 = vrot.slane %v4944_v19, 4  ;;  %v4967_v32 = vshrl.u32 %v4953_v22, 16  ;;  %v4970_v33 = vshll.u32 %v4953_v22, 16 }
  0x26   : > { %v777_v28 = vor.u32 %v776_v25, %v773_v21  ;;  %v831_v35 = vrot.slane %v4947_v20, 3  ;;  %v832_v36 = vrot.slane %v4956_v23, 4  ;;  %v826_v42 = vrot.slane %v4933_v13, 4  ;;  %v1039_v21 = vld [vmem:[%s6720_s6] sm:$0xff] }
  0x27   : > { %794 = vrot.lane.b32.xlu1 %v769_v24, %s6702_s7  ;;  %v785_v34 = vor.u32 %v784_v27, %v781_v26  ;;  %v830_v37 = vor.u32 %v829_v31, %v828_v29  ;;  %v789_v38 = vrot.slane %v4967_v32, 6  ;;  %v792_v39 = vrot.slane %v4970_v33, 7 }
  0x28   : > { %v833_v40 = vor.u32 %v832_v36, %v831_v35  ;;  %v827_v45 = vor.u32 %v826_v42, %v825_v41  ;;  %v834_v47 = vrot.slane %v4967_v32, 3  ;;  %v835_v48 = vrot.slane %v4970_v33, 4 }
  0x29   : > { %796 = vrot.lane.b32.xlu0 %v777_v28, %s6702_s7  ;;  %v793_v43 = vor.u32 %v792_v39, %v789_v38  ;;  %v875_v51 = vrot.slane %v4944_v19, 1  ;;  %v876_v52 = vrot.slane %v4956_v23, 1  ;;  %v860_v53 = vcombine.low %v859_v46, %v859_v46 }
  0x2a   : > { %v836_v50 = vor.u32 %v835_v48, %v834_v47  ;;  %v909_v57 = vrot.slane %v4925_v10, 7  ;;  %v910_v59 = vrot.slane %v4927_v11, 7  ;;  %v874_v60 = vrot.slane %v4933_v13, 1 }
  0x2b   : > { %819 = vrot.lane.b32.xlu1 %v812_v30, %s6696_s0  ;;  %v4665_v54 = vpack.i.bf16 %v876_v52, %v875_v51  ;;  %v879_v55 = vor.u32 %v875_v51, %v4940_v17  ;;  %v880_v56 = vor.u32 %v876_v52, %v4947_v20  ;;  %v877_v61 = vrot.slane %v4970_v33, 1 }
  0x2c   : > { %v878_v63 = vor.u32 %v874_v60, %v4930_v12  ;;  %v927_v0 = vrot.slane %v4940_v17, 5  ;;  %v928_v1 = vrot.slane %v4944_v19, 6  ;;  %v930_v4 = vrot.slane %v4947_v20, 5 }
  0x2d   : > { %798 = vrot.lane.b32.xlu0 %v785_v34, %s6702_s7  ;;  %v4670_v62 = vpack.i.bf16 %v877_v61, %v874_v60  ;;  %v931_v5 = vrot.slane %v4956_v23, 6  ;;  %v881_v9 = vor.u32 %v877_v61, %v4967_v32  ;;  %v924_v14 = vrot.slane %v4930_v12, 5 }
  0x2e   : > { %v929_v6 = vor.u32 %v928_v1, %v927_v0  ;;  %v925_v15 = vrot.slane %v4933_v13, 6  ;;  %v911_v16 = vrot.slane %v4953_v22, 7  ;;  %v933_v18 = vrot.slane %v4967_v32, 5  ;;  %v1040_v22 = vld [vmem:[%s6720_s6 + $0x8] sm:$0xff] }
  0x2f   : > { %839 = vrot.lane.b32.xlu1 %v830_v37, %s6700_s30  ;;  %v932_v8 = vor.u32 %v931_v5, %v930_v4  ;;  %v934_v19 = vrot.slane %v4970_v33, 6  ;;  %v951_v12 = vcombine.low %v4927_v11, %v4927_v11  ;;  %v4773_v20 = vmov 0  }
  0x30   : > { %v926_v17 = vor.u32 %v925_v15, %v924_v14  ;;  %1101 = vmatprep.mubr.bf16.mxu0 %v4773_v20  ;;  %4675 = vset.pattern.permute.xlu0 %v4773_v20 }
  0x31   : > { %841 = vrot.lane.b32.xlu0 %v833_v40, %s6700_s30  ;;  %4676 = vset.pattern.permute.xlu1 %v4773_v20  ;;  %v935_v13 = vor.u32 %v934_v19, %v933_v18 }
  0x33   : > { %800 = vrot.lane.b32.xlu1 %v793_v43, %s6702_s7 }
  0x35   : > { %837 = vrot.lane.b32.xlu0 %v827_v45, %s6700_s30 }
  0x37   : > { %864 = vrot.lane.b32.xlu1 %v859_v46, %s6694_s3 }
  0x39   : > { %866 = vrot.lane.b32.xlu0 %v4989_v49, %s6694_s3 }
  0x3b   : > { %843 = vrot.lane.b32.xlu1 %v836_v50, %s6700_s30 }
  0x3d   : > { %862 = vrot.lane.b32.xlu0 %v860_v53, %s6694_s3 }
  0x3f   : > { %4666 = vrot.lane.b32.xlu1 %v4665_v54, %s6692_s25 }
  0x41   : > { %892 = vrot.lane.b32.xlu0 %v879_v55, %s6692_s25 }
  0x43   : > { %894 = vrot.lane.b32.xlu1 %v880_v56, %s6692_s25 }
  0x45   : > { %914 = vrot.lane.b32.xlu0 %v909_v57, %s6690_s8 }
  0x47   : > { %916 = vrot.lane.b32.xlu1 %v910_v59, %s6690_s8 }
  0x49   : > { %868 = vrot.lane.b32.xlu0 %v4920_v7, %s6694_s3 }
  0x4b   : > { %4671 = vrot.lane.b32.xlu1 %v4670_v62, %s6692_s25 }
  0x4d   : > { %890 = vrot.lane.b32.xlu0 %v878_v63, %s6692_s25 }
  0x4f   : > { %912 = vrot.lane.b32.xlu1 %v908_v2, %s6690_s8 }
  0x51   : > { %938 = vrot.lane.b32.xlu0 %v929_v6, %s6688_s4 }
  0x53   : > { %940 = vrot.lane.b32.xlu1 %v932_v8, %s6688_s4 }
  0x55   : > { %896 = vrot.lane.b32.xlu0 %v881_v9, %s6692_s25 }
  0x57   : > { %918 = vrot.lane.b32.xlu1 %v911_v16, %s6690_s8 }
  0x59   : > { %936 = vrot.lane.b32.xlu0 %v926_v17, %s6688_s4 }
  0x5b   : > { %954 = vrot.lane.b32.xlu1 %v4920_v7, %s6686_s1 }
  0x5d   : > { %956 = vrot.lane.b32.xlu0 %v951_v12, %s6686_s1 }
  0x5f   : > { %942 = vrot.lane.b32.xlu1 %v935_v13, %s6688_s4  ;;  %s6730_s4 = sld [smem:[#allocation4_spill]] }
  0x61   : > { %952 = vrot.lane.b32.xlu0 %v4989_v49, %s6686_s1 }
  0x63   : > { %958 = vrot.lane.b32.xlu1 %v4927_v11, %s6686_s1  ;;  %s6733_s1 = smov 79  }
  0x65   : > { %1043 = vperm.xlu0 %4675, %v1039_v21  }
  0x67   : > { %1048 = vperm.xlu1 %4676, %v1040_v22  }
  0x93   : > { %v814_v23 = vpop.permute.xlu0 %813 }
  0x95   : > { %v816_v24 = vpop.permute.xlu1 %815 }
  0x96   : > { %v822_v1 = vsel %vm821_vm11, %v814_v23, %v816_v24 }
  0x97   : > { %v818_v25 = vpop.permute.xlu0 %817 }
  0x98   : > { %v823_v43 = vsel %vm821_vm11, %v816_v24, %v818_v25 }
  0x99   : > { %v795_v26 = vpop.permute.xlu1 %794 }
  0x9b   : > { %v797_v27 = vpop.permute.xlu0 %796 }
  0x9c   : > { %v803_v56 = vsel %vm802_vm1, %v795_v26, %v797_v27 }
  0x9d   : > { %v820_v28 = vpop.permute.xlu1 %819  ;;  %v967_v60 = vsel %vm5054_vm7, %v4920_v7, %v803_v56 }
  0x9e   : > { %v824_v2 = vsel %vm821_vm11, %v818_v25, %v820_v28  ;;  %v973_v7 = vsel %vm970_vm12, %v967_v60, %v822_v1 }
  0x9f   : > { %v799_v29 = vpop.permute.xlu0 %798 }
  0xa0   : > { %v804_v36 = vsel %vm802_vm1, %v797_v27, %v799_v29 }
  0xa1   : > { %v840_v30 = vpop.permute.xlu1 %839  ;;  %v968_v39 = vsel %vm5054_vm7, %v4925_v10, %v804_v36 }
  0xa2   : > { %v977_v47 = vsel %vm970_vm12, %v968_v39, %v823_v43 }
  0xa3   : > { %v842_v31 = vpop.permute.xlu0 %841 }
  0xa4   : > { %v847_v41 = vsel %vm845_vm4, %v840_v30, %v842_v31 }
  0xa5   : > { %v801_v32 = vpop.permute.xlu1 %800  ;;  %v987_v50 = vsel %vm5063_vm13, %v977_v47, %v847_v41 }
  0xa6   : > { %v805_v57 = vsel %vm802_vm1, %v799_v29, %v801_v32  ;;  %v4776_v29 = vmov 65535  }
  0xa7   : > { %v838_v33 = vpop.permute.xlu0 %837  ;;  %v969_v61 = vsel %vm5054_vm7, %v4927_v11, %v805_v57  ;;  %vm1022_vm7 = vsmask.f32 2304 }
  0xa8   : > { %v846_v63 = vsel %vm845_vm4, %v838_v33, %v840_v30  ;;  %v981_v8 = vsel %vm970_vm12, %v969_v61, %v824_v2  ;;  %v1061_v30 = vsel %vm983_vm5, 4294967295, %v4776_v29  ;;  %vm5116_vm10 = vmand %vm970_vm12, %vm1022_vm7  ;;  %vm1056_vm5 = vcmask 220160  }
  0xa9   : > { %v865_v34 = vpop.permute.xlu1 %864  ;;  %v986_v14 = vsel %vm5063_vm13, %v973_v7, %v846_v63  ;;  %v739_v63 = vld [vmem:[%s6730_s4] sm:$0x7]  ;;  %v1164_v2 = vsub.s32 2, %v4913_v3  ;;  %s6698_s4 = smov 25   ;;  %vm1187_vm12 = vcmask 203776   ;;  %vm1336_vm7 = vcmask 130048  }
  0xab   : > { %v867_v35 = vpop.permute.xlu0 %866 }
  0xac   : > { %v872_v44 = vsel %vm870_vm8, %v865_v34, %v867_v35 }
  0xad   : > { %v844_v37 = vpop.permute.xlu1 %843  ;;  %v996_v52 = vsel %vm989_vm15, %v987_v50, %v872_v44 }
  0xae   : > { %v848_v0 = vsel %vm845_vm4, %v842_v31, %v844_v37  ;;  %v1062_v37 = vsel %vm989_vm15, %v1061_v30, 0 }
  0xaf   : > { %v863_v40 = vpop.permute.xlu0 %862  ;;  %v988_v15 = vsel %vm5063_vm13, %v981_v8, %v848_v0  ;;  %vm960_vm13 = vcmask 637952   ;;  %v1160_v0 = vsub.s32 1, %v4913_v3 }
  0xb0   : > { %v871_v4 = vsel %vm870_vm8, %v863_v40, %v865_v34 }
  0xb1   : > { %v4667_v45 = vpop.permute.xlu1 %4666  ;;  %v992_v18 = vsel %vm989_vm15, %v986_v14, %v871_v4 }
  0xb2   : > { %v4669_v10 = vunpack.i.h.bf16 %v4667_v45  ;;  %v4668_v46 = vunpack.i.l.bf16 %v4667_v45 }
  0xb3   : > { %v5074_v49 = vpop.permute.xlu0 %892 }
  0xb4   : > { %v900_v51 = vsel %vm898_vm14, %v4668_v46, %v4669_v10 }
  0xb5   : > { %v5080_v53 = vpop.permute.xlu1 %894  ;;  %v1006_v54 = vsel %vm5070_vm2, %v996_v52, %v900_v51 }
  0xb6   : > { %1069 = vmatprep.subr.bf16.mxu0 %v1006_v54  ;;  %v903_v34 = vsel %vm898_vm14, %v5074_v49, %v5080_v53 }
  0xb7   : > { %v915_v55 = vpop.permute.xlu0 %914 }
  0xb9   : > { %v917_v59 = vpop.permute.xlu1 %916 }
  0xba   : > { %v922_v28 = vsel %vm920_vm3, %v915_v55, %v917_v59 }
  0xbb   : > { %v869_v62 = vpop.permute.xlu0 %868 }
  0xbc   : > { %v873_v5 = vsel %vm870_vm8, %v867_v35, %v869_v62  ;;  %v1015_v35 = vsel %vm1008_vm9, %v903_v34, %v922_v28  ;;  %v1156_v62 = vsub.s32 0, %v4913_v3 }
  0xbd   : > { %v4672_v6 = vpop.permute.xlu1 %4671  ;;  %v1000_v12 = vsel %vm989_vm15, %v988_v15, %v873_v5  ;;  %vm5193_vm15 = vmneg %vm1187_vm12 }
  0xbe   : > { %v4674_v9 = vunpack.i.h.bf16 %v4672_v6  ;;  %v4673_v11 = vunpack.i.l.bf16 %v4672_v6  ;;  %v5158_v6 = vrot.slane %v739_v63, %v1156_v62 }
  0xbf   : > { %v891_v16 = vpop.permute.xlu0 %890 }
  0xc0   : > { %v899_v17 = vsel %vm898_vm14, %v4673_v11, %v4668_v46  ;;  %v901_v19 = vsel %vm898_vm14, %v4669_v10, %v4674_v9  ;;  %v902_v44 = vsel %vm898_vm14, %v891_v16, %v5074_v49  ;;  %v5160_v9 = vrot.slane %v739_v63, %v1160_v0 }
  0xc1   : > { %v913_v13 = vpop.permute.xlu1 %912  ;;  %v1005_v21 = vsel %vm5070_vm2, %v992_v18, %v899_v17  ;;  %v1007_v22 = vsel %vm5070_vm2, %v1000_v12, %v901_v19  ;;  %vm1027_vm2 = vcmask 1043456   ;;  %v5162_v19 = vrot.slane %v739_v63, %v1164_v2 }
  0xc2   : > { %1070 = vmatpush1.bf16.msra.mxu0 %v1005_v21  ;;  %4567 = vmatpush3.bf16.msra.mxu1 %v1007_v22  ;;  %v921_v38 = vsel %vm920_vm3, %v913_v13, %v915_v55 }
  0xc3   : > { %v939_v23 = vpop.permute.xlu0 %938  ;;  %4568 = vmatprep.subr.bf16.mxu1 %v4770_v58  ;;  %v1011_v46 = vsel %vm1008_vm9, %v902_v44, %v921_v38 }
  0xc5   : > { %v941_v24 = vpop.permute.xlu1 %940 }
  0xc6   : > { %v946_v32 = vsel %vm944_vm6, %v939_v23, %v941_v24 }
  0xc7   : > { %v897_v25 = vpop.permute.xlu0 %896  ;;  %v1025_v39 = vsel %vm5116_vm10, %v1015_v35, %v946_v32  ;;  %v4744_v35 = vld [vmem:[%s6677_s22 + $0x4] ss:$8 sps:$4 sm:$0xff]  }
  0xc8   : > { %v904_v50 = vsel %vm898_vm14, %v5080_v53, %v897_v25  ;;  %v4719_v53 = vld [vmem:[%s6729_s2] sm:$0xff]   ;;  %s6734_s2 = sld [smem:[#allocation7_spill]] }
  0xc9   : > { %v919_v26 = vpop.permute.xlu1 %918 }
  0xca   : > { %v923_v45 = vsel %vm920_vm3, %v917_v59, %v919_v26 }
  0xcb   : > { %v937_v27 = vpop.permute.xlu0 %936  ;;  %v1019_v54 = vsel %vm1008_vm9, %v904_v50, %v923_v45  ;;  %vm1995_vm9 = vcmask 261120  }
  0xcc   : > { %v945_v41 = vsel %vm944_vm6, %v937_v27, %v939_v23 }
  0xcd   : > { %v955_v33 = vpop.permute.xlu1 %954  ;;  %v1024_v51 = vsel %vm5116_vm10, %v1011_v46, %v945_v41  ;;  %v1315_v41 = vld [vmem:[%s6736_s28] sm:$0xff] }
  0xcf   : > { %v957_v36 = vpop.permute.xlu0 %956 }
  0xd0   : > { %v962_v40 = vsel %vm960_vm13, %v955_v33, %v957_v36 }
  0xd1   : > { %v943_v42 = vpop.permute.xlu1 %942  ;;  %v1033_v43 = vsel %vm1027_vm2, %v1025_v39, %v962_v40  ;;  %v4720_v40 = vld [vmem:[%s6734_s2 + $0x4] ss:$8 sps:$4 sm:$0xff]  }
  0xd2   : > { %v1065_v10 = vand.u32 %v1062_v37, %v1033_v43  ;;  %v947_v47 = vsel %vm944_vm6, %v941_v24, %v943_v42  ;;  %v1316_v42 = vld [vmem:[%s6736_s28 + $0x8] sm:$0xff] }
  0xd3   : > { %v953_v48 = vpop.permute.xlu0 %952  ;;  %v1026_v56 = vsel %vm5116_vm10, %v1019_v54, %v947_v47  ;;  %vm2290_vm10 = vcmask 392192  }
  0xd4   : > { %v961_v52 = vsel %vm960_vm13, %v953_v48, %v955_v33  ;;  %1071 = vmatprep.subr.bf16.mxu0 %v1065_v10 }
  0xd5   : > { %v1030_v49 = vsel %vm1027_vm2, %v1024_v51, %v961_v52  ;;  %v959_v55 = vpop.permute.xlu1 %958 }
  0xd6   : > { %v963_v57 = vsel %vm960_vm13, %v957_v36, %v959_v55  ;;  %v1063_v59 = vand.u32 %v1062_v37, %v1030_v49 }
  0xd7   : > { %v1036_v60 = vsel %vm1027_vm2, %v1026_v56, %v963_v57 }
  0xd8   : > { %1072 = vmatpush1.bf16.msra.mxu0 %v1063_v59  ;;  %v1067_v61 = vand.u32 %v1062_v37, %v1036_v60 }
  0xda   : > { %4569 = vmatpush3.bf16.msra.mxu1 %v1067_v61 }
  0xdb   : > { %4422 = vmatmul.mubr.msk.bf16.vlgmr.msra.gmra.mrb[0].mxu0 %vm1056_vm5, %v4719_v53  ;;  %1383 = vmatprep.subr.bf16.mxu1 %v4773_v20 }
  0xdc   : > { %4428 = vmatprep.mubr.msk.bf16.mxu0 %vm1336_vm7, %v4720_v40 }
  0xdd   : > { %4571 = vmatmul.mubr.msk.bf16.vlgmr.msra.gmra.mrb[0].mxu1 %vm1056_vm5, %v4719_v53 }
  0xde   : > { %4429 = vmatprep.mubr.msk.bf16.mxu1 %vm1336_vm7, %v4720_v40 }
  0xe4   : > { %v1044_v1 = vpop.permute.xlu0 %1043 }
  0xe6   : > { %v1049_v5 = vpop.permute.xlu1 %1048 }
 0x1ae   : > { %v1103_v4 = vpop.f32.mrb[0].mxu0 }
 0x1af   : > { %v1104_v7 = vadd.f32 %v1103_v4, %v1044_v1  ;;  %v1105_v8 = vpop.f32.mrb[1].mxu0 }
 0x1b0   : > { %v1106_v11 = vadd.f32 %v1105_v8, %v1044_v1  ;;  %v1107_v14 = vpop.f32.mrb[2].mxu0  ;;  %v1146_v15 = vpop.f32.mrb[0].mxu1 }
 0x1b1   : > { %v1108_v16 = vadd.f32 %v1107_v14, %v1049_v5  ;;  %v1109_v17 = vpop.f32.mrb[3].mxu0  ;;  %v4572_v18 = vpop.f32.mrb[1].mxu1  ;;  %v5165_v3 = vmul.f32 %v5158_v6, %v1104_v7  ;;  %v1147_v22 = vadd.f32 %v1146_v15, %v1044_v1 }
 0x1b2   : > { %v1110_v12 = vadd.f32 %v1109_v17, %v1049_v5  ;;  %v1149_v13 = vpop.f32.mrb[2].mxu1  ;;  %v5171_v25 = vmul.f32 %v5160_v9, %v1106_v11 }
 0x1b3   : > { %v5168_v21 = vmul.f32 %v5158_v6, %v1108_v16  ;;  %v1150_v23 = vadd.f32 %v1149_v13, %v1049_v5  ;;  %v4573_v24 = vpop.f32.mrb[3].mxu1  ;;  %v5184_v30 = vmul.f32 %v5162_v19, %v1147_v22 }
 0x1b4   : > { %v5174_v26 = vmul.f32 %v5160_v9, %v1110_v12 }
 0x1b5   : > { %v5177_v27 = vmul.f32 %v5162_v19, %v1150_v23  ;;  %v1175_v28 = vpack.c.bf16 %v5168_v21, %v5165_v3 }
 0x1b6   : > { %v1176_v29 = vpack.c.bf16 %v5174_v26, %v5171_v25 }
 0x1b7   : > { %1181 = vrot.lane.b32.xlu1 %v1175_v28, %s6698_s4  ;;  %v1177_v31 = vpack.c.bf16 %v5177_v27, %v5184_v30 }
 0x1b8   : > { %1183 = vrot.lane.b32.xlu0 %v1176_v29, %s6698_s4 }
 0x1bb   : > { %1185 = vrot.lane.b32.xlu1 %v1177_v31, %s6698_s4 }
 0x229   : > { %v1182_v32 = vpop.permute.xlu1 %1181 }
 0x22a   : > { %v1195_v33 = vsel %vm1187_vm12, 0, %v1182_v32  ;;  %v1184_v34 = vpop.permute.xlu0 %1183 }
 0x22b   : > { %v1188_v36 = vsel %vm1187_vm12, %v1182_v32, %v1184_v34  ;;  %1201 = vrot.lane.b32.xlu0 %v1195_v33, %s6702_s7 }
 0x22c   : > { %1340 = vmatprep.subr.bf16.mxu0 %v1188_v36 }
 0x22d   : > { %4427 = vmatpush1.bf16.msk.msra.mxu0 %vm5193_vm15, %v1182_v32  ;;  %v1186_v37 = vpop.permute.xlu1 %1185 }
 0x22e   : > { %v1189_v38 = vsel %vm1187_vm12, %v1184_v34, %v1186_v37  ;;  %v1198_v39 = vsel %vm1187_vm12, %v1186_v37, 0 }
 0x22f   : > { %1215 = vrot.lane.b32.xlu0 %v1195_v33, %s6696_s0  ;;  %1205 = vrot.lane.b32.xlu1 %v1189_v38, %s6702_s7 }
 0x230   : > { %1384 = vmatpush1.bf16.msra.mxu1 %v1189_v38 }
 0x231   : > { %1385 = vmatprep.subr.bf16.mxu1 %v4773_v20 }
 0x233   : > { %1229 = vrot.lane.b32.xlu0 %v1195_v33, %s6700_s30  ;;  %1207 = vrot.lane.b32.xlu1 %v1198_v39, %s6702_s7 }
 0x237   : > { %1243 = vrot.lane.b32.xlu0 %v1195_v33, %s6694_s3  ;;  %1219 = vrot.lane.b32.xlu1 %v1189_v38, %s6696_s0 }
 0x23b   : > { %1257 = vrot.lane.b32.xlu0 %v1195_v33, %s6692_s25  ;;  %1221 = vrot.lane.b32.xlu1 %v1198_v39, %s6696_s0 }
 0x23f   : > { %1271 = vrot.lane.b32.xlu0 %v1195_v33, %s6690_s8  ;;  %1233 = vrot.lane.b32.xlu1 %v1189_v38, %s6700_s30 }
 0x243   : > { %1285 = vrot.lane.b32.xlu0 %v1195_v33, %s6733_s1  ;;  %1235 = vrot.lane.b32.xlu1 %v1198_v39, %s6700_s30 }
 0x247   : > { %1203 = vrot.lane.b32.xlu0 %v1188_v36, %s6702_s7  ;;  %1247 = vrot.lane.b32.xlu1 %v1189_v38, %s6694_s3 }
 0x24b   : > { %1217 = vrot.lane.b32.xlu0 %v1188_v36, %s6696_s0  ;;  %1249 = vrot.lane.b32.xlu1 %v1198_v39, %s6694_s3 }
 0x24f   : > { %1231 = vrot.lane.b32.xlu0 %v1188_v36, %s6700_s30  ;;  %1261 = vrot.lane.b32.xlu1 %v1189_v38, %s6692_s25 }
 0x253   : > { %1245 = vrot.lane.b32.xlu0 %v1188_v36, %s6694_s3  ;;  %1263 = vrot.lane.b32.xlu1 %v1198_v39, %s6692_s25  ;;  %s6739_s3 = smov 80  }
 0x257   : > { %1259 = vrot.lane.b32.xlu0 %v1188_v36, %s6692_s25  ;;  %1275 = vrot.lane.b32.xlu1 %v1189_v38, %s6690_s8  ;;  %s6744_s25 = smov 126  }
 0x25b   : > { %1273 = vrot.lane.b32.xlu0 %v1188_v36, %s6690_s8  ;;  %1277 = vrot.lane.b32.xlu1 %v1198_v39, %s6690_s8  ;;  %s6737_s8 = smov 103  }
 0x25f   : > { %1287 = vrot.lane.b32.xlu0 %v1188_v36, %s6733_s1  ;;  %1289 = vrot.lane.b32.xlu1 %v1189_v38, %s6733_s1 }
 0x263   : > { %1301 = vrot.lane.b32.xlu0 %v1188_v36, %s6735_s29  ;;  %1291 = vrot.lane.b32.xlu1 %v1198_v39, %s6733_s1 }
 0x267   : > { %1299 = vrot.lane.b32.xlu0 %v1195_v33, %s6735_s29  ;;  %1303 = vrot.lane.b32.xlu1 %v1189_v38, %s6735_s29 }
 0x26b   : > { %1319 = vperm.xlu0 %4675, %v1315_v41   ;;  %1305 = vrot.lane.b32.xlu1 %v1198_v39, %s6735_s29 }
 0x26f   : > { %1324 = vperm.xlu1 %4676, %v1316_v42  }
 0x29d   : > { %v1202_v43 = vpop.permute.xlu0 %1201 }
 0x2a1   : > { %v1216_v44 = vpop.permute.xlu0 %1215  ;;  %v1206_v45 = vpop.permute.xlu1 %1205 }
 0x2a5   : > { %v1230_v10 = vpop.permute.xlu0 %1229  ;;  %v1208_v46 = vpop.permute.xlu1 %1207 }
 0x2a6   : > { %v1211_v47 = vsel %vm802_vm1, %v1206_v45, %v1208_v46 }
 0x2a7   : > { %1386 = vmatpush1.bf16.msra.mxu1 %v1211_v47 }
 0x2a8   : > { %1387 = vmatprep.subr.bf16.mxu1 %v4773_v20 }
 0x2a9   : > { %v1244_v48 = vpop.permute.xlu0 %1243  ;;  %v1220_v50 = vpop.permute.xlu1 %1219 }
 0x2ad   : > { %v1258_v51 = vpop.permute.xlu0 %1257  ;;  %v1222_v52 = vpop.permute.xlu1 %1221 }
 0x2ae   : > { %v1225_v54 = vsel %vm821_vm11, %v1220_v50, %v1222_v52 }
 0x2af   : > { %1388 = vmatpush1.bf16.msra.mxu1 %v1225_v54 }
 0x2b0   : > { %1389 = vmatprep.subr.bf16.mxu1 %v4773_v20 }
 0x2b1   : > { %v1272_v49 = vpop.permute.xlu0 %1271  ;;  %v1234_v55 = vpop.permute.xlu1 %1233 }
 0x2b5   : > { %v1286_v56 = vpop.permute.xlu0 %1285  ;;  %v1236_v57 = vpop.permute.xlu1 %1235 }
 0x2b6   : > { %v1239_v59 = vsel %vm845_vm4, %v1234_v55, %v1236_v57 }
 0x2b7   : > { %1390 = vmatpush1.bf16.msra.mxu1 %v1239_v59 }
 0x2b8   : > { %1391 = vmatprep.subr.bf16.mxu1 %v4773_v20 }
 0x2b9   : > { %v1204_v60 = vpop.permute.xlu0 %1203  ;;  %v1248_v53 = vpop.permute.xlu1 %1247 }
 0x2ba   : > { %v1210_v61 = vsel %vm802_vm1, %v1204_v60, %v1206_v45  ;;  %v1209_v62 = vsel %vm802_vm1, %v1202_v43, %v1204_v60  ;;  %v4722_v45 = vld [vmem:[%s6734_s2] ss:$8 sps:$4 sm:$0xff]   ;;  %s6742_s2 = smov 127  }
 0x2bb   : > { %1342 = vmatprep.subr.bf16.mxu0 %v1210_v61 }
 0x2bc   : > { %1343 = vmatpush1.bf16.msra.mxu0 %v1209_v62 }
 0x2bd   : > { %v1218_v63 = vpop.permute.xlu0 %1217  ;;  %v1250_v0 = vpop.permute.xlu1 %1249 }
 0x2be   : > { %v1253_v1 = vsel %vm870_vm8, %v1248_v53, %v1250_v0  ;;  %v1224_v2 = vsel %vm821_vm11, %v1218_v63, %v1220_v50  ;;  %v1223_v4 = vsel %vm821_vm11, %v1216_v44, %v1218_v63 }
 0x2bf   : > { %1344 = vmatprep.subr.bf16.mxu0 %v1224_v2  ;;  %1392 = vmatpush1.bf16.msra.mxu1 %v1253_v1 }
 0x2c0   : > { %1345 = vmatpush1.bf16.msra.mxu0 %v1223_v4  ;;  %1393 = vmatprep.subr.bf16.mxu1 %v4773_v20 }
 0x2c1   : > { %v1232_v5 = vpop.permute.xlu0 %1231  ;;  %v1262_v7 = vpop.permute.xlu1 %1261 }
 0x2c2   : > { %v1238_v8 = vsel %vm845_vm4, %v1232_v5, %v1234_v55  ;;  %v1237_v11 = vsel %vm845_vm4, %v1230_v10, %v1232_v5 }
 0x2c3   : > { %1346 = vmatprep.subr.bf16.mxu0 %v1238_v8 }
 0x2c4   : > { %1347 = vmatpush1.bf16.msra.mxu0 %v1237_v11 }
 0x2c5   : > { %v1246_v14 = vpop.permute.xlu0 %1245  ;;  %v1264_v15 = vpop.permute.xlu1 %1263 }
 0x2c6   : > { %v1267_v16 = vsel %vm898_vm14, %v1262_v7, %v1264_v15  ;;  %v1252_v17 = vsel %vm870_vm8, %v1246_v14, %v1248_v53  ;;  %v1251_v18 = vsel %vm870_vm8, %v1244_v48, %v1246_v14 }
 0x2c7   : > { %1348 = vmatprep.subr.bf16.mxu0 %v1252_v17  ;;  %1394 = vmatpush1.bf16.msra.mxu1 %v1267_v16 }
 0x2c8   : > { %1349 = vmatpush1.bf16.msra.mxu0 %v1251_v18  ;;  %1395 = vmatprep.subr.bf16.mxu1 %v4773_v20 }
 0x2c9   : > { %v1260_v12 = vpop.permute.xlu0 %1259  ;;  %v1276_v13 = vpop.permute.xlu1 %1275 }
 0x2ca   : > { %v1266_v22 = vsel %vm898_vm14, %v1260_v12, %v1262_v7  ;;  %v1265_v23 = vsel %vm898_vm14, %v1258_v51, %v1260_v12 }
 0x2cb   : > { %1350 = vmatprep.subr.bf16.mxu0 %v1266_v22 }
 0x2cc   : > { %1351 = vmatpush1.bf16.msra.mxu0 %v1265_v23 }
 0x2cd   : > { %v1274_v24 = vpop.permute.xlu0 %1273  ;;  %v1278_v28 = vpop.permute.xlu1 %1277 }
 0x2ce   : > { %v1281_v29 = vsel %vm920_vm3, %v1276_v13, %v1278_v28  ;;  %v1280_v31 = vsel %vm920_vm3, %v1274_v24, %v1276_v13  ;;  %v1279_v32 = vsel %vm920_vm3, %v1272_v49, %v1274_v24  ;;  %v1578_v24 = vld [vmem:[%s6741_s9] sm:$0xff]  ;;  %v1579_v28 = vld [vmem:[%s6741_s9 + $0x8] sm:$0xff]  ;;  %s6748_s9 = sld [smem:[#allocation10_spill]] }
 0x2cf   : > { %1352 = vmatprep.subr.bf16.mxu0 %v1280_v31  ;;  %1396 = vmatpush1.bf16.msra.mxu1 %v1281_v29 }
 0x2d0   : > { %1353 = vmatpush1.bf16.msra.mxu0 %v1279_v32  ;;  %1397 = vmatprep.subr.bf16.mxu1 %v4773_v20 }
 0x2d1   : > { %v1288_v33 = vpop.permute.xlu0 %1287  ;;  %v1290_v34 = vpop.permute.xlu1 %1289 }
 0x2d2   : > { %v1294_v36 = vsel %vm944_vm6, %v1288_v33, %v1290_v34  ;;  %v1293_v37 = vsel %vm944_vm6, %v1286_v56, %v1288_v33 }
 0x2d3   : > { %1354 = vmatprep.subr.bf16.mxu0 %v1294_v36 }
 0x2d4   : > { %1355 = vmatpush1.bf16.msra.mxu0 %v1293_v37 }
 0x2d5   : > { %v1302_v38 = vpop.permute.xlu0 %1301  ;;  %v1292_v39 = vpop.permute.xlu1 %1291 }
 0x2d6   : > { %v1295_v40 = vsel %vm944_vm6, %v1290_v34, %v1292_v39 }
 0x2d7   : > { %1398 = vmatpush1.bf16.msra.mxu1 %v1295_v40 }
 0x2d8   : > { %1399 = vmatprep.subr.bf16.mxu1 %v4773_v20 }
 0x2d9   : > { %v1300_v41 = vpop.permute.xlu0 %1299  ;;  %v1304_v42 = vpop.permute.xlu1 %1303 }
 0x2da   : > { %v1307_v43 = vsel %vm960_vm13, %v1300_v41, %v1302_v38  ;;  %v1308_v44 = vsel %vm960_vm13, %v1302_v38, %v1304_v42 }
 0x2db   : > { %1356 = vmatprep.subr.bf16.mxu0 %v1308_v44 }
 0x2dc   : > { %1357 = vmatpush1.bf16.msra.mxu0 %v1307_v43 }
 0x2dd   : > { %v1306_v10 = vpop.permute.xlu1 %1305 }
 0x2de   : > { %v1309_v46 = vsel %vm960_vm13, %v1304_v42, %v1306_v10 }
 0x2df   : > { %1373 = vmatmul.mubr.bf16.vlgmr.msra.gmra.mrb[4].mxu0 %v4722_v45  ;;  %1400 = vmatpush1.bf16.msra.mxu1 %v1309_v46 }
 0x2e0   : > { %1645 = vmatprep.subr.bf16.mxu1 %v4773_v20 }
 0x2e2   : > { %1416 = vmatmul.mubr.bf16.vlgmr.msra.gmra.mrb[4].mxu1 %v4722_v45 }
 0x2ea   : > { %v1320_v47 = vpop.permute.xlu0 %1319 }
 0x2ee   : > { %v1325_v52 = vpop.permute.xlu1 %1324 }
 0x3b2   : > { %v1374_v48 = vpop.f32.mrb[4].mxu0 }
 0x3b3   : > { %v1375_v50 = vadd.f32 %v1374_v48, %v1320_v47  ;;  %v1376_v51 = vpop.f32.mrb[5].mxu0 }
 0x3b4   : > { %v1377_v54 = vadd.f32 %v1376_v51, %v1320_v47  ;;  %v1378_v49 = vpop.f32.mrb[6].mxu0 }
 0x3b5   : > { %v1379_v55 = vadd.f32 %v1378_v49, %v1325_v52  ;;  %v1380_v56 = vpop.f32.mrb[7].mxu0  ;;  %v1417_v57 = vpop.f32.mrb[4].mxu1  ;;  %v1424_v61 = vmul.f32 %v1375_v50, %v5158_v6 }
 0x3b6   : > { %v1381_v59 = vadd.f32 %v1380_v56, %v1325_v52  ;;  %v1418_v60 = vadd.f32 %v1417_v57, %v1320_v47  ;;  %v1419_v53 = vpop.f32.mrb[5].mxu1  ;;  %v1425_v0 = vmul.f32 %v1377_v54, %v5160_v9 }
 0x3b7   : > { %v1427_v62 = vmul.f32 %v1379_v55, %v5158_v6  ;;  %v1420_v63 = vpop.f32.mrb[6].mxu1 }
 0x3b8   : > { %v1428_v1 = vmul.f32 %v1381_v59, %v5160_v9  ;;  %v1421_v2 = vadd.f32 %v1420_v63, %v1325_v52  ;;  %v1422_v4 = vpop.f32.mrb[7].mxu1  ;;  %v1426_v7 = vmul.f32 %v1418_v60, %v5162_v19 }
 0x3b9   : > { %v1430_v5 = vpack.c.bf16 %v1427_v62, %v1424_v61 }
 0x3ba   : > { %v1429_v8 = vmul.f32 %v1421_v2, %v5162_v19  ;;  %v1431_v11 = vpack.c.bf16 %v1428_v1, %v1425_v0 }
 0x3bb   : > { %1436 = vrot.lane.b32.xlu0 %v1430_v5, %s6698_s4 }
 0x3bc   : > { %1438 = vrot.lane.b32.xlu1 %v1431_v11, %s6698_s4  ;;  %v1432_v14 = vpack.c.bf16 %v1429_v8, %v1426_v7 }
 0x3bf   : > { %1440 = vrot.lane.b32.xlu0 %v1432_v14, %s6698_s4  ;;  %s6740_s4 = sld [smem:[#allocation11_spill]] }
 0x3c5   : > { %v4723_v23 = vld [vmem:[%s6740_s4 + $0x4] ss:$8 sps:$4 sm:$0xff]  }
 0x3c6   : > { %4432 = vmatprep.mubr.msk.bf16.mxu0 %vm1336_vm7, %v4723_v23  ;;  %4433 = vmatprep.mubr.msk.bf16.mxu1 %vm1336_vm7, %v4723_v23 }
 0x42d   : > { %v5290_v15 = vpop.permute.xlu0 %1436 }
 0x42e   : > { %v5294_v16 = vsel %vm1187_vm12, 0, %v5290_v15  ;;  %v1439_v17 = vpop.permute.xlu1 %1438 }
 0x42f   : > { %v5298_v18 = vsel %vm1187_vm12, %v5290_v15, %v1439_v17  ;;  %1464 = vrot.lane.b32.xlu1 %v5294_v16, %s6702_s7 }
 0x430   : > { %1602 = vmatprep.subr.bf16.mxu0 %v5298_v18 }
 0x431   : > { %4490 = vmatpush1.bf16.msk.msra.mxu0 %vm5193_vm15, %v5290_v15  ;;  %v1441_v12 = vpop.permute.xlu0 %1440 }
 0x432   : > { %v5307_v13 = vsel %vm1187_vm12, %v1439_v17, %v1441_v12  ;;  %v5310_v22 = vsel %vm1187_vm12, %v1441_v12, 0 }
 0x433   : > { %1478 = vrot.lane.b32.xlu1 %v5294_v16, %s6696_s0  ;;  %1470 = vrot.lane.b32.xlu0 %v5310_v22, %s6702_s7 }
 0x434   : > { %1646 = vmatpush1.bf16.msra.mxu1 %v5307_v13 }
 0x435   : > { %1647 = vmatprep.subr.bf16.mxu1 %v4773_v20 }
 0x437   : > { %1492 = vrot.lane.b32.xlu1 %v5294_v16, %s6700_s30  ;;  %1484 = vrot.lane.b32.xlu0 %v5310_v22, %s6696_s0 }
 0x43b   : > { %1506 = vrot.lane.b32.xlu1 %v5294_v16, %s6737_s8  ;;  %1498 = vrot.lane.b32.xlu0 %v5310_v22, %s6700_s30 }
 0x43f   : > { %1520 = vrot.lane.b32.xlu1 %v5294_v16, %s6738_s27  ;;  %1512 = vrot.lane.b32.xlu0 %v5310_v22, %s6737_s8 }
 0x443   : > { %1534 = vrot.lane.b32.xlu1 %v5294_v16, %s6739_s3  ;;  %1526 = vrot.lane.b32.xlu0 %v5310_v22, %s6738_s27 }
 0x447   : > { %1548 = vrot.lane.b32.xlu1 %v5294_v16, %s6733_s1  ;;  %1540 = vrot.lane.b32.xlu0 %v5310_v22, %s6739_s3 }
 0x44b   : > { %1466 = vrot.lane.b32.xlu1 %v5298_v18, %s6702_s7  ;;  %1554 = vrot.lane.b32.xlu0 %v5310_v22, %s6733_s1 }
 0x44f   : > { %1480 = vrot.lane.b32.xlu1 %v5298_v18, %s6696_s0  ;;  %1468 = vrot.lane.b32.xlu0 %v5307_v13, %s6702_s7  ;;  %s6745_s7 = smov 104  }
 0x453   : > { %1494 = vrot.lane.b32.xlu1 %v5298_v18, %s6700_s30  ;;  %1482 = vrot.lane.b32.xlu0 %v5307_v13, %s6696_s0  ;;  %s6743_s0 = smov 25  }
 0x457   : > { %1508 = vrot.lane.b32.xlu1 %v5298_v18, %s6737_s8  ;;  %1496 = vrot.lane.b32.xlu0 %v5307_v13, %s6700_s30 }
 0x45b   : > { %1522 = vrot.lane.b32.xlu1 %v5298_v18, %s6738_s27  ;;  %1510 = vrot.lane.b32.xlu0 %v5307_v13, %s6737_s8 }
 0x45f   : > { %1536 = vrot.lane.b32.xlu1 %v5298_v18, %s6739_s3  ;;  %1524 = vrot.lane.b32.xlu0 %v5307_v13, %s6738_s27 }
 0x463   : > { %1550 = vrot.lane.b32.xlu1 %v5298_v18, %s6733_s1  ;;  %1538 = vrot.lane.b32.xlu0 %v5307_v13, %s6739_s3 }
 0x467   : > { %1564 = vrot.lane.b32.xlu1 %v5298_v18, %s6735_s29  ;;  %1552 = vrot.lane.b32.xlu0 %v5307_v13, %s6733_s1 }
 0x46b   : > { %1562 = vrot.lane.b32.xlu1 %v5294_v16, %s6735_s29  ;;  %1566 = vrot.lane.b32.xlu0 %v5307_v13, %s6735_s29 }
 0x46f   : > { %1582 = vperm.xlu1 %4676, %v1578_v24   ;;  %1568 = vrot.lane.b32.xlu0 %v5310_v22, %s6735_s29 }
 0x473   : > { %1744 = vrot.lane.b32.xlu1 %v5307_v13, %s6742_s2  ;;  %1587 = vperm.xlu0 %4675, %v1579_v28  }
 0x477   : > { %1740 = vrot.lane.b32.xlu0 %v5294_v16, %s6742_s2 }
 0x47b   : > { %1742 = vrot.lane.b32.xlu0 %v5298_v18, %s6742_s2 }
 0x4a1   : > { %v1465_v29 = vpop.permute.xlu1 %1464 }
 0x4a5   : > { %v1479_v31 = vpop.permute.xlu1 %1478  ;;  %v1471_v32 = vpop.permute.xlu0 %1470 }
 0x4a9   : > { %v1493_v33 = vpop.permute.xlu1 %1492  ;;  %v1485_v34 = vpop.permute.xlu0 %1484 }
 0x4ad   : > { %v1507_v36 = vpop.permute.xlu1 %1506  ;;  %v1499_v37 = vpop.permute.xlu0 %1498 }
 0x4b1   : > { %v1521_v38 = vpop.permute.xlu1 %1520  ;;  %v1513_v39 = vpop.permute.xlu0 %1512 }
 0x4b5   : > { %v1535_v40 = vpop.permute.xlu1 %1534  ;;  %v1527_v41 = vpop.permute.xlu0 %1526 }
 0x4b9   : > { %v5393_v42 = vpop.permute.xlu1 %1548  ;;  %v1541_v43 = vpop.permute.xlu0 %1540 }
 0x4bd   : > { %v1467_v44 = vpop.permute.xlu1 %1466  ;;  %v1555_v45 = vpop.permute.xlu0 %1554 }
 0x4be   : > { %v1472_v50 = vsel %vm802_vm1, %v1465_v29, %v1467_v44 }
 0x4c1   : > { %v1481_v10 = vpop.permute.xlu1 %1480  ;;  %v1469_v46 = vpop.permute.xlu0 %1468 }
 0x4c2   : > { %v1473_v47 = vsel %vm802_vm1, %v1467_v44, %v1469_v46  ;;  %v1474_v48 = vsel %vm802_vm1, %v1469_v46, %v1471_v32  ;;  %v1486_v55 = vsel %vm821_vm11, %v1479_v31, %v1481_v10 }
 0x4c3   : > { %1604 = vmatprep.subr.bf16.mxu0 %v1473_v47  ;;  %1648 = vmatpush1.bf16.msra.mxu1 %v1474_v48 }
 0x4c4   : > { %1605 = vmatpush1.bf16.msra.mxu0 %v1472_v50  ;;  %1649 = vmatprep.subr.bf16.mxu1 %v4773_v20 }
 0x4c5   : > { %v1495_v51 = vpop.permute.xlu1 %1494  ;;  %v1483_v52 = vpop.permute.xlu0 %1482 }
 0x4c6   : > { %v1487_v54 = vsel %vm821_vm11, %v1481_v10, %v1483_v52  ;;  %v1488_v49 = vsel %vm821_vm11, %v1483_v52, %v1485_v34  ;;  %v1500_v53 = vsel %vm845_vm4, %v1493_v33, %v1495_v51 }
 0x4c7   : > { %1606 = vmatprep.subr.bf16.mxu0 %v1487_v54  ;;  %1650 = vmatpush1.bf16.msra.mxu1 %v1488_v49 }
 0x4c8   : > { %1607 = vmatpush1.bf16.msra.mxu0 %v1486_v55  ;;  %1651 = vmatprep.subr.bf16.mxu1 %v4773_v20 }
 0x4c9   : > { %v1509_v56 = vpop.permute.xlu1 %1508  ;;  %v1497_v57 = vpop.permute.xlu0 %1496 }
 0x4ca   : > { %v1501_v59 = vsel %vm845_vm4, %v1495_v51, %v1497_v57  ;;  %v1502_v60 = vsel %vm845_vm4, %v1497_v57, %v1499_v37  ;;  %v1514_v1 = vsel %vm870_vm8, %v1507_v36, %v1509_v56 }
 0x4cb   : > { %1608 = vmatprep.subr.bf16.mxu0 %v1501_v59  ;;  %1652 = vmatpush1.bf16.msra.mxu1 %v1502_v60 }
 0x4cc   : > { %1609 = vmatpush1.bf16.msra.mxu0 %v1500_v53  ;;  %1653 = vmatprep.subr.bf16.mxu1 %v4773_v20 }
 0x4cd   : > { %v1523_v61 = vpop.permute.xlu1 %1522  ;;  %v1511_v62 = vpop.permute.xlu0 %1510 }
 0x4ce   : > { %v1515_v63 = vsel %vm870_vm8, %v1509_v56, %v1511_v62  ;;  %v1516_v0 = vsel %vm870_vm8, %v1511_v62, %v1513_v39  ;;  %v1528_v8 = vsel %vm898_vm14, %v1521_v38, %v1523_v61  ;;  %v4725_v38 = vld [vmem:[%s6740_s4] ss:$8 sps:$4 sm:$0xff]  }
 0x4cf   : > { %1610 = vmatprep.subr.bf16.mxu0 %v1515_v63  ;;  %1654 = vmatpush1.bf16.msra.mxu1 %v1516_v0 }
 0x4d0   : > { %1611 = vmatpush1.bf16.msra.mxu0 %v1514_v1  ;;  %1655 = vmatprep.subr.bf16.mxu1 %v4773_v20 }
 0x4d1   : > { %v1537_v2 = vpop.permute.xlu1 %1536  ;;  %v1525_v4 = vpop.permute.xlu0 %1524 }
 0x4d2   : > { %v1529_v5 = vsel %vm898_vm14, %v1523_v61, %v1525_v4  ;;  %v1530_v7 = vsel %vm898_vm14, %v1525_v4, %v1527_v41  ;;  %v1542_v23 = vsel %vm920_vm3, %v1535_v40, %v1537_v2 }
 0x4d3   : > { %1612 = vmatprep.subr.bf16.mxu0 %v1529_v5  ;;  %1656 = vmatpush1.bf16.msra.mxu1 %v1530_v7 }
 0x4d4   : > { %1613 = vmatpush1.bf16.msra.mxu0 %v1528_v8  ;;  %1657 = vmatprep.subr.bf16.mxu1 %v4773_v20 }
 0x4d5   : > { %v1551_v11 = vpop.permute.xlu1 %1550  ;;  %v1539_v14 = vpop.permute.xlu0 %1538 }
 0x4d6   : > { %v1543_v17 = vsel %vm920_vm3, %v1537_v2, %v1539_v14  ;;  %v1544_v12 = vsel %vm920_vm3, %v1539_v14, %v1541_v43  ;;  %v1556_v32 = vsel %vm944_vm6, %v5393_v42, %v1551_v11 }
 0x4d7   : > { %1614 = vmatprep.subr.bf16.mxu0 %v1543_v17  ;;  %1658 = vmatpush1.bf16.msra.mxu1 %v1544_v12 }
 0x4d8   : > { %1615 = vmatpush1.bf16.msra.mxu0 %v1542_v23  ;;  %1659 = vmatprep.subr.bf16.mxu1 %v4773_v20 }
 0x4d9   : > { %v1565_v24 = vpop.permute.xlu1 %1564  ;;  %v1553_v28 = vpop.permute.xlu0 %1552 }
 0x4da   : > { %v1557_v29 = vsel %vm944_vm6, %v1551_v11, %v1553_v28  ;;  %v1558_v31 = vsel %vm944_vm6, %v1553_v28, %v1555_v45 }
 0x4db   : > { %1616 = vmatprep.subr.bf16.mxu0 %v1557_v29  ;;  %1660 = vmatpush1.bf16.msra.mxu1 %v1558_v31 }
 0x4dc   : > { %1617 = vmatpush1.bf16.msra.mxu0 %v1556_v32  ;;  %1661 = vmatprep.subr.bf16.mxu1 %v4773_v20 }
 0x4dd   : > { %v1563_v33 = vpop.permute.xlu1 %1562  ;;  %v1567_v34 = vpop.permute.xlu0 %1566 }
 0x4de   : > { %v1570_v36 = vsel %vm960_vm13, %v1563_v33, %v1565_v24  ;;  %v1571_v37 = vsel %vm960_vm13, %v1565_v24, %v1567_v34 }
 0x4df   : > { %1618 = vmatprep.subr.bf16.mxu0 %v1571_v37 }
 0x4e0   : > { %1619 = vmatpush1.bf16.msra.mxu0 %v1570_v36 }
 0x4e1   : > { %1999 = vmatprep.subr.bf16.mxu0 %v5298_v18  ;;  %v1569_v39 = vpop.permute.xlu0 %1568 }
 0x4e2   : > { %v1572_v40 = vsel %vm960_vm13, %v1567_v34, %v1569_v39 }
 0x4e3   : > { %1635 = vmatmul.mubr.bf16.vlgmr.msra.gmra.mrb[8].mxu0 %v4725_v38  ;;  %1662 = vmatpush1.bf16.msra.mxu1 %v1572_v40 }
 0x4e4   : > { %4492 = vmatpush1.bf16.msk.msra.mxu0 %vm5193_vm15, %v5290_v15 }
 0x4e6   : > { %1678 = vmatmul.mubr.bf16.vlgmr.msra.gmra.mrb[8].mxu1 %v4725_v38 }
 0x4ee   : > { %v1583_v41 = vpop.permute.xlu1 %1582 }
 0x4f2   : > { %v1588_v45 = vpop.permute.xlu0 %1587  ;;  %v5481_v14 = vpop.permute.xlu1 %1744 }
 0x4f6   : > { %v1741_v11 = vpop.permute.xlu0 %1740 }
 0x4fa   : > { %v1743_v17 = vpop.permute.xlu0 %1742 }
 0x4fb   : > { %v1757_v32 = vsel %vm802_vm1, %v1743_v17, %v5481_v14  ;;  %v1756_v34 = vsel %vm802_vm1, %v1741_v11, %v1743_v17 }
 0x5b6   : > { %v1636_v42 = vpop.f32.mrb[8].mxu0 }
 0x5b7   : > { %v1637_v43 = vadd.f32 %v1636_v42, %v1583_v41  ;;  %v1638_v44 = vpop.f32.mrb[9].mxu0 }
 0x5b8   : > { %v1639_v10 = vadd.f32 %v1638_v44, %v1583_v41  ;;  %v1640_v46 = vpop.f32.mrb[10].mxu0 }
 0x5b9   : > { %v1686_v47 = vmax.f32 %v1637_v43, 0.0  ;;  %v1641_v48 = vadd.f32 %v1640_v46, %v1588_v45  ;;  %v1642_v50 = vpop.f32.mrb[11].mxu0  ;;  %v1679_v51 = vpop.f32.mrb[8].mxu1  ;;  %v1968_v46 = vld [vmem:[%s6747_s11] sm:$0xff] }
 0x5ba   : > { %v1687_v52 = vmax.f32 %v1639_v10, 0.0  ;;  %v1643_v54 = vadd.f32 %v1642_v50, %v1588_v45  ;;  %v1680_v49 = vadd.f32 %v1679_v51, %v1583_v41  ;;  %v1681_v55 = vpop.f32.mrb[9].mxu1  ;;  %v4728_v41 = vld [vmem:[%s6746_s10 + $0x4] ss:$12 sps:$4 sm:$0xff]  }
 0x5bb   : > { %v1689_v56 = vmax.f32 %v1641_v48, 0.0  ;;  %v1682_v57 = vpop.f32.mrb[10].mxu1  ;;  %v1692_v61 = vmul.f32 %v1686_v47, %v5158_v6  ;;  %2117 = vmatprep.mubr.bf16.mxu1 %v4728_v41  ;;  %2031 = vmatprep.mubr.bf16.mxu0 %v4728_v41  ;;  %v1969_v47 = vld [vmem:[%s6747_s11 + $0x8] sm:$0xff]  ;;  %s6749_s11 = sld [smem:[#allocation9_spill]] }
 0x5bc   : > { %v1690_v59 = vmax.f32 %v1643_v54, 0.0  ;;  %v1688_v15 = vmax.f32 %v1680_v49, 0.0  ;;  %v1683_v60 = vadd.f32 %v1682_v57, %v1588_v45  ;;  %v1684_v53 = vpop.f32.mrb[11].mxu1  ;;  %v1693_v63 = vmul.f32 %v1687_v52, %v5160_v9 }
 0x5bd   : > { %v1695_v62 = vmul.f32 %v1689_v56, %v5158_v6 }
 0x5be   : > { %v1696_v0 = vmul.f32 %v1690_v59, %v5160_v9  ;;  %v1691_v1 = vmax.f32 %v1683_v60, 0.0  ;;  %v1694_v5 = vmul.f32 %v1688_v15, %v5162_v19 }
 0x5bf   : > { %v1698_v2 = vpack.c.bf16 %v1695_v62, %v1692_v61 }
 0x5c0   : > { %v1699_v4 = vpack.c.bf16 %v1696_v0, %v1693_v63  ;;  %v1697_v7 = vmul.f32 %v1691_v1, %v5162_v19 }
 0x5c2   : > { %v1700_v8 = vpack.c.bf16 %v1697_v7, %v1694_v5  ;;  %1706 = vrot.lane.b32.xlu0 %v1699_v4, %s6743_s0 }
 0x5c4   : > { %1708 = vrot.lane.b32.xlu1 %v1700_v8, %s6743_s0 }
 0x5c6   : > { %1770 = vrot.lane.b32.xlu0 %v5298_v18, %s6744_s25 }
 0x5c8   : > { %1704 = vrot.lane.b32.xlu1 %v1698_v2, %s6743_s0 }
 0x5ca   : > { %1768 = vrot.lane.b32.xlu0 %v5294_v16, %s6744_s25 }
 0x5cc   : > { %1772 = vrot.lane.b32.xlu1 %v5307_v13, %s6744_s25 }
 0x5ce   : > { %1798 = vrot.lane.b32.xlu0 %v5298_v18, %s6745_s7 }
 0x5d0   : > { %1800 = vrot.lane.b32.xlu1 %v5307_v13, %s6745_s7 }
 0x5d2   : > { %1796 = vrot.lane.b32.xlu0 %v5294_v16, %s6745_s7 }
 0x5d4   : > { %1828 = vrot.lane.b32.xlu1 %v5307_v13, %s6737_s8 }
 0x5d6   : > { %1826 = vrot.lane.b32.xlu0 %v5298_v18, %s6737_s8 }
 0x5d8   : > { %1830 = vrot.lane.b32.xlu1 %v5310_v22, %s6737_s8 }
 0x5da   : > { %1824 = vrot.lane.b32.xlu0 %v5294_v16, %s6737_s8 }
 0x5dc   : > { %1854 = vrot.lane.b32.xlu1 %v5298_v18, %s6738_s27 }
 0x5de   : > { %1856 = vrot.lane.b32.xlu0 %v5307_v13, %s6738_s27 }
 0x5e0   : > { %1858 = vrot.lane.b32.xlu1 %v5310_v22, %s6738_s27 }
 0x5e2   : > { %1852 = vrot.lane.b32.xlu0 %v5294_v16, %s6738_s27 }
 0x5e4   : > { %1746 = vrot.lane.b32.xlu1 %v5310_v22, %s6742_s2 }
 0x5e6   : > { %1882 = vrot.lane.b32.xlu0 %v5298_v18, %s6739_s3 }
 0x5e8   : > { %1884 = vrot.lane.b32.xlu1 %v5307_v13, %s6739_s3 }
 0x5ec   : > { %1880 = vrot.lane.b32.xlu1 %v5294_v16, %s6739_s3 }
 0x5f0   : > { %1886 = vrot.lane.b32.xlu1 %v5310_v22, %s6739_s3 }
 0x634   : > { %v1707_v24 = vpop.permute.xlu0 %1706 }
 0x636   : > { %v1709_v12 = vpop.permute.xlu1 %1708 }
 0x637   : > { %v5484_v23 = vsel %vm1187_vm12, %v1709_v12, 0  ;;  %v5521_v38 = vsel %vm1187_vm12, %v1707_v24, %v1709_v12 }
 0x638   : > { %1866 = vrot.lane.b32.xlu0 %v5484_v23, %s6738_s27  ;;  %1838 = vrot.lane.b32.xlu1 %v5484_v23, %s6737_s8  ;;  %v1771_v42 = vpop.permute.xlu0 %1770 }
 0x63a   : > { %v1705_v28 = vpop.permute.xlu1 %1704 }
 0x63b   : > { %v5491_v29 = vsel %vm1187_vm12, %v1705_v28, %v1707_v24  ;;  %v5494_v31 = vsel %vm1187_vm12, 0, %v1705_v28 }
 0x63c   : > { %1754 = vrot.lane.b32.xlu0 %v5484_v23, %s6742_s2  ;;  %1748 = vrot.lane.b32.xlu1 %v5494_v31, %s6742_s2  ;;  %v1769_v43 = vpop.permute.xlu0 %1768 }
 0x63d   : > { %2001 = vmatprep.subr.bf16.mxu0 %v5491_v29  ;;  %v1784_v12 = vsel %vm821_vm11, %v1769_v43, %v1771_v42 }
 0x63e   : > { %4494 = vmatpush1.bf16.msk.msra.mxu0 %vm5193_vm15, %v1705_v28  ;;  %v5505_v33 = vpop.permute.xlu1 %1772 }
 0x63f   : > { %2003 = vmatprep.subr.bf16.mxu0 %v1757_v32  ;;  %v1785_v8 = vsel %vm821_vm11, %v1771_v42, %v5505_v33 }
 0x640   : > { %1832 = vrot.lane.b32.xlu0 %v5494_v31, %s6737_s8  ;;  %1776 = vrot.lane.b32.xlu1 %v5494_v31, %s6744_s25  ;;  %v1799_v44 = vpop.permute.xlu0 %1798 }
 0x642   : > { %2004 = vmatpush1.bf16.msra.mxu0 %v1756_v34  ;;  %v5512_v36 = vpop.permute.xlu1 %1800 }
 0x644   : > { %1860 = vrot.lane.b32.xlu0 %v5494_v31, %s6738_s27  ;;  %1804 = vrot.lane.b32.xlu1 %v5494_v31, %s6745_s7  ;;  %v1797_v45 = vpop.permute.xlu0 %1796 }
 0x645   : > { %v1812_v42 = vsel %vm845_vm4, %v1797_v45, %v1799_v44 }
 0x646   : > { %v5518_v37 = vpop.permute.xlu1 %1828 }
 0x648   : > { %1752 = vrot.lane.b32.xlu0 %v5521_v38, %s6742_s2  ;;  %1750 = vrot.lane.b32.xlu1 %v5491_v29, %s6742_s2  ;;  %v1827_v48 = vpop.permute.xlu0 %1826 }
 0x64a   : > { %v1831_v39 = vpop.permute.xlu1 %1830 }
 0x64b   : > { %v1842_v40 = vsel %vm870_vm8, %v5518_v37, %v1831_v39  ;;  %v1813_v39 = vsel %vm845_vm4, %v1799_v44, %v5512_v36 }
 0x64c   : > { %1888 = vrot.lane.b32.xlu0 %v5494_v31, %s6739_s3  ;;  %1774 = vrot.lane.b32.xlu1 %v5310_v22, %s6744_s25  ;;  %v1825_v51 = vpop.permute.xlu0 %1824 }
 0x64d   : > { %4504 = vmatprep.subr.bf16.mxu1 %v1842_v40 }
 0x64e   : > { %4505 = vmatpush3.bf16.msra.mxu1 %v5307_v13  ;;  %v5593_v10 = vpop.permute.xlu1 %1854 }
 0x650   : > { %1780 = vrot.lane.b32.xlu0 %v5521_v38, %s6744_s25  ;;  %1778 = vrot.lane.b32.xlu1 %v5491_v29, %s6744_s25  ;;  %v1857_v54 = vpop.permute.xlu0 %1856 }
 0x652   : > { %v5605_v50 = vpop.permute.xlu1 %1858 }
 0x654   : > { %1910 = vrot.lane.b32.xlu0 %v5298_v18, %s6733_s1  ;;  %1912 = vrot.lane.b32.xlu1 %v5307_v13, %s6733_s1  ;;  %v5611_v55 = vpop.permute.xlu0 %1852 }
 0x656   : > { %v5607_v52 = vpop.permute.xlu1 %1746 }
 0x658   : > { %1808 = vrot.lane.b32.xlu0 %v5521_v38, %s6745_s7  ;;  %1806 = vrot.lane.b32.xlu1 %v5491_v29, %s6745_s7  ;;  %v5615_v57 = vpop.permute.xlu0 %1882 }
 0x65a   : > { %v5609_v49 = vpop.permute.xlu1 %1884 }
 0x65c   : > { %1894 = vrot.lane.b32.xlu0 %v5484_v23, %s6739_s3  ;;  %1908 = vrot.lane.b32.xlu1 %v5294_v16, %s6733_s1 }
 0x65e   : > { %v5613_v56 = vpop.permute.xlu1 %1880 }
 0x660   : > { %1836 = vrot.lane.b32.xlu0 %v5521_v38, %s6737_s8  ;;  %1834 = vrot.lane.b32.xlu1 %v5491_v29, %s6737_s8 }
 0x662   : > { %v5617_v59 = vpop.permute.xlu1 %1886 }
 0x664   : > { %1782 = vrot.lane.b32.xlu0 %v5484_v23, %s6744_s25  ;;  %1914 = vrot.lane.b32.xlu1 %v5310_v22, %s6733_s1 }
 0x668   : > { %1864 = vrot.lane.b32.xlu0 %v5521_v38, %s6738_s27  ;;  %1862 = vrot.lane.b32.xlu1 %v5491_v29, %s6738_s27 }
 0x66c   : > { %1916 = vrot.lane.b32.xlu0 %v5494_v31, %s6733_s1  ;;  %1802 = vrot.lane.b32.xlu1 %v5310_v22, %s6745_s7 }
 0x670   : > { %1892 = vrot.lane.b32.xlu0 %v5521_v38, %s6739_s3  ;;  %1890 = vrot.lane.b32.xlu1 %v5491_v29, %s6739_s3 }
 0x674   : > { %1922 = vrot.lane.b32.xlu0 %v5484_v23, %s6733_s1  ;;  %1810 = vrot.lane.b32.xlu1 %v5484_v23, %s6745_s7 }
 0x678   : > { %1920 = vrot.lane.b32.xlu0 %v5521_v38, %s6733_s1  ;;  %1918 = vrot.lane.b32.xlu1 %v5491_v29, %s6733_s1 }
 0x67c   : > { %1938 = vrot.lane.b32.xlu0 %v5298_v18, %s6735_s29  ;;  %1940 = vrot.lane.b32.xlu1 %v5307_v13, %s6735_s29 }
 0x680   : > { %1936 = vrot.lane.b32.xlu0 %v5294_v16, %s6735_s29  ;;  %1942 = vrot.lane.b32.xlu1 %v5310_v22, %s6735_s29 }
 0x684   : > { %1946 = vrot.lane.b32.xlu0 %v5491_v29, %s6735_s29  ;;  %1948 = vrot.lane.b32.xlu1 %v5521_v38, %s6735_s29 }
 0x688   : > { %1944 = vrot.lane.b32.xlu0 %v5494_v31, %s6735_s29  ;;  %1950 = vrot.lane.b32.xlu1 %v5484_v23, %s6735_s29 }
 0x68c   : > { %1972 = vperm.xlu0 %4675, %v1968_v46   ;;  %1977 = vperm.xlu1 %4676, %v1969_v47  }
 0x6aa   : > { %v5619_v15 = vpop.permute.xlu0 %1866  ;;  %v1839_v60 = vpop.permute.xlu1 %1838 }
 0x6ae   : > { %v5621_v53 = vpop.permute.xlu0 %1754  ;;  %v1749_v61 = vpop.permute.xlu1 %1748 }
 0x6b2   : > { %v1833_v62 = vpop.permute.xlu0 %1832  ;;  %v1777_v63 = vpop.permute.xlu1 %1776 }
 0x6b6   : > { %v1861_v0 = vpop.permute.xlu0 %1860  ;;  %v1805_v1 = vpop.permute.xlu1 %1804 }
 0x6ba   : > { %v5623_v2 = vpop.permute.xlu0 %1752  ;;  %v1751_v4 = vpop.permute.xlu1 %1750 }
 0x6bb   : > { %v1760_v5 = vsel %vm802_vm1, %v1751_v4, %v5623_v2  ;;  %v1759_v7 = vsel %vm802_vm1, %v1749_v61, %v1751_v4 }
 0x6bc   : > { %2005 = vmatprep.subr.bf16.mxu0 %v1760_v5 }
 0x6bd   : > { %2006 = vmatpush1.bf16.msra.mxu0 %v1759_v7  ;;  %v1840_v7 = vsel %vm870_vm8, %v1825_v51, %v1827_v48 }
 0x6be   : > { %v5630_v11 = vpop.permute.xlu0 %1888  ;;  %2007 = vmatprep.subr.bf16.mxu0 %v1785_v8  ;;  %v5632_v17 = vpop.permute.xlu1 %1774 }
 0x6c1   : > { %2008 = vmatpush1.bf16.msra.mxu0 %v1784_v12 }
 0x6c2   : > { %v5635_v24 = vpop.permute.xlu0 %1780  ;;  %v1779_v28 = vpop.permute.xlu1 %1778 }
 0x6c3   : > { %v1788_v32 = vsel %vm821_vm11, %v1779_v28, %v5635_v24  ;;  %v1787_v34 = vsel %vm821_vm11, %v1777_v63, %v1779_v28  ;;  %v1841_v63 = vsel %vm870_vm8, %v1827_v48, %v5518_v37  ;;  %v1869_v37 = vsel %vm898_vm14, %v5593_v10, %v1857_v54 }
 0x6c4   : > { %2009 = vmatprep.subr.bf16.mxu0 %v1788_v32  ;;  %v1870_v48 = vsel %vm898_vm14, %v1857_v54, %v5605_v50 }
 0x6c5   : > { %2010 = vmatpush1.bf16.msra.mxu0 %v1787_v34 }
 0x6c6   : > { %v5642_v40 = vpop.permute.xlu0 %1910  ;;  %2011 = vmatprep.subr.bf16.mxu0 %v1813_v39  ;;  %v5644_v41 = vpop.permute.xlu1 %1912 }
 0x6c9   : > { %2012 = vmatpush1.bf16.msra.mxu0 %v1812_v42 }
 0x6ca   : > { %v5647_v43 = vpop.permute.xlu0 %1808  ;;  %v1807_v46 = vpop.permute.xlu1 %1806 }
 0x6cb   : > { %v1816_v47 = vsel %vm845_vm4, %v1807_v46, %v5647_v43  ;;  %v1815_v61 = vsel %vm845_vm4, %v1805_v1, %v1807_v46 }
 0x6cc   : > { %2013 = vmatprep.subr.bf16.mxu0 %v1816_v47 }
 0x6cd   : > { %2014 = vmatpush1.bf16.msra.mxu0 %v1815_v61 }
 0x6ce   : > { %v1895_v4 = vpop.permute.xlu0 %1894  ;;  %2015 = vmatprep.subr.bf16.mxu0 %v1841_v63  ;;  %v1909_v5 = vpop.permute.xlu1 %1908 }
 0x6d1   : > { %2016 = vmatpush1.bf16.msra.mxu0 %v1840_v7 }
 0x6d2   : > { %v1837_v44 = vpop.permute.xlu0 %1836  ;;  %v1835_v45 = vpop.permute.xlu1 %1834 }
 0x6d3   : > { %v1844_v8 = vsel %vm870_vm8, %v1835_v45, %v1837_v44  ;;  %v1845_v12 = vsel %vm870_vm8, %v1837_v44, %v1839_v60  ;;  %v1843_v28 = vsel %vm870_vm8, %v1833_v62, %v1835_v45  ;;  %v1868_v60 = vsel %vm898_vm14, %v5611_v55, %v5593_v10 }
 0x6d4   : > { %2017 = vmatprep.subr.bf16.mxu0 %v1844_v8  ;;  %4506 = vmatprep.subr.bf16.mxu1 %v1845_v12  ;;  %v1758_v62 = vsel %vm802_vm1, %v5481_v14, %v5607_v52  ;;  %v1761_v10 = vsel %vm802_vm1, %v5623_v2, %v5621_v53  ;;  %v1897_v14 = vsel %vm920_vm3, %v5615_v57, %v5609_v49 }
 0x6d5   : > { %2018 = vmatpush1.bf16.msra.mxu0 %v1843_v28  ;;  %4507 = vmatpush3.bf16.msra.mxu1 %v5521_v38  ;;  %v1898_v52 = vsel %vm920_vm3, %v5609_v49, %v5617_v59  ;;  %v1786_v53 = vsel %vm821_vm11, %v5505_v33, %v5632_v17  ;;  %v1925_v33 = vsel %vm944_vm6, %v5642_v40, %v5644_v41 }
 0x6d6   : > { %v1783_v51 = vpop.permute.xlu0 %1782  ;;  %2019 = vmatprep.subr.bf16.mxu0 %v1869_v37  ;;  %4508 = vmatprep.subr.bf16.mxu1 %v1870_v48  ;;  %v1915_v1 = vpop.permute.xlu1 %1914 }
 0x6d7   : > { %v1789_v47 = vsel %vm821_vm11, %v5635_v24, %v1783_v51 }
 0x6d9   : > { %2020 = vmatpush1.bf16.msra.mxu0 %v1868_v60  ;;  %4509 = vmatpush3.bf16.msra.mxu1 %v1758_v62 }
 0x6da   : > { %v1865_v32 = vpop.permute.xlu0 %1864  ;;  %v1863_v34 = vpop.permute.xlu1 %1862 }
 0x6db   : > { %v1872_v39 = vsel %vm898_vm14, %v1863_v34, %v1865_v32  ;;  %v1873_v50 = vsel %vm898_vm14, %v1865_v32, %v5619_v15  ;;  %v1871_v54 = vsel %vm898_vm14, %v1861_v0, %v1863_v34  ;;  %v1896_v0 = vsel %vm920_vm3, %v5613_v56, %v5615_v57  ;;  %v4729_v34 = vld [vmem:[%s6746_s10 + $0x8] ss:$12 sps:$4 sm:$0xff]  }
 0x6dc   : > { %2021 = vmatprep.subr.bf16.mxu0 %v1872_v39  ;;  %4510 = vmatprep.subr.bf16.mxu1 %v1873_v50  ;;  %v1926_v56 = vsel %vm944_vm6, %v5644_v41, %v1915_v1 }
 0x6dd   : > { %2022 = vmatpush1.bf16.msra.mxu0 %v1871_v54  ;;  %4511 = vmatpush3.bf16.msra.mxu1 %v1761_v10 }
 0x6de   : > { %v1917_v55 = vpop.permute.xlu0 %1916  ;;  %2023 = vmatprep.subr.bf16.mxu0 %v1897_v14  ;;  %4512 = vmatprep.subr.bf16.mxu1 %v1898_v52  ;;  %v1803_v15 = vpop.permute.xlu1 %1802 }
 0x6df   : > { %v1814_v24 = vsel %vm845_vm4, %v5512_v36, %v1803_v15 }
 0x6e1   : > { %2024 = vmatpush1.bf16.msra.mxu0 %v1896_v0  ;;  %4513 = vmatpush3.bf16.msra.mxu1 %v1786_v53 }
 0x6e2   : > { %v1893_v2 = vpop.permute.xlu0 %1892  ;;  %v1891_v42 = vpop.permute.xlu1 %1890 }
 0x6e3   : > { %v1900_v46 = vsel %vm920_vm3, %v1891_v42, %v1893_v2  ;;  %v1901_v49 = vsel %vm920_vm3, %v1893_v2, %v1895_v4  ;;  %v1899_v59 = vsel %vm920_vm3, %v5630_v11, %v1891_v42  ;;  %v1924_v11 = vsel %vm944_vm6, %v1909_v5, %v5642_v40  ;;  %v4726_v40 = vld [vmem:[%s6746_s10] ss:$12 sps:$4 sm:$0xff]  }
 0x6e4   : > { %2025 = vmatprep.subr.bf16.mxu0 %v1900_v46  ;;  %4514 = vmatprep.subr.bf16.mxu1 %v1901_v49 }
 0x6e5   : > { %2026 = vmatpush1.bf16.msra.mxu0 %v1899_v59  ;;  %4515 = vmatpush3.bf16.msra.mxu1 %v1789_v47 }
 0x6e6   : > { %v1923_v57 = vpop.permute.xlu0 %1922  ;;  %2027 = vmatprep.subr.bf16.mxu0 %v1925_v33  ;;  %4516 = vmatprep.subr.bf16.mxu1 %v1926_v56  ;;  %v1811_v17 = vpop.permute.xlu1 %1810 }
 0x6e7   : > { %v1817_v44 = vsel %vm845_vm4, %v5647_v43, %v1811_v17 }
 0x6e9   : > { %2028 = vmatpush1.bf16.msra.mxu0 %v1924_v11  ;;  %4517 = vmatpush3.bf16.msra.mxu1 %v1814_v24 }
 0x6ea   : > { %v1921_v61 = vpop.permute.xlu0 %1920  ;;  %v1919_v63 = vpop.permute.xlu1 %1918 }
 0x6eb   : > { %v1928_v4 = vsel %vm944_vm6, %v1919_v63, %v1921_v61  ;;  %v1929_v7 = vsel %vm944_vm6, %v1921_v61, %v1923_v57  ;;  %v1927_v41 = vsel %vm944_vm6, %v1917_v55, %v1919_v63 }
 0x6ec   : > { %2029 = vmatprep.subr.bf16.mxu0 %v1928_v4  ;;  %4518 = vmatprep.subr.bf16.mxu1 %v1929_v7 }
 0x6ed   : > { %2030 = vmatpush1.bf16.msra.mxu0 %v1927_v41  ;;  %4519 = vmatpush3.bf16.msra.mxu1 %v1817_v44 }
 0x6ee   : > { %v1939_v36 = vpop.permute.xlu0 %1938  ;;  %v1941_v5 = vpop.permute.xlu1 %1940  ;;  %4574 = vmatprep.subr.bf16.mxu1 %v4770_v58 }
 0x6ef   : > { %v1953_v45 = vsel %vm960_vm13, %v1939_v36, %v1941_v5 }
 0x6f0   : > { %2042 = vmatprep.subr.bf16.mxu0 %v1953_v45  ;;  %2118 = vmatmul.mubr.bf16.vlgmr.msra.gmra.mrb[12].mxu1 %v4726_v40 }
 0x6f1   : > { %2032 = vmatmul.mubr.bf16.vlgmr.msra.gmra.mrb[12].mxu0 %v4726_v40  ;;  %4578 = vmatprep.mubr.msk.bf16.mxu1 %vm4775_vm0, %v4770_v58 }
 0x6f2   : > { %v1937_v43 = vpop.permute.xlu0 %1936  ;;  %v1943_v8 = vpop.permute.xlu1 %1942  ;;  %2074 = vmatprep.mubr.bf16.mxu0 %v4773_v20 }
 0x6f3   : > { %v1952_v12 = vsel %vm960_vm13, %v1937_v43, %v1939_v36  ;;  %v1954_v28 = vsel %vm960_vm13, %v1941_v5, %v1943_v8 }
 0x6f4   : > { %2043 = vmatpush1.bf16.msra.mxu0 %v1952_v12  ;;  %4575 = vmatpush3.bf16.msra.mxu1 %v1954_v28 }
 0x6f5   : > { %4576 = vmatprep.subr.bf16.mxu1 %v4770_v58 }
 0x6f6   : > { %v1947_v37 = vpop.permute.xlu0 %1946  ;;  %v1949_v48 = vpop.permute.xlu1 %1948 }
 0x6f7   : > { %v1956_v51 = vsel %vm960_vm13, %v1947_v37, %v1949_v48 }
 0x6f8   : > { %2044 = vmatprep.subr.bf16.mxu0 %v1956_v51 }
 0x6fa   : > { %v1945_v1 = vpop.permute.xlu0 %1944  ;;  %v1951_v60 = vpop.permute.xlu1 %1950 }
 0x6fb   : > { %v1955_v62 = vsel %vm960_vm13, %v1945_v1, %v1947_v37  ;;  %v1957_v32 = vsel %vm960_vm13, %v1949_v48, %v1951_v60 }
 0x6fc   : > { %2045 = vmatpush1.bf16.msra.mxu0 %v1955_v62  ;;  %4577 = vmatpush3.bf16.msra.mxu1 %v1957_v32 }
 0x6fd   : > { %2652 = vmatprep.subr.bf16.mxu0 %v4773_v20 }
 0x6ff   : > { %4437 = vmatmul.mubr.msk.bf16.vlgmr.msra.gmra.mrb[12].mxu0 %vm1995_vm9, %v4729_v34  ;;  %4579 = vmatmul.mubr.msk.bf16.vlgmr.msra.gmra.mrb[16].mxu1 %vm1995_vm9, %v4729_v34 }
 0x700   : > { %2326 = vmatprep.mubr.bf16.mxu1 %v4773_v20 }
 0x70b   : > { %v1973_v55 = vpop.permute.xlu0 %1972  ;;  %v1978_v15 = vpop.permute.xlu1 %1977 }
 0x7c3   : > { %v4520_v39 = vpop.f32.mrb[12].mxu1 }
 0x7c4   : > { %v4521_v50 = vpop.f32.mrb[13].mxu1 }
 0x7c5   : > { %v4522_v54 = vadd.f32 %v4521_v50, %v4520_v39  ;;  %v4523_v10 = vpop.f32.mrb[14].mxu1 }
 0x7c6   : > { %v4524_v14 = vpop.f32.mrb[15].mxu1 }
 0x7c7   : > { %v4525_v52 = vadd.f32 %v4524_v14, %v4523_v10  ;;  %v2120_v0 = vadd.f32 %v4522_v54, %v1973_v55  ;;  %v2219_v14 = vld [vmem:[%s6668_s13] sm:$0xff] }
 0x7c9   : > { %v2123_v47 = vadd.f32 %v4525_v52, %v1978_v15 }
 0x7d2   : > { %v2076_v53 = vpop.f32.mrb[12].mxu0  ;;  %v2160_v2 = vpop.f32.mrb[16].mxu1 }
 0x7d3   : > { %v4622_v42 = vadd.f32 %v2076_v53, %v1973_v55  ;;  %v2161_v46 = vadd.f32 %v2160_v2, %v2120_v0  ;;  %v2078_v49 = vpop.f32.mrb[13].mxu0  ;;  %v4580_v59 = vpop.f32.mrb[17].mxu1  ;;  %v2379_v0 = vunpack.c.l.bf16 %v5298_v18 }
 0x7d4   : > { %v4623_v33 = vadd.f32 %v2078_v49, %v1973_v55  ;;  %v2080_v56 = vpop.f32.mrb[14].mxu0  ;;  %v2163_v57 = vpop.f32.mrb[18].mxu1 }
 0x7d5   : > { %v2167_v17 = vmax.f32 %v4622_v42, 0.0  ;;  %v2169_v11 = vmax.f32 %v2161_v46, 0.0  ;;  %v4624_v24 = vadd.f32 %v2080_v56, %v1978_v15  ;;  %v2164_v61 = vadd.f32 %v2163_v57, %v2123_v47  ;;  %v2082_v63 = vpop.f32.mrb[15].mxu0  ;;  %v4581_v4 = vpop.f32.mrb[19].mxu1 }
 0x7d6   : > { %v2168_v7 = vmax.f32 %v4623_v33, 0.0  ;;  %v4625_v41 = vadd.f32 %v2082_v63, %v1978_v15  ;;  %v2378_v15 = vunpack.c.l.bf16 %v5294_v16  ;;  %v2380_v42 = vunpack.c.l.bf16 %v5307_v13 }
 0x7d7   : > { %v2170_v44 = vmax.f32 %v4624_v24, 0.0  ;;  %v2172_v40 = vmax.f32 %v2164_v61, 0.0  ;;  %v2173_v5 = vmul.f32 %v2167_v17, %v5158_v6  ;;  %v2175_v45 = vmul.f32 %v2169_v11, %v5162_v19 }
 0x7d8   : > { %v2171_v36 = vmax.f32 %v4625_v41, 0.0  ;;  %v2174_v12 = vmul.f32 %v2168_v7, %v5160_v9  ;;  %v2381_v46 = vunpack.c.l.bf16 %v5310_v22  ;;  %v4677_v59 = vpack.i.bf16 %v2379_v0, %v2378_v15 }
 0x7d9   : > { %v2176_v43 = vmul.f32 %v2170_v44, %v5158_v6  ;;  %v2178_v8 = vmul.f32 %v2172_v40, %v5162_v19  ;;  %v2382_v47 = vunpack.c.h.bf16 %v5294_v16  ;;  %v2383_v33 = vunpack.c.h.bf16 %v5298_v18 }
 0x7da   : > { %v2177_v28 = vmul.f32 %v2171_v36, %v5160_v9  ;;  %v4682_v56 = vpack.i.bf16 %v2381_v46, %v2380_v42  ;;  %v2384_v57 = vunpack.c.h.bf16 %v5307_v13  ;;  %v2385_v17 = vunpack.c.h.bf16 %v5310_v22 }
 0x7db   : > { %v2179_v37 = vpack.c.bf16 %v2176_v43, %v2173_v5  ;;  %v2181_v48 = vpack.c.bf16 %v2178_v8, %v2175_v45  ;;  %v4687_v11 = vpack.i.bf16 %v2383_v33, %v2382_v47 }
 0x7dc   : > { %v2180_v51 = vpack.c.bf16 %v2177_v28, %v2174_v12  ;;  %v4692_v24 = vpack.i.bf16 %v2385_v17, %v2384_v57 }
 0x7dd   : > { %2185 = vrot.lane.b32.xlu0 %v2179_v37, %s6743_s0 }
 0x7de   : > { %2187 = vrot.lane.b32.xlu1 %v2180_v51, %s6743_s0 }
 0x7e1   : > { %2189 = vrot.lane.b32.xlu0 %v2181_v48, %s6743_s0 }
 0x7e2   : > { %2250 = vrot.lane.b32.xlu1 %v5298_v18, %s6737_s8 }
 0x7e5   : > { %2252 = vrot.lane.b32.xlu0 %v5307_v13, %s6737_s8  ;;  %v4730_v13 = vld [vmem:[%s6667_s12] sm:$0xff]  }
 0x7e6   : > { %2248 = vrot.lane.b32.xlu1 %v5294_v16, %s6737_s8 }
 0x7e9   : > { %2258 = vrot.lane.b32.xlu0 %v5491_v29, %s6737_s8 }
 0x7ea   : > { %2260 = vrot.lane.b32.xlu1 %v5521_v38, %s6737_s8 }
 0x7ed   : > { %2256 = vrot.lane.b32.xlu0 %v5494_v31, %s6737_s8 }
 0x84f   : > { %v2186_v1 = vpop.permute.xlu0 %2185 }
 0x850   : > { %v2188_v60 = vpop.permute.xlu1 %2187  ;;  %v2196_v29 = vsel %vm1187_vm12, 0, %v2186_v1 }
 0x851   : > { %v2191_v62 = vsel %vm1187_vm12, %v2186_v1, %v2188_v60 }
 0x852   : > { %2266 = vrot.lane.b32.xlu1 %v2191_v62, %s6737_s8 }
 0x853   : > { %v2190_v32 = vpop.permute.xlu0 %2189 }
 0x854   : > { %v2251_v34 = vpop.permute.xlu1 %2250  ;;  %v2192_v39 = vsel %vm1187_vm12, %v2188_v60, %v2190_v32  ;;  %v2199_v55 = vsel %vm1187_vm12, %v2190_v32, 0 }
 0x855   : > { %2268 = vrot.lane.b32.xlu0 %v2192_v39, %s6737_s8 }
 0x856   : > { %2264 = vrot.lane.b32.xlu1 %v2196_v29, %s6737_s8 }
 0x857   : > { %v2253_v38 = vpop.permute.xlu0 %2252 }
 0x858   : > { %v2249_v50 = vpop.permute.xlu1 %2248  ;;  %v2273_v31 = vsel %vm870_vm8, %v2251_v34, %v2253_v38 }
 0x859   : > { %v2272_v54 = vsel %vm870_vm8, %v2249_v50, %v2251_v34  ;;  %2254 = vrot.lane.b32.xlu0 %v5310_v22, %s6737_s8  ;;  %2294 = vmatprep.subr.bf16.mxu1 %v2273_v31 }
 0x85a   : > { %2262 = vrot.lane.b32.xlu1 %v5484_v23, %s6737_s8  ;;  %2295 = vmatpush1.bf16.msra.mxu1 %v2272_v54  ;;  %v2220_v23 = vld [vmem:[%s6668_s13 + $0x8] sm:$0xff] }
 0x85b   : > { %v2259_v10 = vpop.permute.xlu0 %2258 }
 0x85c   : > { %v2261_v52 = vpop.permute.xlu1 %2260 }
 0x85d   : > { %2270 = vrot.lane.b32.xlu0 %v2199_v55, %s6737_s8  ;;  %v2276_v53 = vsel %vm870_vm8, %v2259_v10, %v2261_v52 }
 0x85e   : > { %2223 = vperm.xlu1 %4676, %v2219_v14   ;;  %2296 = vmatprep.subr.bf16.mxu1 %v2276_v53 }
 0x85f   : > { %v2257_v2 = vpop.permute.xlu0 %2256 }
 0x860   : > { %v2275_v49 = vsel %vm870_vm8, %v2257_v2, %v2259_v10 }
 0x861   : > { %2228 = vperm.xlu0 %4675, %v2220_v23   ;;  %2297 = vmatpush1.bf16.msra.mxu1 %v2275_v49 }
 0x862   : > { %4678 = vrot.lane.b32.xlu1 %v4677_v59, %s6737_s8 }
 0x865   : > { %4683 = vrot.lane.b32.xlu0 %v4682_v56, %s6737_s8 }
 0x866   : > { %4688 = vrot.lane.b32.xlu1 %v4687_v11, %s6737_s8 }
 0x869   : > { %4693 = vrot.lane.b32.xlu0 %v4692_v24, %s6737_s8 }
 0x8c4   : > { %v2267_v16 = vpop.permute.xlu1 %2266 }
 0x8c7   : > { %v2269_v61 = vpop.permute.xlu0 %2268 }
 0x8c8   : > { %v2265_v18 = vpop.permute.xlu1 %2264  ;;  %v2279_v63 = vsel %vm870_vm8, %v2267_v16, %v2269_v61 }
 0x8c9   : > { %v2278_v4 = vsel %vm870_vm8, %v2265_v18, %v2267_v16  ;;  %2298 = vmatprep.subr.bf16.mxu1 %v2279_v63 }
 0x8ca   : > { %2299 = vmatpush1.bf16.msra.mxu1 %v2278_v4 }
 0x8cb   : > { %v2255_v22 = vpop.permute.xlu0 %2254  ;;  %4582 = vmatprep.subr.bf16.mxu1 %v4770_v58 }
 0x8cc   : > { %v2274_v7 = vsel %vm870_vm8, %v2253_v38, %v2255_v22  ;;  %v2263_v41 = vpop.permute.xlu1 %2262 }
 0x8cd   : > { %4440 = vmatmul.mubr.msk.bf16.vlgmr.msra.gmra.mrb[20].mxu1 %vm2290_vm10, %v4730_v13  ;;  %v2277_v44 = vsel %vm870_vm8, %v2261_v52, %v2263_v41 }
 0x8ce   : > { %4583 = vmatpush3.bf16.msra.mxu1 %v2274_v7  ;;  %4588 = vmatprep.mubr.msk.bf16.mxu1 %vm4775_vm0, %v4770_v58 }
 0x8cf   : > { %4584 = vmatprep.subr.bf16.mxu1 %v4770_v58  ;;  %v2271_v40 = vpop.permute.xlu0 %2270 }
 0x8d0   : > { %v2280_v36 = vsel %vm870_vm8, %v2269_v61, %v2271_v40 }
 0x8d2   : > { %4585 = vmatpush3.bf16.msra.mxu1 %v2277_v44 }
 0x8d3   : > { %4586 = vmatprep.subr.bf16.mxu1 %v4770_v58 }
 0x8d6   : > { %4587 = vmatpush3.bf16.msra.mxu1 %v2280_v36 }
 0x8d9   : > { %4589 = vmatmul.mubr.msk.bf16.vlgmr.msra.gmra.mrb[24].mxu1 %vm2290_vm10, %v4730_v13 }
 0x8dd   : > { %v2224_v5 = vpop.permute.xlu1 %2223 }
 0x8e0   : > { %v2229_v45 = vpop.permute.xlu0 %2228 }
 0x8e1   : > { %v4679_v43 = vpop.permute.xlu1 %4678 }
 0x8e2   : > { %v4681_v28 = vunpack.i.h.bf16 %v4679_v43  ;;  %v4680_v37 = vunpack.i.l.bf16 %v4679_v43 }
 0x8e4   : > { %v4684_v8 = vpop.permute.xlu0 %4683  ;;  %v2411_v29 = vsel %vm870_vm8, %v4680_v37, %v4681_v28  ;;  %v2586_v37 = vld [vmem:[%s6670_s15 + $0x8] sm:$0xff] }
 0x8e5   : > { %v4689_v12 = vpop.permute.xlu1 %4688  ;;  %v4685_v51 = vunpack.i.l.bf16 %v4684_v8  ;;  %v4686_v47 = vunpack.i.h.bf16 %v4684_v8 }
 0x8e6   : > { %v4691_v1 = vunpack.i.h.bf16 %v4689_v12  ;;  %v4690_v60 = vunpack.i.l.bf16 %v4689_v12  ;;  %v4731_v12 = vld [vmem:[%s6669_s14 + $0x4] ss:$8 sps:$4 sm:$0xff]  }
 0x8e7   : > { %v2412_v54 = vsel %vm870_vm8, %v4681_v28, %v4685_v51  ;;  %v2413_v24 = vsel %vm870_vm8, %v4685_v51, %v4686_v47  ;;  %v2585_v28 = vld [vmem:[%s6670_s15] sm:$0xff]  ;;  %4444 = vmatprep.mubr.msk.bf16.mxu1 %vm1336_vm7, %v4731_v12  ;;  %4445 = vmatprep.mubr.msk.bf16.mxu0 %vm1336_vm7, %v4731_v12 }
 0x8e8   : > { %v4694_v48 = vpop.permute.xlu0 %4693  ;;  %v2414_v55 = vsel %vm870_vm8, %v4690_v60, %v4691_v1 }
 0x8e9   : > { %v4695_v32 = vunpack.i.l.bf16 %v4694_v48  ;;  %v4696_v56 = vunpack.i.h.bf16 %v4694_v48 }
 0x8eb   : > { %v2415_v53 = vsel %vm870_vm8, %v4691_v1, %v4695_v32  ;;  %v2416_v4 = vsel %vm870_vm8, %v4695_v32, %v4696_v56 }
 0x9a0   : > { %v2328_v62 = vpop.f32.mrb[20].mxu1 }
 0x9a1   : > { %v2329_v34 = vadd.f32 %v2328_v62, %v2224_v5  ;;  %v2330_v39 = vpop.f32.mrb[21].mxu1 }
 0x9a2   : > { %v2331_v38 = vadd.f32 %v2330_v39, %v2224_v5  ;;  %v2332_v50 = vpop.f32.mrb[22].mxu1 }
 0x9a3   : > { %v2423_v31 = vadd.f32 %v2411_v29, %v2329_v34  ;;  %v2333_v10 = vadd.f32 %v2332_v50, %v2229_v45  ;;  %v2334_v14 = vpop.f32.mrb[23].mxu1 }
 0x9a4   : > { %v2424_v52 = vadd.f32 %v2412_v54, %v2331_v38  ;;  %v2335_v15 = vadd.f32 %v2334_v14, %v2229_v45 }
 0x9a5   : > { %v2426_v0 = vadd.f32 %v2414_v55, %v2333_v10  ;;  %v2429_v2 = vmul.f32 %v2423_v31, %v5158_v6 }
 0x9a6   : > { %v2427_v23 = vadd.f32 %v2415_v53, %v2335_v15  ;;  %v2430_v46 = vmul.f32 %v2424_v52, %v5160_v9 }
 0x9a7   : > { %v2432_v42 = vmul.f32 %v2426_v0, %v5158_v6 }
 0x9a8   : > { %v2433_v49 = vmul.f32 %v2427_v23, %v5160_v9 }
 0x9a9   : > { %v2435_v59 = vpack.c.bf16 %v2432_v42, %v2429_v2 }
 0x9aa   : > { %v2436_v33 = vpack.c.bf16 %v2433_v49, %v2430_v46 }
 0x9ab   : > { %2441 = vrot.lane.b32.xlu1 %v2435_v59, %s6743_s0 }
 0x9ac   : > { %v2371_v57 = vpop.f32.mrb[24].mxu1  ;;  %2443 = vrot.lane.b32.xlu0 %v2436_v33, %s6743_s0 }
 0x9ad   : > { %v2372_v17 = vadd.f32 %v2371_v57, %v2224_v5  ;;  %v4590_v11 = vpop.f32.mrb[25].mxu1 }
 0x9ae   : > { %v2374_v16 = vpop.f32.mrb[26].mxu1 }
 0x9af   : > { %v2425_v61 = vadd.f32 %v2413_v24, %v2372_v17  ;;  %v2375_v18 = vadd.f32 %v2374_v16, %v2229_v45  ;;  %v4591_v63 = vpop.f32.mrb[27].mxu1 }
 0x9b1   : > { %v2428_v13 = vadd.f32 %v2416_v4, %v2375_v18  ;;  %v2431_v22 = vmul.f32 %v2425_v61, %v5162_v19 }
 0x9b3   : > { %v2434_v7 = vmul.f32 %v2428_v13, %v5162_v19 }
 0x9b5   : > { %v2437_v41 = vpack.c.bf16 %v2434_v7, %v2431_v22 }
 0x9b7   : > { %2445 = vrot.lane.b32.xlu1 %v2437_v41, %s6743_s0 }
 0xa1d   : > { %v5814_v44 = vpop.permute.xlu1 %2441 }
 0xa1e   : > { %v5818_v40 = vsel %vm1187_vm12, 0, %v5814_v44  ;;  %v2444_v36 = vpop.permute.xlu0 %2443 }
 0xa1f   : > { %v5822_v5 = vsel %vm1187_vm12, %v5814_v44, %v2444_v36  ;;  %2471 = vrot.lane.b32.xlu0 %v5818_v40, %s6742_s2 }
 0xa20   : > { %2609 = vmatprep.subr.bf16.mxu1 %v5822_v5 }
 0xa21   : > { %4496 = vmatpush1.bf16.msk.msra.mxu1 %vm5193_vm15, %v5814_v44 }
 0xa23   : > { %2485 = vrot.lane.b32.xlu0 %v5818_v40, %s6744_s25 }
 0xa27   : > { %2499 = vrot.lane.b32.xlu0 %v5818_v40, %s6745_s7 }
 0xa29   : > { %v2446_v45 = vpop.permute.xlu1 %2445 }
 0xa2a   : > { %v5835_v43 = vsel %vm1187_vm12, %v2444_v36, %v2446_v45  ;;  %v5844_v8 = vsel %vm1187_vm12, %v2446_v45, 0 }
 0xa2b   : > { %2513 = vrot.lane.b32.xlu0 %v5818_v40, %s6737_s8  ;;  %2475 = vrot.lane.b32.xlu1 %v5835_v43, %s6742_s2 }
 0xa2c   : > { %2653 = vmatpush1.bf16.msra.mxu0 %v5835_v43 }
 0xa2d   : > { %2654 = vmatprep.subr.bf16.mxu0 %v4773_v20 }
 0xa2f   : > { %2527 = vrot.lane.b32.xlu0 %v5818_v40, %s6738_s27  ;;  %2477 = vrot.lane.b32.xlu1 %v5844_v8, %s6742_s2 }
 0xa33   : > { %2541 = vrot.lane.b32.xlu0 %v5818_v40, %s6739_s3  ;;  %2489 = vrot.lane.b32.xlu1 %v5835_v43, %s6744_s25 }
 0xa37   : > { %2555 = vrot.lane.b32.xlu0 %v5818_v40, %s6733_s1  ;;  %2491 = vrot.lane.b32.xlu1 %v5844_v8, %s6744_s25 }
 0xa3b   : > { %2503 = vrot.lane.b32.xlu1 %v5835_v43, %s6745_s7  ;;  %2473 = vrot.lane.b32.xlu0 %v5822_v5, %s6742_s2 }
 0xa3f   : > { %2505 = vrot.lane.b32.xlu1 %v5844_v8, %s6745_s7  ;;  %2487 = vrot.lane.b32.xlu0 %v5822_v5, %s6744_s25 }
 0xa43   : > { %2517 = vrot.lane.b32.xlu1 %v5835_v43, %s6737_s8  ;;  %2501 = vrot.lane.b32.xlu0 %v5822_v5, %s6745_s7 }
 0xa47   : > { %2519 = vrot.lane.b32.xlu1 %v5844_v8, %s6737_s8  ;;  %2515 = vrot.lane.b32.xlu0 %v5822_v5, %s6737_s8 }
 0xa4b   : > { %2531 = vrot.lane.b32.xlu1 %v5835_v43, %s6738_s27  ;;  %2529 = vrot.lane.b32.xlu0 %v5822_v5, %s6738_s27 }
 0xa4f   : > { %2533 = vrot.lane.b32.xlu1 %v5844_v8, %s6738_s27  ;;  %2543 = vrot.lane.b32.xlu0 %v5822_v5, %s6739_s3 }
 0xa53   : > { %2545 = vrot.lane.b32.xlu1 %v5835_v43, %s6739_s3  ;;  %2557 = vrot.lane.b32.xlu0 %v5822_v5, %s6733_s1 }
 0xa57   : > { %2547 = vrot.lane.b32.xlu1 %v5844_v8, %s6739_s3  ;;  %2571 = vrot.lane.b32.xlu0 %v5822_v5, %s6735_s29 }
 0xa5b   : > { %2559 = vrot.lane.b32.xlu1 %v5835_v43, %s6733_s1  ;;  %2569 = vrot.lane.b32.xlu0 %v5818_v40, %s6735_s29 }
 0xa5f   : > { %2561 = vrot.lane.b32.xlu1 %v5844_v8, %s6733_s1  ;;  %2589 = vperm.xlu0 %4675, %v2585_v28  }
 0xa63   : > { %2573 = vrot.lane.b32.xlu1 %v5835_v43, %s6735_s29  ;;  %2751 = vrot.lane.b32.xlu0 %v5835_v43, %s6742_s2 }
 0xa67   : > { %2575 = vrot.lane.b32.xlu1 %v5844_v8, %s6735_s29 }
 0xa6b   : > { %2594 = vperm.xlu1 %4676, %v2586_v37  }
 0xa6f   : > { %2749 = vrot.lane.b32.xlu1 %v5822_v5, %s6742_s2 }
 0xa73   : > { %2747 = vrot.lane.b32.xlu1 %v5818_v40, %s6742_s2 }
 0xa91   : > { %v2472_v48 = vpop.permute.xlu0 %2471 }
 0xa95   : > { %v2486_v51 = vpop.permute.xlu0 %2485 }
 0xa99   : > { %v2500_v1 = vpop.permute.xlu0 %2499 }
 0xa9d   : > { %v2476_v60 = vpop.permute.xlu1 %2475  ;;  %v2514_v62 = vpop.permute.xlu0 %2513 }
 0xaa1   : > { %v2478_v32 = vpop.permute.xlu1 %2477  ;;  %v2528_v34 = vpop.permute.xlu0 %2527 }
 0xaa2   : > { %v2481_v39 = vsel %vm802_vm1, %v2476_v60, %v2478_v32 }
 0xaa3   : > { %2655 = vmatpush1.bf16.msra.mxu0 %v2481_v39  ;;  %v4733_v39 = vld [vmem:[%s6669_s14] ss:$8 sps:$4 sm:$0xff]  }
 0xaa4   : > { %2656 = vmatprep.subr.bf16.mxu0 %v4773_v20 }
 0xaa5   : > { %v2490_v29 = vpop.permute.xlu1 %2489  ;;  %v2542_v38 = vpop.permute.xlu0 %2541 }
 0xaa9   : > { %v2492_v50 = vpop.permute.xlu1 %2491  ;;  %v2556_v31 = vpop.permute.xlu0 %2555 }
 0xaaa   : > { %v2495_v54 = vsel %vm821_vm11, %v2490_v29, %v2492_v50 }
 0xaab   : > { %2657 = vmatpush1.bf16.msra.mxu0 %v2495_v54 }
 0xaac   : > { %2658 = vmatprep.subr.bf16.mxu0 %v4773_v20 }
 0xaad   : > { %v2504_v10 = vpop.permute.xlu1 %2503  ;;  %v2474_v14 = vpop.permute.xlu0 %2473 }
 0xaae   : > { %v2480_v52 = vsel %vm802_vm1, %v2474_v14, %v2476_v60  ;;  %v2479_v55 = vsel %vm802_vm1, %v2472_v48, %v2474_v14 }
 0xaaf   : > { %2611 = vmatprep.subr.bf16.mxu1 %v2480_v52 }
 0xab0   : > { %2612 = vmatpush1.bf16.msra.mxu1 %v2479_v55 }
 0xab1   : > { %v2506_v15 = vpop.permute.xlu1 %2505  ;;  %v2488_v0 = vpop.permute.xlu0 %2487 }
 0xab2   : > { %v2509_v53 = vsel %vm845_vm4, %v2504_v10, %v2506_v15  ;;  %v2494_v23 = vsel %vm821_vm11, %v2488_v0, %v2490_v29  ;;  %v2493_v2 = vsel %vm821_vm11, %v2486_v51, %v2488_v0 }
 0xab3   : > { %2613 = vmatprep.subr.bf16.mxu1 %v2494_v23  ;;  %2659 = vmatpush1.bf16.msra.mxu0 %v2509_v53 }
 0xab4   : > { %2614 = vmatpush1.bf16.msra.mxu1 %v2493_v2  ;;  %2660 = vmatprep.subr.bf16.mxu0 %v4773_v20 }
 0xab5   : > { %v2518_v42 = vpop.permute.xlu1 %2517  ;;  %v2502_v46 = vpop.permute.xlu0 %2501 }
 0xab6   : > { %v2508_v49 = vsel %vm845_vm4, %v2502_v46, %v2504_v10  ;;  %v2507_v59 = vsel %vm845_vm4, %v2500_v1, %v2502_v46 }
 0xab7   : > { %2615 = vmatprep.subr.bf16.mxu1 %v2508_v49 }
 0xab8   : > { %2616 = vmatpush1.bf16.msra.mxu1 %v2507_v59 }
 0xab9   : > { %v2520_v47 = vpop.permute.xlu1 %2519  ;;  %v2516_v33 = vpop.permute.xlu0 %2515 }
 0xaba   : > { %v2523_v56 = vsel %vm870_vm8, %v2518_v42, %v2520_v47  ;;  %v2522_v57 = vsel %vm870_vm8, %v2516_v33, %v2518_v42  ;;  %v2521_v17 = vsel %vm870_vm8, %v2514_v62, %v2516_v33 }
 0xabb   : > { %2617 = vmatprep.subr.bf16.mxu1 %v2522_v57  ;;  %2661 = vmatpush1.bf16.msra.mxu0 %v2523_v56 }
 0xabc   : > { %2618 = vmatpush1.bf16.msra.mxu1 %v2521_v17  ;;  %2662 = vmatprep.subr.bf16.mxu0 %v4773_v20 }
 0xabd   : > { %v2532_v11 = vpop.permute.xlu1 %2531  ;;  %v2530_v24 = vpop.permute.xlu0 %2529 }
 0xabe   : > { %v2536_v16 = vsel %vm898_vm14, %v2530_v24, %v2532_v11  ;;  %v2535_v61 = vsel %vm898_vm14, %v2528_v34, %v2530_v24 }
 0xabf   : > { %2619 = vmatprep.subr.bf16.mxu1 %v2536_v16 }
 0xac0   : > { %2620 = vmatpush1.bf16.msra.mxu1 %v2535_v61 }
 0xac1   : > { %v2534_v18 = vpop.permute.xlu1 %2533  ;;  %v2544_v4 = vpop.permute.xlu0 %2543 }
 0xac2   : > { %v2537_v63 = vsel %vm898_vm14, %v2532_v11, %v2534_v18  ;;  %v2549_v7 = vsel %vm920_vm3, %v2542_v38, %v2544_v4 }
 0xac3   : > { %2663 = vmatpush1.bf16.msra.mxu0 %v2537_v63 }
 0xac4   : > { %2664 = vmatprep.subr.bf16.mxu0 %v4773_v20 }
 0xac5   : > { %v2546_v13 = vpop.permute.xlu1 %2545  ;;  %v2558_v41 = vpop.permute.xlu0 %2557 }
 0xac6   : > { %v2550_v22 = vsel %vm920_vm3, %v2544_v4, %v2546_v13  ;;  %v2563_v48 = vsel %vm944_vm6, %v2556_v31, %v2558_v41 }
 0xac7   : > { %2621 = vmatprep.subr.bf16.mxu1 %v2550_v22 }
 0xac8   : > { %2622 = vmatpush1.bf16.msra.mxu1 %v2549_v7 }
 0xac9   : > { %v2548_v36 = vpop.permute.xlu1 %2547  ;;  %v2572_v28 = vpop.permute.xlu0 %2571 }
 0xaca   : > { %v2551_v45 = vsel %vm920_vm3, %v2546_v13, %v2548_v36 }
 0xacb   : > { %2665 = vmatpush1.bf16.msra.mxu0 %v2551_v45 }
 0xacc   : > { %2666 = vmatprep.subr.bf16.mxu0 %v4773_v20 }
 0xacd   : > { %v2560_v12 = vpop.permute.xlu1 %2559  ;;  %v2570_v60 = vpop.permute.xlu0 %2569 }
 0xace   : > { %v2564_v37 = vsel %vm944_vm6, %v2558_v41, %v2560_v12  ;;  %v2577_v34 = vsel %vm960_vm13, %v2570_v60, %v2572_v28 }
 0xacf   : > { %2623 = vmatprep.subr.bf16.mxu1 %v2564_v37 }
 0xad0   : > { %2624 = vmatpush1.bf16.msra.mxu1 %v2563_v48 }
 0xad1   : > { %v2562_v51 = vpop.permute.xlu1 %2561 }
 0xad2   : > { %v2565_v1 = vsel %vm944_vm6, %v2560_v12, %v2562_v51 }
 0xad3   : > { %2667 = vmatpush1.bf16.msra.mxu0 %v2565_v1 }
 0xad4   : > { %2668 = vmatprep.subr.bf16.mxu0 %v4773_v20 }
 0xad5   : > { %v2574_v62 = vpop.permute.xlu1 %2573 }
 0xad6   : > { %v2578_v32 = vsel %vm960_vm13, %v2572_v28, %v2574_v62 }
 0xad7   : > { %2625 = vmatprep.subr.bf16.mxu1 %v2578_v32 }
 0xad8   : > { %2626 = vmatpush1.bf16.msra.mxu1 %v2577_v34 }
 0xad9   : > { %v2576_v29 = vpop.permute.xlu1 %2575  ;;  %3005 = vmatprep.subr.bf16.mxu1 %v5822_v5 }
 0xada   : > { %v2579_v38 = vsel %vm960_vm13, %v2574_v62, %v2576_v29 }
 0xadb   : > { %2642 = vmatmul.mubr.bf16.vlgmr.msra.gmra.mrb[28].mxu1 %v4733_v39  ;;  %2669 = vmatpush1.bf16.msra.mxu0 %v2579_v38 }
 0xadc   : > { %4498 = vmatpush1.bf16.msk.msra.mxu1 %vm5193_vm15, %v5814_v44 }
 0xade   : > { %2685 = vmatmul.mubr.bf16.vlgmr.msra.gmra.mrb[16].mxu0 %v4733_v39  ;;  %v2590_v50 = vpop.permute.xlu0 %2589 }
 0xae2   : > { %v6002_v41 = vpop.permute.xlu0 %2751 }
 0xaea   : > { %v2595_v14 = vpop.permute.xlu1 %2594 }
 0xaee   : > { %v2750_v7 = vpop.permute.xlu1 %2749 }
 0xaef   : > { %v2764_v1 = vsel %vm802_vm1, %v2750_v7, %v6002_v41 }
 0xaf2   : > { %v2748_v36 = vpop.permute.xlu1 %2747 }
 0xaf3   : > { %v2763_v62 = vsel %vm802_vm1, %v2748_v36, %v2750_v7 }
 0xbae   : > { %v2643_v31 = vpop.f32.mrb[28].mxu1 }
 0xbaf   : > { %v2644_v54 = vadd.f32 %v2643_v31, %v2590_v50  ;;  %v2645_v10 = vpop.f32.mrb[29].mxu1 }
 0xbb0   : > { %v2646_v52 = vadd.f32 %v2645_v10, %v2590_v50  ;;  %v2647_v55 = vpop.f32.mrb[30].mxu1 }
 0xbb1   : > { %v2693_v15 = vmax.f32 %v2644_v54, 0.0  ;;  %v2648_v0 = vadd.f32 %v2647_v55, %v2595_v14  ;;  %v2649_v53 = vpop.f32.mrb[31].mxu1  ;;  %v2686_v23 = vpop.f32.mrb[16].mxu0  ;;  %v2975_v55 = vld [vmem:[%s6672_s17] sm:$0xff] }
 0xbb2   : > { %v2694_v2 = vmax.f32 %v2646_v52, 0.0  ;;  %v2650_v42 = vadd.f32 %v2649_v53, %v2595_v14  ;;  %v2687_v46 = vadd.f32 %v2686_v23, %v2590_v50  ;;  %v2688_v49 = vpop.f32.mrb[17].mxu0  ;;  %v4736_v50 = vld [vmem:[%s6671_s16 + $0x4] ss:$12 sps:$4 sm:$0xff]  }
 0xbb3   : > { %v2696_v59 = vmax.f32 %v2648_v0, 0.0  ;;  %v2689_v47 = vpop.f32.mrb[18].mxu0  ;;  %v2699_v17 = vmul.f32 %v2693_v15, %v5158_v6  ;;  %3123 = vmatprep.mubr.bf16.mxu0 %v4736_v50  ;;  %3037 = vmatprep.mubr.bf16.mxu1 %v4736_v50  ;;  %v2976_v15 = vld [vmem:[%s6672_s17 + $0x8] sm:$0xff] }
 0xbb4   : > { %v2697_v33 = vmax.f32 %v2650_v42, 0.0  ;;  %v2695_v44 = vmax.f32 %v2687_v46, 0.0  ;;  %v2690_v56 = vadd.f32 %v2689_v47, %v2595_v14  ;;  %v2691_v57 = vpop.f32.mrb[19].mxu0  ;;  %v2700_v24 = vmul.f32 %v2694_v2, %v5160_v9 }
 0xbb5   : > { %v2702_v11 = vmul.f32 %v2696_v59, %v5158_v6 }
 0xbb6   : > { %v2703_v16 = vmul.f32 %v2697_v33, %v5160_v9  ;;  %v2698_v61 = vmax.f32 %v2690_v56, 0.0  ;;  %v2701_v4 = vmul.f32 %v2695_v44, %v5162_v19 }
 0xbb7   : > { %v2705_v18 = vpack.c.bf16 %v2702_v11, %v2699_v17 }
 0xbb8   : > { %v2706_v63 = vpack.c.bf16 %v2703_v16, %v2700_v24  ;;  %v2704_v13 = vmul.f32 %v2698_v61, %v5162_v19 }
 0xbba   : > { %v2707_v22 = vpack.c.bf16 %v2704_v13, %v2701_v4  ;;  %2713 = vrot.lane.b32.xlu1 %v2706_v63, %s6743_s0 }
 0xbbc   : > { %2715 = vrot.lane.b32.xlu0 %v2707_v22, %s6743_s0 }
 0xbbe   : > { %2777 = vrot.lane.b32.xlu1 %v5822_v5, %s6744_s25 }
 0xbc0   : > { %2711 = vrot.lane.b32.xlu0 %v2705_v18, %s6743_s0 }
 0xbc2   : > { %2775 = vrot.lane.b32.xlu1 %v5818_v40, %s6744_s25 }
 0xbc4   : > { %2779 = vrot.lane.b32.xlu0 %v5835_v43, %s6744_s25 }
 0xbc6   : > { %2805 = vrot.lane.b32.xlu1 %v5822_v5, %s6745_s7 }
 0xbc8   : > { %2807 = vrot.lane.b32.xlu0 %v5835_v43, %s6745_s7 }
 0xbca   : > { %2803 = vrot.lane.b32.xlu1 %v5818_v40, %s6745_s7 }
 0xbcc   : > { %2835 = vrot.lane.b32.xlu0 %v5835_v43, %s6737_s8 }
 0xbce   : > { %2833 = vrot.lane.b32.xlu1 %v5822_v5, %s6737_s8 }
 0xbd0   : > { %2837 = vrot.lane.b32.xlu0 %v5844_v8, %s6737_s8 }
 0xbd2   : > { %2831 = vrot.lane.b32.xlu1 %v5818_v40, %s6737_s8 }
 0xbd4   : > { %2861 = vrot.lane.b32.xlu0 %v5822_v5, %s6738_s27 }
 0xbd6   : > { %2863 = vrot.lane.b32.xlu1 %v5835_v43, %s6738_s27 }
 0xbd8   : > { %2865 = vrot.lane.b32.xlu0 %v5844_v8, %s6738_s27 }
 0xbda   : > { %2859 = vrot.lane.b32.xlu1 %v5818_v40, %s6738_s27 }
 0xbdc   : > { %2753 = vrot.lane.b32.xlu0 %v5844_v8, %s6742_s2 }
 0xbde   : > { %2889 = vrot.lane.b32.xlu1 %v5822_v5, %s6739_s3 }
 0xbe0   : > { %2891 = vrot.lane.b32.xlu0 %v5835_v43, %s6739_s3 }
 0xbe4   : > { %2887 = vrot.lane.b32.xlu0 %v5818_v40, %s6739_s3 }
 0xbe8   : > { %2893 = vrot.lane.b32.xlu0 %v5844_v8, %s6739_s3 }
 0xc2c   : > { %v2714_v28 = vpop.permute.xlu1 %2713 }
 0xc2e   : > { %v2716_v45 = vpop.permute.xlu0 %2715 }
 0xc2f   : > { %v6005_v12 = vsel %vm1187_vm12, %v2716_v45, 0  ;;  %v6042_v39 = vsel %vm1187_vm12, %v2714_v28, %v2716_v45 }
 0xc30   : > { %2873 = vrot.lane.b32.xlu1 %v6005_v12, %s6738_s27  ;;  %2845 = vrot.lane.b32.xlu0 %v6005_v12, %s6737_s8  ;;  %v2778_v31 = vpop.permute.xlu1 %2777 }
 0xc32   : > { %v2712_v37 = vpop.permute.xlu0 %2711 }
 0xc33   : > { %v6012_v48 = vsel %vm1187_vm12, %v2712_v37, %v2714_v28  ;;  %v6015_v51 = vsel %vm1187_vm12, 0, %v2712_v37 }
 0xc34   : > { %2761 = vrot.lane.b32.xlu1 %v6005_v12, %s6742_s2  ;;  %2755 = vrot.lane.b32.xlu0 %v6015_v51, %s6742_s2  ;;  %v2776_v54 = vpop.permute.xlu1 %2775 }
 0xc35   : > { %3007 = vmatprep.subr.bf16.mxu1 %v6012_v48  ;;  %v2791_v45 = vsel %vm821_vm11, %v2776_v54, %v2778_v31 }
 0xc36   : > { %4500 = vmatpush1.bf16.msk.msra.mxu1 %vm5193_vm15, %v2712_v37  ;;  %v6026_v60 = vpop.permute.xlu0 %2779 }
 0xc37   : > { %3009 = vmatprep.subr.bf16.mxu1 %v2764_v1  ;;  %v2792_v22 = vsel %vm821_vm11, %v2778_v31, %v6026_v60 }
 0xc38   : > { %2839 = vrot.lane.b32.xlu1 %v6015_v51, %s6737_s8  ;;  %2783 = vrot.lane.b32.xlu0 %v6015_v51, %s6744_s25  ;;  %v2806_v10 = vpop.permute.xlu1 %2805 }
 0xc3a   : > { %3010 = vmatpush1.bf16.msra.mxu1 %v2763_v62  ;;  %v6033_v32 = vpop.permute.xlu0 %2807 }
 0xc3c   : > { %2867 = vrot.lane.b32.xlu1 %v6015_v51, %s6738_s27  ;;  %2811 = vrot.lane.b32.xlu0 %v6015_v51, %s6745_s7  ;;  %v2804_v14 = vpop.permute.xlu1 %2803 }
 0xc3d   : > { %v2819_v31 = vsel %vm845_vm4, %v2804_v14, %v2806_v10 }
 0xc3e   : > { %v6039_v34 = vpop.permute.xlu0 %2835 }
 0xc40   : > { %2759 = vrot.lane.b32.xlu1 %v6042_v39, %s6742_s2  ;;  %2757 = vrot.lane.b32.xlu0 %v6012_v48, %s6742_s2  ;;  %v2834_v0 = vpop.permute.xlu1 %2833 }
 0xc42   : > { %v2838_v29 = vpop.permute.xlu0 %2837 }
 0xc43   : > { %v2849_v38 = vsel %vm870_vm8, %v6039_v34, %v2838_v29  ;;  %v2820_v29 = vsel %vm845_vm4, %v2806_v10, %v6033_v32 }
 0xc44   : > { %2895 = vrot.lane.b32.xlu1 %v6015_v51, %s6739_s3  ;;  %2781 = vrot.lane.b32.xlu0 %v5844_v8, %s6744_s25  ;;  %v2832_v23 = vpop.permute.xlu1 %2831 }
 0xc45   : > { %4533 = vmatprep.subr.bf16.mxu0 %v2849_v38 }
 0xc46   : > { %4534 = vmatpush3.bf16.msra.mxu0 %v5835_v43  ;;  %v6114_v52 = vpop.permute.xlu0 %2861 }
 0xc48   : > { %2787 = vrot.lane.b32.xlu1 %v6042_v39, %s6744_s25  ;;  %2785 = vrot.lane.b32.xlu0 %v6012_v48, %s6744_s25  ;;  %v2864_v42 = vpop.permute.xlu1 %2863 }
 0xc4a   : > { %v6126_v53 = vpop.permute.xlu0 %2865 }
 0xc4c   : > { %2917 = vrot.lane.b32.xlu1 %v5822_v5, %s6733_s1  ;;  %2919 = vrot.lane.b32.xlu0 %v5835_v43, %s6733_s1  ;;  %v6132_v49 = vpop.permute.xlu1 %2859 }
 0xc4e   : > { %v6128_v2 = vpop.permute.xlu0 %2753 }
 0xc50   : > { %2815 = vrot.lane.b32.xlu1 %v6042_v39, %s6745_s7  ;;  %2813 = vrot.lane.b32.xlu0 %v6012_v48, %s6745_s7  ;;  %v6136_v47 = vpop.permute.xlu1 %2889 }
 0xc52   : > { %v6130_v46 = vpop.permute.xlu0 %2891 }
 0xc54   : > { %2901 = vrot.lane.b32.xlu1 %v6005_v12, %s6739_s3  ;;  %2915 = vrot.lane.b32.xlu0 %v5818_v40, %s6733_s1 }
 0xc56   : > { %v6134_v59 = vpop.permute.xlu0 %2887 }
 0xc58   : > { %2843 = vrot.lane.b32.xlu1 %v6042_v39, %s6737_s8  ;;  %2841 = vrot.lane.b32.xlu0 %v6012_v48, %s6737_s8 }
 0xc5a   : > { %v6138_v33 = vpop.permute.xlu0 %2893 }
 0xc5c   : > { %2789 = vrot.lane.b32.xlu1 %v6005_v12, %s6744_s25  ;;  %2921 = vrot.lane.b32.xlu0 %v5844_v8, %s6733_s1 }
 0xc60   : > { %2871 = vrot.lane.b32.xlu1 %v6042_v39, %s6738_s27  ;;  %2869 = vrot.lane.b32.xlu0 %v6012_v48, %s6738_s27 }
 0xc64   : > { %2923 = vrot.lane.b32.xlu1 %v6015_v51, %s6733_s1  ;;  %2809 = vrot.lane.b32.xlu0 %v5844_v8, %s6745_s7 }
 0xc68   : > { %2899 = vrot.lane.b32.xlu1 %v6042_v39, %s6739_s3  ;;  %2897 = vrot.lane.b32.xlu0 %v6012_v48, %s6739_s3 }
 0xc6c   : > { %2929 = vrot.lane.b32.xlu1 %v6005_v12, %s6733_s1  ;;  %2817 = vrot.lane.b32.xlu0 %v6005_v12, %s6745_s7 }
 0xc70   : > { %2927 = vrot.lane.b32.xlu1 %v6042_v39, %s6733_s1  ;;  %2925 = vrot.lane.b32.xlu0 %v6012_v48, %s6733_s1 }
 0xc74   : > { %2945 = vrot.lane.b32.xlu1 %v5822_v5, %s6735_s29  ;;  %2947 = vrot.lane.b32.xlu0 %v5835_v43, %s6735_s29 }
 0xc78   : > { %2943 = vrot.lane.b32.xlu1 %v5818_v40, %s6735_s29  ;;  %2949 = vrot.lane.b32.xlu0 %v5844_v8, %s6735_s29 }
 0xc7c   : > { %2953 = vrot.lane.b32.xlu1 %v6012_v48, %s6735_s29  ;;  %2955 = vrot.lane.b32.xlu0 %v6042_v39, %s6735_s29 }
 0xc80   : > { %2951 = vrot.lane.b32.xlu1 %v6015_v51, %s6735_s29  ;;  %2957 = vrot.lane.b32.xlu0 %v6005_v12, %s6735_s29 }
 0xc84   : > { %2979 = vperm.xlu1 %4676, %v2975_v55   ;;  %2984 = vperm.xlu0 %4675, %v2976_v15  }
 0xca2   : > { %v6140_v44 = vpop.permute.xlu1 %2873  ;;  %v2846_v56 = vpop.permute.xlu0 %2845 }
 0xca6   : > { %v6142_v57 = vpop.permute.xlu1 %2761  ;;  %v2756_v17 = vpop.permute.xlu0 %2755 }
 0xcaa   : > { %v2840_v11 = vpop.permute.xlu1 %2839  ;;  %v2784_v24 = vpop.permute.xlu0 %2783 }
 0xcae   : > { %v2868_v16 = vpop.permute.xlu1 %2867  ;;  %v2812_v61 = vpop.permute.xlu0 %2811 }
 0xcb2   : > { %v6144_v18 = vpop.permute.xlu1 %2759  ;;  %v2758_v63 = vpop.permute.xlu0 %2757 }
 0xcb3   : > { %v2767_v4 = vsel %vm802_vm1, %v2758_v63, %v6144_v18  ;;  %v2766_v13 = vsel %vm802_vm1, %v2756_v17, %v2758_v63 }
 0xcb4   : > { %3011 = vmatprep.subr.bf16.mxu1 %v2767_v4 }
 0xcb5   : > { %3012 = vmatpush1.bf16.msra.mxu1 %v2766_v13  ;;  %v2847_v13 = vsel %vm870_vm8, %v2832_v23, %v2834_v0 }
 0xcb6   : > { %v6151_v7 = vpop.permute.xlu1 %2895  ;;  %3013 = vmatprep.subr.bf16.mxu1 %v2792_v22  ;;  %v6153_v36 = vpop.permute.xlu0 %2781 }
 0xcb9   : > { %3014 = vmatpush1.bf16.msra.mxu1 %v2791_v45 }
 0xcba   : > { %v6156_v28 = vpop.permute.xlu1 %2787  ;;  %v2786_v37 = vpop.permute.xlu0 %2785 }
 0xcbb   : > { %v2795_v1 = vsel %vm821_vm11, %v2786_v37, %v6156_v28  ;;  %v2794_v62 = vsel %vm821_vm11, %v2784_v24, %v2786_v37  ;;  %v2848_v24 = vsel %vm870_vm8, %v2834_v0, %v6039_v34  ;;  %v2876_v34 = vsel %vm898_vm14, %v6114_v52, %v2864_v42 }
 0xcbc   : > { %3015 = vmatprep.subr.bf16.mxu1 %v2795_v1  ;;  %v2877_v0 = vsel %vm898_vm14, %v2864_v42, %v6126_v53 }
 0xcbd   : > { %3016 = vmatpush1.bf16.msra.mxu1 %v2794_v62 }
 0xcbe   : > { %v6163_v38 = vpop.permute.xlu1 %2917  ;;  %3017 = vmatprep.subr.bf16.mxu1 %v2820_v29  ;;  %v6165_v50 = vpop.permute.xlu0 %2919 }
 0xcc1   : > { %3018 = vmatpush1.bf16.msra.mxu1 %v2819_v31 }
 0xcc2   : > { %v6168_v54 = vpop.permute.xlu1 %2815  ;;  %v2814_v55 = vpop.permute.xlu0 %2813 }
 0xcc3   : > { %v2823_v15 = vsel %vm845_vm4, %v2814_v55, %v6168_v54  ;;  %v2822_v17 = vsel %vm845_vm4, %v2812_v61, %v2814_v55 }
 0xcc4   : > { %3019 = vmatprep.subr.bf16.mxu1 %v2823_v15 }
 0xcc5   : > { %3020 = vmatpush1.bf16.msra.mxu1 %v2822_v17 }
 0xcc6   : > { %v2902_v63 = vpop.permute.xlu1 %2901  ;;  %3021 = vmatprep.subr.bf16.mxu1 %v2848_v24  ;;  %v2916_v4 = vpop.permute.xlu0 %2915 }
 0xcc9   : > { %3022 = vmatpush1.bf16.msra.mxu1 %v2847_v13 }
 0xcca   : > { %v2844_v10 = vpop.permute.xlu1 %2843  ;;  %v2842_v14 = vpop.permute.xlu0 %2841 }
 0xccb   : > { %v2851_v22 = vsel %vm870_vm8, %v2842_v14, %v2844_v10  ;;  %v2852_v45 = vsel %vm870_vm8, %v2844_v10, %v2846_v56  ;;  %v2850_v37 = vsel %vm870_vm8, %v2840_v11, %v2842_v14  ;;  %v2875_v56 = vsel %vm898_vm14, %v6132_v49, %v6114_v52 }
 0xccc   : > { %3023 = vmatprep.subr.bf16.mxu1 %v2851_v22  ;;  %4535 = vmatprep.subr.bf16.mxu0 %v2852_v45  ;;  %v2765_v11 = vsel %vm802_vm1, %v6002_v41, %v6128_v2  ;;  %v2768_v52 = vsel %vm802_vm1, %v6144_v18, %v6142_v57  ;;  %v2904_v41 = vsel %vm920_vm3, %v6136_v47, %v6130_v46 }
 0xccd   : > { %3024 = vmatpush1.bf16.msra.mxu1 %v2850_v37  ;;  %4536 = vmatpush3.bf16.msra.mxu0 %v6042_v39  ;;  %v2905_v2 = vsel %vm920_vm3, %v6130_v46, %v6138_v33  ;;  %v2793_v57 = vsel %vm821_vm11, %v6026_v60, %v6153_v36  ;;  %v2932_v60 = vsel %vm944_vm6, %v6163_v38, %v6165_v50 }
 0xcce   : > { %v2790_v23 = vpop.permute.xlu1 %2789  ;;  %3025 = vmatprep.subr.bf16.mxu1 %v2876_v34  ;;  %4537 = vmatprep.subr.bf16.mxu0 %v2877_v0  ;;  %v2922_v61 = vpop.permute.xlu0 %2921 }
 0xccf   : > { %v2796_v15 = vsel %vm821_vm11, %v6156_v28, %v2790_v23 }
 0xcd1   : > { %3026 = vmatpush1.bf16.msra.mxu1 %v2875_v56  ;;  %4538 = vmatpush3.bf16.msra.mxu0 %v2765_v11 }
 0xcd2   : > { %v2872_v1 = vpop.permute.xlu1 %2871  ;;  %v2870_v62 = vpop.permute.xlu0 %2869 }
 0xcd3   : > { %v2879_v29 = vsel %vm898_vm14, %v2870_v62, %v2872_v1  ;;  %v2880_v53 = vsel %vm898_vm14, %v2872_v1, %v6140_v44  ;;  %v2878_v42 = vsel %vm898_vm14, %v2868_v16, %v2870_v62  ;;  %v2903_v16 = vsel %vm920_vm3, %v6134_v59, %v6136_v47  ;;  %v4737_v62 = vld [vmem:[%s6671_s16 + $0x8] ss:$12 sps:$4 sm:$0xff]  }
 0xcd4   : > { %3027 = vmatprep.subr.bf16.mxu1 %v2879_v29  ;;  %4539 = vmatprep.subr.bf16.mxu0 %v2880_v53  ;;  %v2933_v59 = vsel %vm944_vm6, %v6165_v50, %v2922_v61 }
 0xcd5   : > { %3028 = vmatpush1.bf16.msra.mxu1 %v2878_v42  ;;  %4540 = vmatpush3.bf16.msra.mxu0 %v2768_v52 }
 0xcd6   : > { %v2924_v49 = vpop.permute.xlu1 %2923  ;;  %3029 = vmatprep.subr.bf16.mxu1 %v2904_v41  ;;  %4541 = vmatprep.subr.bf16.mxu0 %v2905_v2  ;;  %v2810_v44 = vpop.permute.xlu0 %2809 }
 0xcd7   : > { %v2821_v28 = vsel %vm845_vm4, %v6033_v32, %v2810_v44 }
 0xcd9   : > { %3030 = vmatpush1.bf16.msra.mxu1 %v2903_v16  ;;  %4542 = vmatpush3.bf16.msra.mxu0 %v2793_v57 }
 0xcda   : > { %v2900_v18 = vpop.permute.xlu1 %2899  ;;  %v2898_v31 = vpop.permute.xlu0 %2897 }
 0xcdb   : > { %v2907_v55 = vsel %vm920_vm3, %v2898_v31, %v2900_v18  ;;  %v2908_v46 = vsel %vm920_vm3, %v2900_v18, %v2902_v63  ;;  %v2906_v33 = vsel %vm920_vm3, %v6151_v7, %v2898_v31  ;;  %v2931_v7 = vsel %vm944_vm6, %v2916_v4, %v6163_v38  ;;  %v4734_v38 = vld [vmem:[%s6671_s16] ss:$12 sps:$4 sm:$0xff]  }
 0xcdc   : > { %3031 = vmatprep.subr.bf16.mxu1 %v2907_v55  ;;  %4543 = vmatprep.subr.bf16.mxu0 %v2908_v46 }
 0xcdd   : > { %3032 = vmatpush1.bf16.msra.mxu1 %v2906_v33  ;;  %4544 = vmatpush3.bf16.msra.mxu0 %v2796_v15 }
 0xcde   : > { %v2930_v47 = vpop.permute.xlu1 %2929  ;;  %3033 = vmatprep.subr.bf16.mxu1 %v2932_v60  ;;  %4545 = vmatprep.subr.bf16.mxu0 %v2933_v59  ;;  %v2818_v36 = vpop.permute.xlu0 %2817 }
 0xcdf   : > { %v2824_v10 = vsel %vm845_vm4, %v6168_v54, %v2818_v36 }
 0xce1   : > { %3034 = vmatpush1.bf16.msra.mxu1 %v2931_v7  ;;  %4546 = vmatpush3.bf16.msra.mxu0 %v2821_v28 }
 0xce2   : > { %v2928_v17 = vpop.permute.xlu1 %2927  ;;  %v2926_v24 = vpop.permute.xlu0 %2925 }
 0xce3   : > { %v2935_v63 = vsel %vm944_vm6, %v2926_v24, %v2928_v17  ;;  %v2936_v13 = vsel %vm944_vm6, %v2928_v17, %v2930_v47  ;;  %v2934_v50 = vsel %vm944_vm6, %v2924_v49, %v2926_v24 }
 0xce4   : > { %3035 = vmatprep.subr.bf16.mxu1 %v2935_v63  ;;  %4547 = vmatprep.subr.bf16.mxu0 %v2936_v13 }
 0xce5   : > { %3036 = vmatpush1.bf16.msra.mxu1 %v2934_v50  ;;  %4548 = vmatpush3.bf16.msra.mxu0 %v2824_v10 }
 0xce6   : > { %v2946_v32 = vpop.permute.xlu1 %2945  ;;  %v2948_v4 = vpop.permute.xlu0 %2947  ;;  %4592 = vmatprep.subr.bf16.mxu0 %v4770_v58 }
 0xce7   : > { %v2960_v14 = vsel %vm960_vm13, %v2946_v32, %v2948_v4 }
 0xce8   : > { %3048 = vmatprep.subr.bf16.mxu1 %v2960_v14  ;;  %3124 = vmatmul.mubr.bf16.vlgmr.msra.gmra.mrb[20].mxu0 %v4734_v38 }
 0xce9   : > { %3038 = vmatmul.mubr.bf16.vlgmr.msra.gmra.mrb[32].mxu1 %v4734_v38  ;;  %4596 = vmatprep.mubr.msk.bf16.mxu0 %vm4775_vm0, %v4770_v58 }
 0xcea   : > { %v2944_v54 = vpop.permute.xlu1 %2943  ;;  %v2950_v22 = vpop.permute.xlu0 %2949  ;;  %3080 = vmatprep.mubr.bf16.mxu1 %v4773_v20 }
 0xceb   : > { %v2959_v45 = vsel %vm960_vm13, %v2944_v54, %v2946_v32  ;;  %v2961_v37 = vsel %vm960_vm13, %v2948_v4, %v2950_v22 }
 0xcec   : > { %3049 = vmatpush1.bf16.msra.mxu1 %v2959_v45  ;;  %4593 = vmatpush3.bf16.msra.mxu0 %v2961_v37 }
 0xced   : > { %4594 = vmatprep.subr.bf16.mxu0 %v4770_v58 }
 0xcee   : > { %v2954_v34 = vpop.permute.xlu1 %2953  ;;  %v2956_v0 = vpop.permute.xlu0 %2955 }
 0xcef   : > { %v2963_v23 = vsel %vm960_vm13, %v2954_v34, %v2956_v0 }
 0xcf0   : > { %3050 = vmatprep.subr.bf16.mxu1 %v2963_v23 }
 0xcf2   : > { %v2952_v61 = vpop.permute.xlu1 %2951  ;;  %v2958_v56 = vpop.permute.xlu0 %2957 }
 0xcf3   : > { %v2962_v11 = vsel %vm960_vm13, %v2952_v61, %v2954_v34  ;;  %v2964_v1 = vsel %vm960_vm13, %v2956_v0, %v2958_v56 }
 0xcf4   : > { %3051 = vmatpush1.bf16.msra.mxu1 %v2962_v11  ;;  %4595 = vmatpush3.bf16.msra.mxu0 %v2964_v1 }
 0xcf5   : > { %4610 = vmatprep.subr.bf16.mxu1 %v4770_v58 }
 0xcf7   : > { %4449 = vmatmul.mubr.msk.bf16.vlgmr.msra.gmra.mrb[32].mxu1 %vm1995_vm9, %v4737_v62  ;;  %4597 = vmatmul.mubr.msk.bf16.vlgmr.msra.gmra.mrb[24].mxu0 %vm1995_vm9, %v4737_v62 }
 0xcf8   : > { %3331 = vmatprep.mubr.bf16.mxu0 %v4773_v20  ;;  %4612 = vmatprep.mubr.msk.bf16.mxu1 %vm4775_vm0, %v4770_v58 }
 0xd03   : > { %v2980_v49 = vpop.permute.xlu1 %2979  ;;  %v2985_v44 = vpop.permute.xlu0 %2984 }
 0xdbb   : > { %v4549_v29 = vpop.f32.mrb[20].mxu0 }
 0xdbc   : > { %v4550_v53 = vpop.f32.mrb[21].mxu0 }
 0xdbd   : > { %v4551_v42 = vadd.f32 %v4550_v53, %v4549_v29  ;;  %v4552_v52 = vpop.f32.mrb[22].mxu0 }
 0xdbe   : > { %v4553_v41 = vpop.f32.mrb[23].mxu0 }
 0xdbf   : > { %v4554_v2 = vadd.f32 %v4553_v41, %v4552_v52  ;;  %v3126_v16 = vadd.f32 %v4551_v42, %v2980_v49  ;;  %v3225_v41 = vld [vmem:[%s6674_s19] sm:$0xff] }
 0xdc1   : > { %v3129_v15 = vadd.f32 %v4554_v2, %v2985_v44 }
 0xdca   : > { %v3082_v57 = vpop.f32.mrb[32].mxu1  ;;  %v3166_v18 = vpop.f32.mrb[24].mxu0 }
 0xdcb   : > { %v4626_v31 = vadd.f32 %v3082_v57, %v2980_v49  ;;  %v3167_v55 = vadd.f32 %v3166_v18, %v3126_v16  ;;  %v3084_v46 = vpop.f32.mrb[33].mxu1  ;;  %v4598_v33 = vpop.f32.mrb[25].mxu0  ;;  %v3384_v16 = vunpack.c.l.bf16 %v5822_v5 }
 0xdcc   : > { %v4627_v60 = vadd.f32 %v3084_v46, %v2980_v49  ;;  %v3086_v59 = vpop.f32.mrb[34].mxu1  ;;  %v3169_v47 = vpop.f32.mrb[26].mxu0 }
 0xdcd   : > { %v3173_v36 = vmax.f32 %v4626_v31, 0.0  ;;  %v3175_v7 = vmax.f32 %v3167_v55, 0.0  ;;  %v4628_v28 = vadd.f32 %v3086_v59, %v2985_v44  ;;  %v3170_v17 = vadd.f32 %v3169_v47, %v3129_v15  ;;  %v3088_v24 = vpop.f32.mrb[35].mxu1  ;;  %v4599_v63 = vpop.f32.mrb[27].mxu0 }
 0xdce   : > { %v3174_v13 = vmax.f32 %v4627_v60, 0.0  ;;  %v4629_v50 = vadd.f32 %v3088_v24, %v2985_v44  ;;  %v3383_v44 = vunpack.c.l.bf16 %v5818_v40  ;;  %v3385_v31 = vunpack.c.l.bf16 %v5835_v43 }
 0xdcf   : > { %v3176_v10 = vmax.f32 %v4628_v28, 0.0  ;;  %v3178_v38 = vmax.f32 %v3170_v17, 0.0  ;;  %v3179_v4 = vmul.f32 %v3173_v36, %v5158_v6  ;;  %v3181_v14 = vmul.f32 %v3175_v7, %v5162_v19 }
 0xdd0   : > { %v3177_v32 = vmax.f32 %v4629_v50, 0.0  ;;  %v3180_v45 = vmul.f32 %v3174_v13, %v5160_v9  ;;  %v3386_v55 = vunpack.c.l.bf16 %v5844_v8  ;;  %v4697_v33 = vpack.i.bf16 %v3384_v16, %v3383_v44 }
 0xdd1   : > { %v3182_v54 = vmul.f32 %v3176_v10, %v5158_v6  ;;  %v3184_v22 = vmul.f32 %v3178_v38, %v5162_v19  ;;  %v3387_v15 = vunpack.c.h.bf16 %v5818_v40  ;;  %v3388_v60 = vunpack.c.h.bf16 %v5822_v5  ;;  %v4738_v10 = vld [vmem:[%s6673_s18] sm:$0xff]  }
 0xdd2   : > { %v3183_v37 = vmul.f32 %v3177_v32, %v5160_v9  ;;  %v4702_v59 = vpack.i.bf16 %v3386_v55, %v3385_v31  ;;  %v3389_v47 = vunpack.c.h.bf16 %v5835_v43  ;;  %v3390_v36 = vunpack.c.h.bf16 %v5844_v8 }
 0xdd3   : > { %v3185_v34 = vpack.c.bf16 %v3182_v54, %v3179_v4  ;;  %v3187_v0 = vpack.c.bf16 %v3184_v22, %v3181_v14  ;;  %v4707_v7 = vpack.i.bf16 %v3388_v60, %v3387_v15 }
 0xdd4   : > { %v3186_v23 = vpack.c.bf16 %v3183_v37, %v3180_v45  ;;  %v4712_v28 = vpack.i.bf16 %v3390_v36, %v3389_v47 }
 0xdd5   : > { %3191 = vrot.lane.b32.xlu1 %v3185_v34, %s6743_s0 }
 0xdd6   : > { %3193 = vrot.lane.b32.xlu0 %v3186_v23, %s6743_s0 }
 0xdd9   : > { %3195 = vrot.lane.b32.xlu1 %v3187_v0, %s6743_s0 }
 0xdda   : > { %3256 = vrot.lane.b32.xlu0 %v5822_v5, %s6737_s8 }
 0xddd   : > { %3258 = vrot.lane.b32.xlu1 %v5835_v43, %s6737_s8 }
 0xdde   : > { %3254 = vrot.lane.b32.xlu0 %v5818_v40, %s6737_s8 }
 0xde1   : > { %3264 = vrot.lane.b32.xlu1 %v6012_v48, %s6737_s8 }
 0xde2   : > { %3266 = vrot.lane.b32.xlu0 %v6042_v39, %s6737_s8 }
 0xde5   : > { %3262 = vrot.lane.b32.xlu1 %v6015_v51, %s6737_s8 }
 0xe47   : > { %v3192_v61 = vpop.permute.xlu1 %3191 }
 0xe48   : > { %v3194_v56 = vpop.permute.xlu0 %3193  ;;  %v3202_v48 = vsel %vm1187_vm12, 0, %v3192_v61 }
 0xe49   : > { %v3197_v11 = vsel %vm1187_vm12, %v3192_v61, %v3194_v56 }
 0xe4a   : > { %3272 = vrot.lane.b32.xlu0 %v3197_v11, %s6737_s8 }
 0xe4b   : > { %v3196_v1 = vpop.permute.xlu1 %3195 }
 0xe4c   : > { %v3257_v62 = vpop.permute.xlu0 %3256  ;;  %v3198_v29 = vsel %vm1187_vm12, %v3194_v56, %v3196_v1  ;;  %v3205_v49 = vsel %vm1187_vm12, %v3196_v1, 0 }
 0xe4d   : > { %3274 = vrot.lane.b32.xlu1 %v3198_v29, %s6737_s8 }
 0xe4e   : > { %3270 = vrot.lane.b32.xlu0 %v3202_v48, %s6737_s8 }
 0xe4f   : > { %v3259_v39 = vpop.permute.xlu1 %3258 }
 0xe50   : > { %v3255_v53 = vpop.permute.xlu0 %3254  ;;  %v3279_v51 = vsel %vm870_vm8, %v3257_v62, %v3259_v39 }
 0xe51   : > { %v3278_v42 = vsel %vm870_vm8, %v3255_v53, %v3257_v62  ;;  %3260 = vrot.lane.b32.xlu1 %v5844_v8, %s6737_s8  ;;  %3299 = vmatprep.subr.bf16.mxu0 %v3279_v51 }
 0xe52   : > { %3268 = vrot.lane.b32.xlu0 %v6005_v12, %s6737_s8  ;;  %3300 = vmatpush1.bf16.msra.mxu0 %v3278_v42  ;;  %v3226_v12 = vld [vmem:[%s6674_s19 + $0x8] sm:$0xff] }
 0xe53   : > { %v3265_v52 = vpop.permute.xlu1 %3264 }
 0xe54   : > { %v3267_v2 = vpop.permute.xlu0 %3266 }
 0xe55   : > { %3276 = vrot.lane.b32.xlu1 %v3205_v49, %s6737_s8  ;;  %v3282_v57 = vsel %vm870_vm8, %v3265_v52, %v3267_v2 }
 0xe56   : > { %3229 = vperm.xlu0 %4675, %v3225_v41   ;;  %3301 = vmatprep.subr.bf16.mxu0 %v3282_v57 }
 0xe57   : > { %v3263_v18 = vpop.permute.xlu1 %3262 }
 0xe58   : > { %v3281_v46 = vsel %vm870_vm8, %v3263_v18, %v3265_v52 }
 0xe59   : > { %3234 = vperm.xlu1 %4676, %v3226_v12   ;;  %3302 = vmatpush1.bf16.msra.mxu0 %v3281_v46 }
 0xe5a   : > { %4698 = vrot.lane.b32.xlu0 %v4697_v33, %s6737_s8 }
 0xe5d   : > { %4703 = vrot.lane.b32.xlu1 %v4702_v59, %s6737_s8 }
 0xe5e   : > { %4708 = vrot.lane.b32.xlu0 %v4707_v7, %s6737_s8 }
 0xe61   : > { %4713 = vrot.lane.b32.xlu1 %v4712_v28, %s6737_s8 }
 0xebc   : > { %v3273_v17 = vpop.permute.xlu0 %3272 }
 0xebf   : > { %v3275_v24 = vpop.permute.xlu1 %3274 }
 0xec0   : > { %v3271_v63 = vpop.permute.xlu0 %3270  ;;  %v3285_v13 = vsel %vm870_vm8, %v3273_v17, %v3275_v24 }
 0xec1   : > { %v3284_v50 = vsel %vm870_vm8, %v3271_v63, %v3273_v17  ;;  %3303 = vmatprep.subr.bf16.mxu0 %v3285_v13 }
 0xec2   : > { %3304 = vmatpush1.bf16.msra.mxu0 %v3284_v50 }
 0xec3   : > { %v3261_v38 = vpop.permute.xlu1 %3260  ;;  %4600 = vmatprep.subr.bf16.mxu0 %v4770_v58 }
 0xec4   : > { %v3280_v32 = vsel %vm870_vm8, %v3259_v39, %v3261_v38  ;;  %v3269_v4 = vpop.permute.xlu0 %3268 }
 0xec5   : > { %4452 = vmatmul.mubr.msk.bf16.vlgmr.msra.gmra.mrb[28].mxu0 %vm2290_vm10, %v4738_v10  ;;  %v3283_v14 = vsel %vm870_vm8, %v3267_v2, %v3269_v4 }
 0xec6   : > { %4601 = vmatpush3.bf16.msra.mxu0 %v3280_v32  ;;  %4606 = vmatprep.mubr.msk.bf16.mxu0 %vm4775_vm0, %v4770_v58 }
 0xec7   : > { %4602 = vmatprep.subr.bf16.mxu0 %v4770_v58  ;;  %v3277_v54 = vpop.permute.xlu1 %3276 }
 0xec8   : > { %v3286_v22 = vsel %vm870_vm8, %v3275_v24, %v3277_v54 }
 0xeca   : > { %4603 = vmatpush3.bf16.msra.mxu0 %v3283_v14 }
 0xecb   : > { %4604 = vmatprep.subr.bf16.mxu0 %v4770_v58 }
 0xece   : > { %4605 = vmatpush3.bf16.msra.mxu0 %v3286_v22 }
 0xed1   : > { %4607 = vmatmul.mubr.msk.bf16.vlgmr.msra.gmra.mrb[32].mxu0 %vm2290_vm10, %v4738_v10 }
 0xed2   : > { %3516 = vmatprep.mubr.bf16.mxu0 %v4773_v20 }
 0xed5   : > { %v3230_v45 = vpop.permute.xlu0 %3229 }
 0xed8   : > { %v3235_v37 = vpop.permute.xlu1 %3234 }
 0xed9   : > { %v4699_v34 = vpop.permute.xlu0 %4698 }
 0xeda   : > { %v4701_v61 = vunpack.i.h.bf16 %v4699_v34  ;;  %v4700_v56 = vunpack.i.l.bf16 %v4699_v34 }
 0xedc   : > { %v4704_v0 = vpop.permute.xlu1 %4703  ;;  %v3415_v42 = vsel %vm870_vm8, %v4700_v56, %v4701_v61 }
 0xedd   : > { %v4709_v23 = vpop.permute.xlu0 %4708  ;;  %v4705_v1 = vunpack.i.l.bf16 %v4704_v0  ;;  %v4706_v36 = vunpack.i.h.bf16 %v4704_v0 }
 0xede   : > { %v4711_v62 = vunpack.i.h.bf16 %v4709_v23  ;;  %v4710_v29 = vunpack.i.l.bf16 %v4709_v23 }
 0xedf   : > { %v3416_v49 = vsel %vm870_vm8, %v4701_v61, %v4705_v1  ;;  %v3417_v13 = vsel %vm870_vm8, %v4705_v1, %v4706_v36 }
 0xee0   : > { %v4714_v11 = vpop.permute.xlu1 %4713  ;;  %v3418_v12 = vsel %vm870_vm8, %v4710_v29, %v4711_v62 }
 0xee1   : > { %v4715_v39 = vunpack.i.l.bf16 %v4714_v11  ;;  %v4716_v28 = vunpack.i.h.bf16 %v4714_v11  ;;  %v3676_v11 = vld [vmem:[%s6748_s9] sm:$0xff] }
 0xee3   : > { %v3419_v55 = vsel %vm870_vm8, %v4711_v62, %v4715_v39  ;;  %v3420_v4 = vsel %vm870_vm8, %v4715_v39, %v4716_v28 }
 0xf98   : > { %v3333_v48 = vpop.f32.mrb[28].mxu0 }
 0xf99   : > { %v3334_v53 = vadd.f32 %v3333_v48, %v3230_v45  ;;  %v3335_v51 = vpop.f32.mrb[29].mxu0 }
 0xf9a   : > { %v3336_v52 = vadd.f32 %v3335_v51, %v3230_v45  ;;  %v3337_v41 = vpop.f32.mrb[30].mxu0 }
 0xf9b   : > { %v3427_v2 = vadd.f32 %v3415_v42, %v3334_v53  ;;  %v3338_v44 = vadd.f32 %v3337_v41, %v3235_v37  ;;  %v3339_v16 = vpop.f32.mrb[31].mxu0 }
 0xf9c   : > { %v3428_v57 = vadd.f32 %v3416_v49, %v3336_v52  ;;  %v3340_v18 = vadd.f32 %v3339_v16, %v3235_v37  ;;  %v4740_v16 = vld [vmem:[%s6749_s11] sm:$0xff]  }
 0xf9d   : > { %v3430_v31 = vadd.f32 %v3418_v12, %v3338_v44  ;;  %v3433_v33 = vmul.f32 %v3427_v2, %v5158_v6 }
 0xf9e   : > { %v3431_v46 = vadd.f32 %v3419_v55, %v3340_v18  ;;  %v3434_v60 = vmul.f32 %v3428_v57, %v5160_v9 }
 0xf9f   : > { %v3436_v15 = vmul.f32 %v3430_v31, %v5158_v6 }
 0xfa0   : > { %v3437_v59 = vmul.f32 %v3431_v46, %v5160_v9 }
 0xfa1   : > { %v3439_v47 = vpack.c.bf16 %v3436_v15, %v3433_v33 }
 0xfa2   : > { %v3440_v7 = vpack.c.bf16 %v3437_v59, %v3434_v60 }
 0xfa3   : > { %3445 = vrot.lane.b32.xlu0 %v3439_v47, %s6743_s0 }
 0xfa4   : > { %v3376_v17 = vpop.f32.mrb[32].mxu0  ;;  %3447 = vrot.lane.b32.xlu1 %v3440_v7, %s6743_s0 }
 0xfa5   : > { %v3377_v24 = vadd.f32 %v3376_v17, %v3230_v45  ;;  %v4608_v63 = vpop.f32.mrb[33].mxu0 }
 0xfa6   : > { %v3379_v50 = vpop.f32.mrb[34].mxu0 }
 0xfa7   : > { %v3429_v10 = vadd.f32 %v3417_v13, %v3377_v24  ;;  %v3380_v38 = vadd.f32 %v3379_v50, %v3235_v37  ;;  %v4609_v32 = vpop.f32.mrb[35].mxu0 }
 0xfa9   : > { %v3432_v14 = vadd.f32 %v3420_v4, %v3380_v38  ;;  %v3435_v54 = vmul.f32 %v3429_v10, %v5162_v19 }
 0xfab   : > { %v3438_v22 = vmul.f32 %v3432_v14, %v5162_v19 }
 0xfad   : > { %v3441_v34 = vpack.c.bf16 %v3438_v22, %v3435_v54 }
 0xfaf   : > { %3449 = vrot.lane.b32.xlu0 %v3441_v34, %s6743_s0 }
0x1015   : > { %v3446_v0 = vpop.permute.xlu0 %3445 }
0x1016   : > { %v3448_v23 = vpop.permute.xlu1 %3447  ;;  %v3454_v61 = vsel %vm1187_vm12, 0, %v3446_v0 }
0x1017   : > { %v3451_v45 = vsel %vm1187_vm12, %v3446_v0, %v3448_v23 }
0x1018   : > { %3469 = vrot.lane.b32.xlu1 %v3451_v45, %s6737_s8 }
0x101c   : > { %3467 = vrot.lane.b32.xlu1 %v3454_v61, %s6737_s8 }
0x1020   : > { %3577 = vrot.lane.b32.xlu1 %v5822_v5, %s6737_s8  ;;  %v3677_v5 = vld [vmem:[%s6748_s9 + $0x8] sm:$0xff] }
0x1021   : > { %v3450_v37 = vpop.permute.xlu0 %3449 }
0x1022   : > { %v3452_v56 = vsel %vm1187_vm12, %v3448_v23, %v3450_v37  ;;  %v3456_v1 = vsel %vm1187_vm12, %v3450_v37, 0 }
0x1023   : > { %3471 = vrot.lane.b32.xlu0 %v3452_v56, %s6737_s8 }
0x1024   : > { %3581 = vrot.lane.b32.xlu1 %v5844_v8, %s6737_s8 }
0x1027   : > { %3473 = vrot.lane.b32.xlu0 %v3456_v1, %s6737_s8 }
0x1028   : > { %3680 = vperm.xlu1 %4676, %v3676_v11  }
0x102b   : > { %3579 = vrot.lane.b32.xlu0 %v5835_v43, %s6737_s8  ;;  %v4739_v43 = vld [vmem:[%s6749_s11 + $0x8] sm:$0xff]  }
0x102f   : > { %3575 = vrot.lane.b32.xlu0 %v5818_v40, %s6737_s8 }
0x1033   : > { %3685 = vperm.xlu0 %4675, %v3677_v5  }
0x108a   : > { %v3470_v8 = vpop.permute.xlu1 %3469 }
0x108e   : > { %v3468_v62 = vpop.permute.xlu1 %3467 }
0x108f   : > { %v3475_v39 = vsel %vm870_vm8, %v3468_v62, %v3470_v8  ;;  %v4741_v62 = vld [vmem:[%s6675_s20 + $0x4] ss:$8 sps:$4 sm:$0xff]  }
0x1092   : > { %v3578_v53 = vpop.permute.xlu1 %3577 }
0x1095   : > { %v3472_v29 = vpop.permute.xlu0 %3471 }
0x1096   : > { %v3476_v48 = vsel %vm870_vm8, %v3470_v8, %v3472_v29  ;;  %v3582_v42 = vpop.permute.xlu1 %3581 }
0x1097   : > { %3484 = vmatprep.subr.bf16.mxu0 %v3476_v48  ;;  %v3838_v48 = vld [vmem:[%s6676_s21 + $0x8] sm:$0xff] }
0x1098   : > { %3485 = vmatpush1.bf16.msra.mxu0 %v3475_v39 }
0x1099   : > { %v3474_v40 = vpop.permute.xlu0 %3473 }
0x109a   : > { %v3477_v51 = vsel %vm870_vm8, %v3472_v29, %v3474_v40  ;;  %v3837_v29 = vld [vmem:[%s6676_s21] sm:$0xff] }
0x109b   : > { %4457 = vmatmul.mubr.msk.bf16.vlgmr.msra.gmra.mrb[36].mxu0 %vm1336_vm7, %v4739_v43  ;;  %4611 = vmatpush3.bf16.msra.mxu1 %v3477_v51 }
0x109c   : > { %4616 = vmatprep.subr.bf16.mxu1 %v4770_v58  ;;  %3624 = vmatprep.mubr.bf16.mxu0 %v4773_v20 }
0x109d   : > { %v3580_v52 = vpop.permute.xlu0 %3579 }
0x109e   : > { %v3585_v41 = vsel %vm870_vm8, %v3580_v52, %v3582_v42  ;;  %4613 = vmatmul.mubr.msk.bf16.vlgmr.msra.gmra.mrb[36].mxu1 %vm1336_vm7, %v4739_v43  ;;  %v3584_v2 = vsel %vm870_vm8, %v3578_v53, %v3580_v52 }
0x109f   : > { %3592 = vmatprep.subr.bf16.mxu0 %v3584_v2  ;;  %4617 = vmatpush3.bf16.msra.mxu1 %v3585_v41 }
0x10a0   : > { %4618 = vmatprep.mubr.msk.bf16.mxu1 %vm4775_vm0, %v4770_v58  ;;  %3904 = vmatprep.subr.bf16.mxu1 %v4773_v20 }
0x10a1   : > { %v3576_v49 = vpop.permute.xlu0 %3575 }
0x10a2   : > { %v3583_v44 = vsel %vm870_vm8, %v3576_v49, %v3578_v53 }
0x10a3   : > { %3593 = vmatpush1.bf16.msra.mxu0 %v3583_v44 }
0x10a6   : > { %4619 = vmatmul.mubr.msk.bf16.vlgmr.msra.gmra.mrb[40].mxu1 %vm1336_vm7, %v4740_v16 }
0x10a7   : > { %4460 = vmatmul.mubr.msk.bf16.vlgmr.msra.gmra.mrb[36].mxu0 %vm1336_vm7, %v4740_v16  ;;  %v3681_v55 = vpop.permute.xlu1 %3680  ;;  %4467 = vmatprep.mubr.msk.bf16.mxu1 %vm1336_vm7, %v4741_v62 }
0x10a8   : > { %4466 = vmatprep.mubr.msk.bf16.mxu0 %vm1336_vm7, %v4741_v62 }
0x10b2   : > { %v3686_v58 = vpop.permute.xlu0 %3685 }
0x1171   : > { %v3561_v57 = vpop.f32.mrb[36].mxu1 }
0x1172   : > { %v4614_v12 = vpop.f32.mrb[37].mxu1 }
0x1173   : > { %v3564_v18 = vpop.f32.mrb[38].mxu1 }
0x1174   : > { %v4615_v31 = vpop.f32.mrb[39].mxu1 }
0x1179   : > { %v3669_v46 = vpop.f32.mrb[40].mxu1 }
0x117a   : > { %v3670_v33 = vadd.f32 %v3669_v46, %v3561_v57  ;;  %v3626_v15 = vpop.f32.mrb[36].mxu0  ;;  %v4620_v60 = vpop.f32.mrb[41].mxu1 }
0x117b   : > { %v3688_v59 = vadd.f32 %v3681_v55, %v3626_v15  ;;  %v3628_v47 = vpop.f32.mrb[37].mxu0  ;;  %v3672_v36 = vpop.f32.mrb[42].mxu1 }
0x117c   : > { %v3690_v7 = vadd.f32 %v3681_v55, %v3670_v33  ;;  %v3689_v28 = vadd.f32 %v3681_v55, %v3628_v47  ;;  %v3673_v17 = vadd.f32 %v3672_v36, %v3564_v18  ;;  %v3630_v24 = vpop.f32.mrb[38].mxu0  ;;  %v4621_v63 = vpop.f32.mrb[43].mxu1 }
0x117d   : > { %v3691_v13 = vadd.f32 %v3686_v58, %v3630_v24  ;;  %v3632_v50 = vpop.f32.mrb[39].mxu0  ;;  %v3694_v32 = vmul.f32 %v3688_v59, %v5158_v6 }
0x117e   : > { %v3693_v10 = vadd.f32 %v3686_v58, %v3673_v17  ;;  %v3692_v38 = vadd.f32 %v3686_v58, %v3632_v50  ;;  %v3696_v14 = vmul.f32 %v3690_v7, %v5162_v19  ;;  %v3695_v54 = vmul.f32 %v3689_v28, %v5160_v9 }
0x117f   : > { %v3697_v4 = vmul.f32 %v3691_v13, %v5158_v6 }
0x1180   : > { %v3699_v22 = vmul.f32 %v3693_v10, %v5162_v19  ;;  %v3698_v34 = vmul.f32 %v3692_v38, %v5160_v9 }
0x1181   : > { %v3700_v0 = vpack.c.bf16 %v3697_v4, %v3694_v32 }
0x1182   : > { %v3702_v23 = vpack.c.bf16 %v3699_v22, %v3696_v14  ;;  %v3701_v45 = vpack.c.bf16 %v3698_v34, %v3695_v54 }
0x1183   : > { %3706 = vrot.lane.b32.xlu1 %v3700_v0, %s6743_s0 }
0x1184   : > { %3708 = vrot.lane.b32.xlu0 %v3701_v45, %s6743_s0 }
0x1187   : > { %3710 = vrot.lane.b32.xlu1 %v3702_v23, %s6743_s0 }
0x11f5   : > { %v3707_v61 = vpop.permute.xlu1 %3706 }
0x11f6   : > { %v3717_v37 = vsel %vm1187_vm12, 0, %v3707_v61  ;;  %v3709_v56 = vpop.permute.xlu0 %3708 }
0x11f7   : > { %v3712_v11 = vsel %vm1187_vm12, %v3707_v61, %v3709_v56  ;;  %3723 = vrot.lane.b32.xlu0 %v3717_v37, %s6742_s2 }
0x11f8   : > { %3861 = vmatprep.subr.bf16.mxu0 %v3712_v11 }
0x11f9   : > { %4465 = vmatpush1.bf16.msk.msra.mxu0 %vm5193_vm15, %v3707_v61  ;;  %v3711_v1 = vpop.permute.xlu1 %3710 }
0x11fa   : > { %v3713_v5 = vsel %vm1187_vm12, %v3709_v56, %v3711_v1  ;;  %v3720_v8 = vsel %vm1187_vm12, %v3711_v1, 0 }
0x11fb   : > { %3737 = vrot.lane.b32.xlu0 %v3717_v37, %s6744_s25  ;;  %3729 = vrot.lane.b32.xlu1 %v3720_v8, %s6742_s2 }
0x11fc   : > { %3905 = vmatpush1.bf16.msra.mxu1 %v3713_v5 }
0x11fd   : > { %3906 = vmatprep.subr.bf16.mxu1 %v4773_v20 }
0x11ff   : > { %3751 = vrot.lane.b32.xlu0 %v3717_v37, %s6745_s7  ;;  %3743 = vrot.lane.b32.xlu1 %v3720_v8, %s6744_s25 }
0x1203   : > { %3765 = vrot.lane.b32.xlu0 %v3717_v37, %s6737_s8  ;;  %3757 = vrot.lane.b32.xlu1 %v3720_v8, %s6745_s7 }
0x1207   : > { %3779 = vrot.lane.b32.xlu0 %v3717_v37, %s6738_s27  ;;  %3771 = vrot.lane.b32.xlu1 %v3720_v8, %s6737_s8 }
0x120b   : > { %3793 = vrot.lane.b32.xlu0 %v3717_v37, %s6739_s3  ;;  %3785 = vrot.lane.b32.xlu1 %v3720_v8, %s6738_s27 }
0x120f   : > { %3807 = vrot.lane.b32.xlu0 %v3717_v37, %s6733_s1  ;;  %3799 = vrot.lane.b32.xlu1 %v3720_v8, %s6739_s3 }
0x1213   : > { %3725 = vrot.lane.b32.xlu0 %v3712_v11, %s6742_s2  ;;  %3813 = vrot.lane.b32.xlu1 %v3720_v8, %s6733_s1 }
0x1217   : > { %3739 = vrot.lane.b32.xlu0 %v3712_v11, %s6744_s25  ;;  %3727 = vrot.lane.b32.xlu1 %v3713_v5, %s6742_s2 }
0x121b   : > { %3753 = vrot.lane.b32.xlu0 %v3712_v11, %s6745_s7  ;;  %3741 = vrot.lane.b32.xlu1 %v3713_v5, %s6744_s25 }
0x121f   : > { %3767 = vrot.lane.b32.xlu0 %v3712_v11, %s6737_s8  ;;  %3755 = vrot.lane.b32.xlu1 %v3713_v5, %s6745_s7 }
0x1223   : > { %3781 = vrot.lane.b32.xlu0 %v3712_v11, %s6738_s27  ;;  %3769 = vrot.lane.b32.xlu1 %v3713_v5, %s6737_s8 }
0x1227   : > { %3795 = vrot.lane.b32.xlu0 %v3712_v11, %s6739_s3  ;;  %3783 = vrot.lane.b32.xlu1 %v3713_v5, %s6738_s27 }
0x122b   : > { %3809 = vrot.lane.b32.xlu0 %v3712_v11, %s6733_s1  ;;  %3797 = vrot.lane.b32.xlu1 %v3713_v5, %s6739_s3 }
0x122f   : > { %3823 = vrot.lane.b32.xlu0 %v3712_v11, %s6735_s29  ;;  %3811 = vrot.lane.b32.xlu1 %v3713_v5, %s6733_s1 }
0x1233   : > { %3821 = vrot.lane.b32.xlu0 %v3717_v37, %s6735_s29  ;;  %3825 = vrot.lane.b32.xlu1 %v3713_v5, %s6735_s29 }
0x1237   : > { %3841 = vperm.xlu0 %4675, %v3837_v29   ;;  %3827 = vrot.lane.b32.xlu1 %v3720_v8, %s6735_s29 }
0x123b   : > { %3846 = vperm.xlu1 %4676, %v3838_v48  }
0x1269   : > { %v3724_v39 = vpop.permute.xlu0 %3723 }
0x126d   : > { %v3738_v53 = vpop.permute.xlu0 %3737  ;;  %v3730_v43 = vpop.permute.xlu1 %3729 }
0x1271   : > { %v3752_v40 = vpop.permute.xlu0 %3751  ;;  %v3744_v51 = vpop.permute.xlu1 %3743 }
0x1275   : > { %v3766_v42 = vpop.permute.xlu0 %3765  ;;  %v3758_v52 = vpop.permute.xlu1 %3757 }
0x1279   : > { %v3780_v41 = vpop.permute.xlu0 %3779  ;;  %v3772_v2 = vpop.permute.xlu1 %3771 }
0x127d   : > { %v3794_v49 = vpop.permute.xlu0 %3793  ;;  %v3786_v44 = vpop.permute.xlu1 %3785 }
0x1281   : > { %v6440_v16 = vpop.permute.xlu0 %3807  ;;  %v3800_v57 = vpop.permute.xlu1 %3799 }
0x1285   : > { %v3726_v12 = vpop.permute.xlu0 %3725  ;;  %v3814_v18 = vpop.permute.xlu1 %3813 }
0x1286   : > { %v3731_v33 = vsel %vm802_vm1, %v3724_v39, %v3726_v12 }
0x1289   : > { %v3740_v31 = vpop.permute.xlu0 %3739  ;;  %v3728_v55 = vpop.permute.xlu1 %3727 }
0x128a   : > { %v3733_v58 = vsel %vm802_vm1, %v3728_v55, %v3730_v43  ;;  %v3732_v46 = vsel %vm802_vm1, %v3726_v12, %v3728_v55  ;;  %v3745_v36 = vsel %vm821_vm11, %v3738_v53, %v3740_v31  ;;  %v4743_v53 = vld [vmem:[%s6675_s20] ss:$8 sps:$4 sm:$0xff]  }
0x128b   : > { %3863 = vmatprep.subr.bf16.mxu0 %v3732_v46  ;;  %3907 = vmatpush1.bf16.msra.mxu1 %v3733_v58 }
0x128c   : > { %3864 = vmatpush1.bf16.msra.mxu0 %v3731_v33  ;;  %3908 = vmatprep.subr.bf16.mxu1 %v4773_v20 }
0x128d   : > { %v3754_v15 = vpop.permute.xlu0 %3753  ;;  %v3742_v60 = vpop.permute.xlu1 %3741 }
0x128e   : > { %v3747_v59 = vsel %vm821_vm11, %v3742_v60, %v3744_v51  ;;  %v3746_v47 = vsel %vm821_vm11, %v3740_v31, %v3742_v60  ;;  %v3759_v63 = vsel %vm845_vm4, %v3752_v40, %v3754_v15 }
0x128f   : > { %3865 = vmatprep.subr.bf16.mxu0 %v3746_v47  ;;  %3909 = vmatpush1.bf16.msra.mxu1 %v3747_v59 }
0x1290   : > { %3866 = vmatpush1.bf16.msra.mxu0 %v3745_v36  ;;  %3910 = vmatprep.subr.bf16.mxu1 %v4773_v20 }
0x1291   : > { %v3768_v7 = vpop.permute.xlu0 %3767  ;;  %v3756_v28 = vpop.permute.xlu1 %3755 }
0x1292   : > { %v3761_v17 = vsel %vm845_vm4, %v3756_v28, %v3758_v52  ;;  %v3760_v24 = vsel %vm845_vm4, %v3754_v15, %v3756_v28  ;;  %v3773_v32 = vsel %vm870_vm8, %v3766_v42, %v3768_v7 }
0x1293   : > { %3867 = vmatprep.subr.bf16.mxu0 %v3760_v24  ;;  %3911 = vmatpush1.bf16.msra.mxu1 %v3761_v17 }
0x1294   : > { %3868 = vmatpush1.bf16.msra.mxu0 %v3759_v63  ;;  %3912 = vmatprep.subr.bf16.mxu1 %v4773_v20 }
0x1295   : > { %v3782_v13 = vpop.permute.xlu0 %3781  ;;  %v3770_v50 = vpop.permute.xlu1 %3769 }
0x1296   : > { %v3775_v10 = vsel %vm870_vm8, %v3770_v50, %v3772_v2  ;;  %v3774_v38 = vsel %vm870_vm8, %v3768_v7, %v3770_v50  ;;  %v3787_v34 = vsel %vm898_vm14, %v3780_v41, %v3782_v13 }
0x1297   : > { %3869 = vmatprep.subr.bf16.mxu0 %v3774_v38  ;;  %3913 = vmatpush1.bf16.msra.mxu1 %v3775_v10  ;;  %v4100_v38 = vld [vmem:[%s6678_s23] sm:$0xff] }
0x1298   : > { %3870 = vmatpush1.bf16.msra.mxu0 %v3773_v32  ;;  %3914 = vmatprep.subr.bf16.mxu1 %v4773_v20  ;;  %v4102_v32 = vld [vmem:[%s6678_s23 + $0x10] sm:$0xff] }
0x1299   : > { %v3796_v4 = vpop.permute.xlu0 %3795  ;;  %v3784_v14 = vpop.permute.xlu1 %3783 }
0x129a   : > { %v3789_v54 = vsel %vm898_vm14, %v3784_v14, %v3786_v44  ;;  %v3788_v22 = vsel %vm898_vm14, %v3782_v13, %v3784_v14  ;;  %v3801_v37 = vsel %vm920_vm3, %v3794_v49, %v3796_v4  ;;  %v4104_v14 = vld [vmem:[%s6678_s23 + $0x20] sm:$0xff] }
0x129b   : > { %3871 = vmatprep.subr.bf16.mxu0 %v3788_v22  ;;  %3915 = vmatpush1.bf16.msra.mxu1 %v3789_v54  ;;  %v4103_v54 = vld [vmem:[%s6678_s23 + $0x18] sm:$0xff]  ;;  %v4106_v22 = vld [vmem:[%s6678_s23 + $0x30] sm:$0xff] }
0x129c   : > { %3872 = vmatpush1.bf16.msra.mxu0 %v3787_v34  ;;  %3916 = vmatprep.subr.bf16.mxu1 %v4773_v20  ;;  %v4105_v34 = vld [vmem:[%s6678_s23 + $0x28] sm:$0xff] }
0x129d   : > { %v3810_v0 = vpop.permute.xlu0 %3809  ;;  %v3798_v23 = vpop.permute.xlu1 %3797 }
0x129e   : > { %v3803_v45 = vsel %vm920_vm3, %v3798_v23, %v3800_v57  ;;  %v3802_v61 = vsel %vm920_vm3, %v3796_v4, %v3798_v23  ;;  %v3815_v8 = vsel %vm944_vm6, %v6440_v16, %v3810_v0  ;;  %v4101_v4 = vld [vmem:[%s6678_s23 + $0x8] sm:$0xff] }
0x129f   : > { %3873 = vmatprep.subr.bf16.mxu0 %v3802_v61  ;;  %3917 = vmatpush1.bf16.msra.mxu1 %v3803_v45 }
0x12a0   : > { %3874 = vmatpush1.bf16.msra.mxu0 %v3801_v37  ;;  %3918 = vmatprep.subr.bf16.mxu1 %v4773_v20 }
0x12a1   : > { %v3824_v56 = vpop.permute.xlu0 %3823  ;;  %v3812_v11 = vpop.permute.xlu1 %3811 }
0x12a2   : > { %v3817_v1 = vsel %vm944_vm6, %v3812_v11, %v3814_v18  ;;  %v3816_v5 = vsel %vm944_vm6, %v3810_v0, %v3812_v11  ;;  %v4107_v0 = vld [vmem:[%s6678_s23 + $0x38] sm:$0xff] }
0x12a3   : > { %3875 = vmatprep.subr.bf16.mxu0 %v3816_v5  ;;  %3919 = vmatpush1.bf16.msra.mxu1 %v3817_v1 }
0x12a4   : > { %3876 = vmatpush1.bf16.msra.mxu0 %v3815_v8  ;;  %3920 = vmatprep.subr.bf16.mxu1 %v4773_v20 }
0x12a5   : > { %v3822_v62 = vpop.permute.xlu0 %3821  ;;  %v3826_v29 = vpop.permute.xlu1 %3825 }
0x12a6   : > { %v3829_v48 = vsel %vm960_vm13, %v3822_v62, %v3824_v56  ;;  %v3830_v39 = vsel %vm960_vm13, %v3824_v56, %v3826_v29 }
0x12a7   : > { %3877 = vmatprep.subr.bf16.mxu0 %v3830_v39 }
0x12a8   : > { %3878 = vmatpush1.bf16.msra.mxu0 %v3829_v48 }
0x12a9   : > { %v3828_v43 = vpop.permute.xlu1 %3827 }
0x12aa   : > { %v3831_v40 = vsel %vm960_vm13, %v3826_v29, %v3828_v43 }
0x12ab   : > { %3894 = vmatmul.mubr.bf16.vlgmr.msra.gmra.mrb[40].mxu0 %v4743_v53  ;;  %3921 = vmatpush1.bf16.msra.mxu1 %v3831_v40 }
0x12ac   : > { %4269 = vmatprep.subr.bf16.mxu1 %v4773_v20  ;;  %4478 = vmatprep.mubr.msk.bf16.mxu0 %vm1336_vm7, %v4744_v35 }
0x12ae   : > { %3937 = vmatmul.mubr.bf16.vlgmr.msra.gmra.mrb[44].mxu1 %v4743_v53 }
0x12af   : > { %4482 = vmatprep.mubr.msk.bf16.mxu1 %vm1336_vm7, %v4744_v35  ;;  %v4746_v35 = vld [vmem:[%s6677_s22] ss:$8 sps:$4 sm:$0xff]  }
0x12b6   : > { %v3842_v51 = vpop.permute.xlu0 %3841 }
0x12ba   : > { %v3847_v2 = vpop.permute.xlu1 %3846 }
0x137e   : > { %v3895_v42 = vpop.f32.mrb[40].mxu0 }
0x137f   : > { %v3896_v52 = vadd.f32 %v3895_v42, %v3842_v51  ;;  %v3897_v41 = vpop.f32.mrb[41].mxu0 }
0x1380   : > { %v3898_v49 = vadd.f32 %v3897_v41, %v3842_v51  ;;  %v3899_v44 = vpop.f32.mrb[42].mxu0 }
0x1381   : > { %v3945_v16 = vadd.f32 %v3896_v52, %v5165_v3  ;;  %v3900_v57 = vadd.f32 %v3899_v44, %v3847_v2  ;;  %v3901_v12 = vpop.f32.mrb[43].mxu0  ;;  %v3938_v18 = vpop.f32.mrb[44].mxu1 }
0x1382   : > { %v3946_v31 = vadd.f32 %v3898_v49, %v5171_v25  ;;  %v3902_v55 = vadd.f32 %v3901_v12, %v3847_v2  ;;  %v3939_v58 = vadd.f32 %v3938_v18, %v3842_v51  ;;  %v3940_v46 = vpop.f32.mrb[45].mxu1 }
0x1383   : > { %v3948_v33 = vadd.f32 %v3900_v57, %v5168_v21  ;;  %v3941_v15 = vpop.f32.mrb[46].mxu1  ;;  %v3951_v7 = vmul.f32 %v3945_v16, %v5158_v6 }
0x1384   : > { %v3949_v60 = vadd.f32 %v3902_v55, %v5174_v26  ;;  %v3947_v59 = vadd.f32 %v3939_v58, %v5184_v30  ;;  %v3942_v47 = vadd.f32 %v3941_v15, %v3847_v2  ;;  %v3943_v36 = vpop.f32.mrb[47].mxu1  ;;  %v3952_v28 = vmul.f32 %v3946_v31, %v5160_v9 }
0x1385   : > { %v3954_v3 = vmul.f32 %v3948_v33, %v5158_v6 }
0x1386   : > { %v3955_v25 = vmul.f32 %v3949_v60, %v5160_v9  ;;  %v3950_v17 = vadd.f32 %v3942_v47, %v5177_v27  ;;  %v3953_v21 = vmul.f32 %v3947_v59, %v5162_v19 }
0x1387   : > { %v3957_v24 = vpack.c.bf16 %v3954_v3, %v3951_v7 }
0x1388   : > { %v3958_v63 = vpack.c.bf16 %v3955_v25, %v3952_v28  ;;  %v3956_v26 = vmul.f32 %v3950_v17, %v5162_v19 }
0x1389   : > { %3963 = vrot.lane.b32.xlu0 %v3957_v24, %s6743_s0 }
0x138a   : > { %v3959_v30 = vpack.c.bf16 %v3956_v26, %v3953_v21  ;;  %3965 = vrot.lane.b32.xlu1 %v3958_v63, %s6743_s0 }
0x138d   : > { %3967 = vrot.lane.b32.xlu0 %v3959_v30, %s6743_s0 }
0x13fb   : > { %v3964_v6 = vpop.permute.xlu0 %3963 }
0x13fc   : > { %v3974_v13 = vsel %vm1187_vm12, 0, %v3964_v6  ;;  %v3966_v50 = vpop.permute.xlu1 %3965 }
0x13fd   : > { %v3969_v9 = vsel %vm1187_vm12, %v3964_v6, %v3966_v50  ;;  %3980 = vrot.lane.b32.xlu1 %v3974_v13, %s6742_s2 }
0x13fe   : > { %4196 = vmatprep.subr.bf16.mxu0 %v3969_v9 }
0x13ff   : > { %4477 = vmatpush1.bf16.msk.msra.mxu0 %vm5193_vm15, %v3964_v6  ;;  %v3968_v19 = vpop.permute.xlu0 %3967 }
0x1400   : > { %v3970_v27 = vsel %vm1187_vm12, %v3966_v50, %v3968_v19  ;;  %v3977_v10 = vsel %vm1187_vm12, %v3968_v19, 0 }
0x1401   : > { %3994 = vrot.lane.b32.xlu1 %v3974_v13, %s6744_s25  ;;  %3986 = vrot.lane.b32.xlu0 %v3977_v10, %s6742_s2 }
0x1402   : > { %4270 = vmatpush1.bf16.msra.mxu1 %v3970_v27 }
0x1403   : > { %4271 = vmatprep.subr.bf16.mxu1 %v4773_v20 }
0x1405   : > { %4008 = vrot.lane.b32.xlu1 %v3974_v13, %s6745_s7  ;;  %4000 = vrot.lane.b32.xlu0 %v3977_v10, %s6744_s25 }
0x1409   : > { %4022 = vrot.lane.b32.xlu1 %v3974_v13, %s6737_s8  ;;  %4014 = vrot.lane.b32.xlu0 %v3977_v10, %s6745_s7 }
0x140d   : > { %4036 = vrot.lane.b32.xlu1 %v3974_v13, %s6738_s27  ;;  %4028 = vrot.lane.b32.xlu0 %v3977_v10, %s6737_s8 }
0x1411   : > { %4050 = vrot.lane.b32.xlu1 %v3974_v13, %s6739_s3  ;;  %4042 = vrot.lane.b32.xlu0 %v3977_v10, %s6738_s27 }
0x1415   : > { %4064 = vrot.lane.b32.xlu1 %v3974_v13, %s6733_s1  ;;  %4056 = vrot.lane.b32.xlu0 %v3977_v10, %s6739_s3 }
0x1419   : > { %3982 = vrot.lane.b32.xlu1 %v3969_v9, %s6742_s2  ;;  %4070 = vrot.lane.b32.xlu0 %v3977_v10, %s6733_s1 }
0x141d   : > { %3996 = vrot.lane.b32.xlu1 %v3969_v9, %s6744_s25  ;;  %3984 = vrot.lane.b32.xlu0 %v3970_v27, %s6742_s2 }
0x1421   : > { %4010 = vrot.lane.b32.xlu1 %v3969_v9, %s6745_s7  ;;  %3998 = vrot.lane.b32.xlu0 %v3970_v27, %s6744_s25  ;;  %s4642_s25 = smul.u32 192, %s6751_s26 }
0x1423   : > { %s6626_s30 = scalar_lea.vmem %s6679_s24, %s4642_s25 }
0x1425   : > { %4024 = vrot.lane.b32.xlu1 %v3969_v9, %s6737_s8  ;;  %4012 = vrot.lane.b32.xlu0 %v3970_v27, %s6745_s7 }
0x1429   : > { %4038 = vrot.lane.b32.xlu1 %v3969_v9, %s6738_s27  ;;  %4026 = vrot.lane.b32.xlu0 %v3970_v27, %s6737_s8 }
0x142d   : > { %4052 = vrot.lane.b32.xlu1 %v3969_v9, %s6739_s3  ;;  %4040 = vrot.lane.b32.xlu0 %v3970_v27, %s6738_s27 }
0x1431   : > { %4066 = vrot.lane.b32.xlu1 %v3969_v9, %s6733_s1  ;;  %4054 = vrot.lane.b32.xlu0 %v3970_v27, %s6739_s3 }
0x1435   : > { %4080 = vrot.lane.b32.xlu1 %v3969_v9, %s6735_s29  ;;  %4068 = vrot.lane.b32.xlu0 %v3970_v27, %s6733_s1 }
0x1439   : > { %4078 = vrot.lane.b32.xlu1 %v3974_v13, %s6735_s29  ;;  %4082 = vrot.lane.b32.xlu0 %v3970_v27, %s6735_s29 }
0x143d   : > { %4110 = vperm.xlu1 %4676, %v4100_v38   ;;  %4084 = vrot.lane.b32.xlu0 %v3977_v10, %s6735_s29  ;;  %v4747_v38 = vld [vmem:[%s6677_s22 + $0x14] ss:$8 sps:$4 sm:$0xff]  }
0x1441   : > { %4120 = vperm.xlu1 %4676, %v4102_v32   ;;  %4115 = vperm.xlu0 %4675, %v4101_v4  }
0x1445   : > { %4130 = vperm.xlu1 %4676, %v4104_v14   ;;  %4125 = vperm.xlu0 %4675, %v4103_v54   ;;  %v4750_v14 = vld [vmem:[%s6677_s22 + $0x24] ss:$8 sps:$4 sm:$0xff]   ;;  %v4752_v54 = vld [vmem:[%s6677_s22 + $0x20] ss:$8 sps:$4 sm:$0xff]  }
0x1449   : > { %4140 = vperm.xlu1 %4676, %v4106_v22   ;;  %4135 = vperm.xlu0 %4675, %v4105_v34   ;;  %v4753_v22 = vld [vmem:[%s6677_s22 + $0x34] ss:$8 sps:$4 sm:$0xff]   ;;  %v4755_v34 = vld [vmem:[%s6677_s22 + $0x30] ss:$8 sps:$4 sm:$0xff]  }
0x144d   : > { %4145 = vperm.xlu0 %4675, %v4107_v0  }
0x146f   : > { %v3981_v23 = vpop.permute.xlu1 %3980 }
0x1473   : > { %v3995_v45 = vpop.permute.xlu1 %3994  ;;  %v3987_v61 = vpop.permute.xlu0 %3986 }
0x1477   : > { %v4009_v37 = vpop.permute.xlu1 %4008  ;;  %v4001_v56 = vpop.permute.xlu0 %4000 }
0x147b   : > { %v4023_v11 = vpop.permute.xlu1 %4022  ;;  %v4015_v1 = vpop.permute.xlu0 %4014 }
0x147f   : > { %v4037_v5 = vpop.permute.xlu1 %4036  ;;  %v4029_v8 = vpop.permute.xlu0 %4028 }
0x1483   : > { %v4051_v62 = vpop.permute.xlu1 %4050  ;;  %v4043_v29 = vpop.permute.xlu0 %4042 }
0x1487   : > { %v6561_v48 = vpop.permute.xlu1 %4064  ;;  %v4057_v39 = vpop.permute.xlu0 %4056 }
0x148b   : > { %v3983_v53 = vpop.permute.xlu1 %3982  ;;  %v4071_v43 = vpop.permute.xlu0 %4070 }
0x148c   : > { %v3988_v41 = vsel %vm802_vm1, %v3981_v23, %v3983_v53 }
0x148f   : > { %v3997_v40 = vpop.permute.xlu1 %3996  ;;  %v3985_v51 = vpop.permute.xlu0 %3984 }
0x1490   : > { %v3990_v42 = vsel %vm802_vm1, %v3985_v51, %v3987_v61  ;;  %v3989_v52 = vsel %vm802_vm1, %v3983_v53, %v3985_v51  ;;  %v4002_v57 = vsel %vm821_vm11, %v3995_v45, %v3997_v40 }
0x1491   : > { %4198 = vmatprep.subr.bf16.mxu0 %v3989_v52  ;;  %4272 = vmatpush1.bf16.msra.mxu1 %v3990_v42 }
0x1492   : > { %4199 = vmatpush1.bf16.msra.mxu0 %v3988_v41  ;;  %4273 = vmatprep.subr.bf16.mxu1 %v4773_v20 }
0x1493   : > { %v4011_v2 = vpop.permute.xlu1 %4010  ;;  %v3999_v49 = vpop.permute.xlu0 %3998 }
0x1494   : > { %v4004_v44 = vsel %vm821_vm11, %v3999_v49, %v4001_v56  ;;  %v4003_v16 = vsel %vm821_vm11, %v3997_v40, %v3999_v49  ;;  %v4016_v58 = vsel %vm845_vm4, %v4009_v37, %v4011_v2 }
0x1495   : > { %4200 = vmatprep.subr.bf16.mxu0 %v4003_v16  ;;  %4274 = vmatpush1.bf16.msra.mxu1 %v4004_v44 }
0x1496   : > { %4201 = vmatpush1.bf16.msra.mxu0 %v4002_v57  ;;  %4275 = vmatprep.subr.bf16.mxu1 %v4773_v20 }
0x1497   : > { %v4025_v12 = vpop.permute.xlu1 %4024  ;;  %v4013_v18 = vpop.permute.xlu0 %4012 }
0x1498   : > { %v4018_v31 = vsel %vm845_vm4, %v4013_v18, %v4015_v1  ;;  %v4017_v55 = vsel %vm845_vm4, %v4011_v2, %v4013_v18  ;;  %v4030_v59 = vsel %vm870_vm8, %v4023_v11, %v4025_v12 }
0x1499   : > { %4202 = vmatprep.subr.bf16.mxu0 %v4017_v55  ;;  %4276 = vmatpush1.bf16.msra.mxu1 %v4018_v31 }
0x149a   : > { %4203 = vmatpush1.bf16.msra.mxu0 %v4016_v58  ;;  %4277 = vmatprep.subr.bf16.mxu1 %v4773_v20 }
0x149b   : > { %v4039_v46 = vpop.permute.xlu1 %4038  ;;  %v4027_v33 = vpop.permute.xlu0 %4026 }
0x149c   : > { %v4032_v15 = vsel %vm870_vm8, %v4027_v33, %v4029_v8  ;;  %v4031_v60 = vsel %vm870_vm8, %v4025_v12, %v4027_v33  ;;  %v4044_v28 = vsel %vm898_vm14, %v4037_v5, %v4039_v46 }
0x149d   : > { %4204 = vmatprep.subr.bf16.mxu0 %v4031_v60  ;;  %4278 = vmatpush1.bf16.msra.mxu1 %v4032_v15 }
0x149e   : > { %4205 = vmatpush1.bf16.msra.mxu0 %v4030_v59  ;;  %4279 = vmatprep.subr.bf16.mxu1 %v4773_v20 }
0x149f   : > { %v4053_v47 = vpop.permute.xlu1 %4052  ;;  %v4041_v36 = vpop.permute.xlu0 %4040 }
0x14a0   : > { %v4046_v7 = vsel %vm898_vm14, %v4041_v36, %v4043_v29  ;;  %v4045_v3 = vsel %vm898_vm14, %v4039_v46, %v4041_v36  ;;  %v4058_v21 = vsel %vm920_vm3, %v4051_v62, %v4053_v47 }
0x14a1   : > { %4206 = vmatprep.subr.bf16.mxu0 %v4045_v3  ;;  %4280 = vmatpush1.bf16.msra.mxu1 %v4046_v7 }
0x14a2   : > { %4207 = vmatpush1.bf16.msra.mxu0 %v4044_v28  ;;  %4281 = vmatprep.subr.bf16.mxu1 %v4773_v20 }
0x14a3   : > { %v4067_v25 = vpop.permute.xlu1 %4066  ;;  %v4055_v17 = vpop.permute.xlu0 %4054 }
0x14a4   : > { %v4060_v24 = vsel %vm920_vm3, %v4055_v17, %v4057_v39  ;;  %v4059_v63 = vsel %vm920_vm3, %v4053_v47, %v4055_v17  ;;  %v4072_v50 = vsel %vm944_vm6, %v6561_v48, %v4067_v25 }
0x14a5   : > { %4208 = vmatprep.subr.bf16.mxu0 %v4059_v63  ;;  %4282 = vmatpush1.bf16.msra.mxu1 %v4060_v24 }
0x14a6   : > { %4209 = vmatpush1.bf16.msra.mxu0 %v4058_v21  ;;  %4283 = vmatprep.subr.bf16.mxu1 %v4773_v20 }
0x14a7   : > { %v4081_v26 = vpop.permute.xlu1 %4080  ;;  %v4069_v30 = vpop.permute.xlu0 %4068 }
0x14a8   : > { %v4074_v6 = vsel %vm944_vm6, %v4069_v30, %v4071_v43  ;;  %v4073_v13 = vsel %vm944_vm6, %v4067_v25, %v4069_v30 }
0x14a9   : > { %4210 = vmatprep.subr.bf16.mxu0 %v4073_v13  ;;  %4284 = vmatpush1.bf16.msra.mxu1 %v4074_v6 }
0x14aa   : > { %4211 = vmatpush1.bf16.msra.mxu0 %v4072_v50  ;;  %4285 = vmatprep.subr.bf16.mxu1 %v4773_v20  ;;  %v4749_v20 = vld [vmem:[%s6677_s22 + $0x10] ss:$8 sps:$4 sm:$0xff]  }
0x14ab   : > { %v4079_v9 = vpop.permute.xlu1 %4078  ;;  %v4083_v19 = vpop.permute.xlu0 %4082 }
0x14ac   : > { %v4086_v27 = vsel %vm960_vm13, %v4079_v9, %v4081_v26  ;;  %v4087_v10 = vsel %vm960_vm13, %v4081_v26, %v4083_v19 }
0x14ad   : > { %4212 = vmatprep.subr.bf16.mxu0 %v4087_v10 }
0x14ae   : > { %4213 = vmatpush1.bf16.msra.mxu0 %v4086_v27 }
0x14af   : > { %v4085_v32 = vpop.permute.xlu0 %4084 }
0x14b0   : > { %v4088_v4 = vsel %vm960_vm13, %v4083_v19, %v4085_v32 }
0x14b1   : > { %4229 = vmatmul.mubr.bf16.vlgmr.msra.gmra.mrb[44].mxu0 %v4746_v35  ;;  %4286 = vmatpush1.bf16.msra.mxu1 %v4088_v4 }
0x14b2   : > { %4479 = vmatprep.mubr.msk.bf16.mxu0 %vm1336_vm7, %v4747_v38 }
0x14b4   : > { %4302 = vmatmul.mubr.bf16.vlgmr.msra.gmra.mrb[48].mxu1 %v4746_v35 }
0x14b5   : > { %4483 = vmatprep.mubr.msk.bf16.mxu1 %vm1336_vm7, %v4747_v38 }
0x14b9   : > { %4239 = vmatmul.mubr.bf16.gmra.mrb[48].mxu0 %v4749_v20 }
0x14ba   : > { %4480 = vmatprep.mubr.msk.bf16.mxu0 %vm1336_vm7, %v4750_v14 }
0x14bc   : > { %4310 = vmatmul.mubr.bf16.gmra.mrb[52].mxu1 %v4749_v20  ;;  %v4111_v0 = vpop.permute.xlu1 %4110 }
0x14bd   : > { %4484 = vmatprep.mubr.msk.bf16.mxu1 %vm1336_vm7, %v4750_v14 }
0x14c0   : > { %v4116_v37 = vpop.permute.xlu0 %4115  ;;  %v4121_v40 = vpop.permute.xlu1 %4120 }
0x14c1   : > { %4249 = vmatmul.mubr.bf16.gmra.mrb[52].mxu0 %v4752_v54 }
0x14c2   : > { %4481 = vmatprep.mubr.msk.bf16.mxu0 %vm1336_vm7, %v4753_v22 }
0x14c4   : > { %4318 = vmatmul.mubr.bf16.gmra.mrb[56].mxu1 %v4752_v54  ;;  %v4126_v41 = vpop.permute.xlu0 %4125  ;;  %v4131_v33 = vpop.permute.xlu1 %4130 }
0x14c5   : > { %4485 = vmatprep.mubr.msk.bf16.mxu1 %vm1336_vm7, %v4753_v22 }
0x14c8   : > { %v4136_v47 = vpop.permute.xlu0 %4135  ;;  %v4141_v6 = vpop.permute.xlu1 %4140 }
0x14c9   : > { %4259 = vmatmul.mubr.bf16.gmra.mrb[56].mxu0 %v4755_v34 }
0x14cc   : > { %4326 = vmatmul.mubr.bf16.gmra.mrb[60].mxu1 %v4755_v34  ;;  %v4146_v19 = vpop.permute.xlu0 %4145 }
0x1584   : > { %v4230_v23 = vpop.f32.mrb[44].mxu0 }
0x1585   : > { %v4231_v45 = vadd.f32 %v4230_v23, %v4111_v0  ;;  %v4232_v61 = vpop.f32.mrb[45].mxu0 }
0x1586   : > { %v4233_v56 = vadd.f32 %v4232_v61, %v4111_v0  ;;  %v4234_v11 = vpop.f32.mrb[46].mxu0 }
0x1587   : > { %4334 = vst [vmem:[%s6626_s30] sm:$0xff] %v4231_v45  ;;  %v4235_v1 = vadd.f32 %v4234_v11, %v4116_v37  ;;  %v4236_v5 = vpop.f32.mrb[47].mxu0  ;;  %v4303_v8 = vpop.f32.mrb[48].mxu1 }
0x1588   : > { %4335 = vst [vmem:[%s6626_s30 + $0x8] sm:$0xff] %v4233_v56  ;;  %v4237_v62 = vadd.f32 %v4236_v5, %v4116_v37  ;;  %v4304_v29 = vadd.f32 %v4303_v8, %v4111_v0  ;;  %v4305_v48 = vpop.f32.mrb[49].mxu1 }
0x1589   : > { %4337 = vst [vmem:[%s6626_s30 + $0x18] sm:$0xff] %v4235_v1  ;;  %v4306_v39 = vpop.f32.mrb[50].mxu1 }
0x158a   : > { %4338 = vst [vmem:[%s6626_s30 + $0x20] sm:$0xff] %v4237_v62  ;;  %4336 = vst [vmem:[%s6626_s30 + $0x10] sm:$0xff] %v4304_v29  ;;  %v4307_v53 = vadd.f32 %v4306_v39, %v4116_v37  ;;  %v4308_v43 = vpop.f32.mrb[51].mxu1 }
0x158c   : > { %4339 = vst [vmem:[%s6626_s30 + $0x28] sm:$0xff] %v4307_v53  ;;  %v4240_v51 = vpop.f32.mrb[48].mxu0 }
0x158d   : > { %v4241_v42 = vadd.f32 %v4240_v51, %v4121_v40  ;;  %v4242_v52 = vpop.f32.mrb[49].mxu0 }
0x158e   : > { %v4243_v2 = vadd.f32 %v4242_v52, %v4121_v40  ;;  %v4244_v49 = vpop.f32.mrb[50].mxu0 }
0x158f   : > { %4340 = vst [vmem:[%s6626_s30 + $0x30] sm:$0xff] %v4241_v42  ;;  %v4245_v44 = vadd.f32 %v4244_v49, %v4126_v41  ;;  %v4246_v16 = vpop.f32.mrb[51].mxu0  ;;  %v4311_v57 = vpop.f32.mrb[52].mxu1 }
0x1590   : > { %4341 = vst [vmem:[%s6626_s30 + $0x38] sm:$0xff] %v4243_v2  ;;  %v4247_v12 = vadd.f32 %v4246_v16, %v4126_v41  ;;  %v4312_v18 = vadd.f32 %v4311_v57, %v4121_v40  ;;  %v4313_v31 = vpop.f32.mrb[53].mxu1 }
0x1591   : > { %4343 = vst [vmem:[%s6626_s30 + $0x48] sm:$0xff] %v4245_v44  ;;  %v4314_v55 = vpop.f32.mrb[54].mxu1 }
0x1592   : > { %4344 = vst [vmem:[%s6626_s30 + $0x50] sm:$0xff] %v4247_v12  ;;  %4342 = vst [vmem:[%s6626_s30 + $0x40] sm:$0xff] %v4312_v18  ;;  %v4315_v58 = vadd.f32 %v4314_v55, %v4126_v41  ;;  %v4316_v46 = vpop.f32.mrb[55].mxu1 }
0x1594   : > { %4345 = vst [vmem:[%s6626_s30 + $0x58] sm:$0xff] %v4315_v58  ;;  %v4250_v15 = vpop.f32.mrb[52].mxu0 }
0x1595   : > { %v4251_v60 = vadd.f32 %v4250_v15, %v4131_v33  ;;  %v4252_v59 = vpop.f32.mrb[53].mxu0 }
0x1596   : > { %v4253_v36 = vadd.f32 %v4252_v59, %v4131_v33  ;;  %v4254_v7 = vpop.f32.mrb[54].mxu0 }
0x1597   : > { %4346 = vst [vmem:[%s6626_s30 + $0x60] sm:$0xff] %v4251_v60  ;;  %v4255_v3 = vadd.f32 %v4254_v7, %v4136_v47  ;;  %v4256_v28 = vpop.f32.mrb[55].mxu0  ;;  %v4319_v25 = vpop.f32.mrb[56].mxu1 }
0x1598   : > { %4347 = vst [vmem:[%s6626_s30 + $0x68] sm:$0xff] %v4253_v36  ;;  %v4257_v17 = vadd.f32 %v4256_v28, %v4136_v47  ;;  %v4320_v24 = vadd.f32 %v4319_v25, %v4131_v33  ;;  %v4321_v63 = vpop.f32.mrb[57].mxu1 }
0x1599   : > { %4349 = vst [vmem:[%s6626_s30 + $0x78] sm:$0xff] %v4255_v3  ;;  %v4322_v21 = vpop.f32.mrb[58].mxu1 }
0x159a   : > { %4350 = vst [vmem:[%s6626_s30 + $0x80] sm:$0xff] %v4257_v17  ;;  %4348 = vst [vmem:[%s6626_s30 + $0x70] sm:$0xff] %v4320_v24  ;;  %v4323_v26 = vadd.f32 %v4322_v21, %v4136_v47  ;;  %v4324_v30 = vpop.f32.mrb[59].mxu1 }
0x159c   : > { %4351 = vst [vmem:[%s6626_s30 + $0x88] sm:$0xff] %v4323_v26  ;;  %v4260_v13 = vpop.f32.mrb[56].mxu0 }
0x159d   : > { %v4261_v50 = vadd.f32 %v4260_v13, %v4141_v6  ;;  %v4262_v9 = vpop.f32.mrb[57].mxu0 }
0x159e   : > { %v4263_v27 = vadd.f32 %v4262_v9, %v4141_v6  ;;  %v4264_v10 = vpop.f32.mrb[58].mxu0 }
0x159f   : > { %4352 = vst [vmem:[%s6626_s30 + $0x90] sm:$0xff] %v4261_v50  ;;  %v4265_v35 = vadd.f32 %v4264_v10, %v4146_v19  ;;  %v4266_v38 = vpop.f32.mrb[59].mxu0  ;;  %v4327_v32 = vpop.f32.mrb[60].mxu1 }
0x15a0   : > { %4353 = vst [vmem:[%s6626_s30 + $0x98] sm:$0xff] %v4263_v27  ;;  %v4267_v4 = vadd.f32 %v4266_v38, %v4146_v19  ;;  %v4328_v20 = vadd.f32 %v4327_v32, %v4141_v6  ;;  %v4329_v14 = vpop.f32.mrb[61].mxu1 }
0x15a1   : > { %4355 = vst [vmem:[%s6626_s30 + $0xa8] sm:$0xff] %v4265_v35  ;;  %v4330_v54 = vpop.f32.mrb[62].mxu1 }
0x15a2   : > { %4356 = vst [vmem:[%s6626_s30 + $0xb0] sm:$0xff] %v4267_v4  ;;  %4354 = vst [vmem:[%s6626_s30 + $0xa0] sm:$0xff] %v4328_v20  ;;  %v4331_v22 = vadd.f32 %v4330_v54, %v4146_v19  ;;  %v4332_v34 = vpop.f32.mrb[63].mxu1 }
0x15a4   : > { %4357 = vst [vmem:[%s6626_s30 + $0xb8] sm:$0xff] %v4331_v22 }
0x15a5 PF: > { %s34_s5 = sadd.s32 1, %s4762_s5  }
0x15a6   : > { %p31_p4 = scmp.ge.s32.totalorder %s34_s5, 4  }
0x15a8   :  { %33 = sbr.rel (!%p31_p4) target bundleno = 13 (0xd), region = 147 }

// kernel: rdn_forward.3
= control target key start
LH: loop header
LB: loop body
LE: loop exit
PB: predicated region body
PF: predicated region fallthrough
CT: control target
= control target key end

     0   :  { %s941_s12 = smov 0   ;;  %s1310_s0 = inlined_call_operand.vmem [shape: bf16[2,16,1280], index: 0, kind: input, shape index: {}]   ;;  %s1311_s1 = inlined_call_operand.vmem [shape: bf16[3,144], index: 1, kind: input, shape index: {}]   ;;  %s1312_s2 = inlined_call_operand.vmem [shape: f32[3,1], index: 2, kind: input, shape index: {}]   ;;  %s1313_s3 = inlined_call_operand.vmem [shape: f32[2,3,1152], index: 3, kind: output, shape index: {}]  }
   0x1 LB: > { %s844_s13 = sadd.s32 4294967295, %s910_s12   ;;  %p848_p0 = scmp.ge.s32.totalorder %s910_s12, 1  ;;  %s910_s12 = sphi %s941_s12, %s13_s12  }
   0x2   : > { %p137_p1 = scmp.lt.s32.totalorder %s910_s12, 3 }
   0x4   : > { %p138_p2 = pnand %p848_p0, %p137_p1 }
   0x5   : > { %p161_p3 = scmp.lt.s32.totalorder (!%p138_p2), %s844_s13, 1  ;;  %s912_s18 = smov (!%p138_p2), 127   ;;  %v985_v4 = vld.sshfl [vmem:[%s1311_s1] sm:$0x33 pattern:$0x76325410] (!%p138_p2) }
   0x6   : > { %141 = sbr.rel (%p138_p2) target bundleno = 512 (0x200), region = 32  ;;  %s913_s19 = smov (!%p138_p2), 126   ;;  %v989_v5 = vcombine.high (!%p138_p2), %v985_v4, %v985_v4  ;;  %vm560_vm0 = vcmask (!%p138_p2), 130048   ;;  %v920_v9 = vmov (!%p138_p2), 0   ;;  %vm251_vm1 = vcmask (!%p138_p2), 1039360  }
   0x7   : > { %s914_s20 = smov (!%p138_p2), 92   ;;  %s915_s21 = smov (!%p138_p2), 91   ;;  %888 = vset.pattern.permute.xlu0 (!%p138_p2), %v920_v9  ;;  %vm290_vm2 = vcmask (!%p138_p2), 1031168   ;;  %vm329_vm3 = vcmask (!%p138_p2), 752640   ;;  %vm368_vm4 = vcmask (!%p138_p2), 744448   ;;  %vm407_vm5 = vcmask (!%p138_p2), 736256  }
   0x8   : > { %s916_s22 = smov (!%p138_p2), 90   ;;  %s917_s23 = smov (!%p138_p2), 56   ;;  %862 = vmatprep.mubr.msk.bf16.mxu0 (!%p138_p2), %vm560_vm0, %v989_v5  ;;  %863 = vmatprep.mubr.msk.bf16.mxu1 (!%p138_p2), %vm560_vm0, %v989_v5  ;;  %vm446_vm6 = vcmask (!%p138_p2), 457728   ;;  %vm485_vm7 = vcmask (!%p138_p2), 449536   ;;  %vm524_vm8 = vcmask (!%p138_p2), 441344  }
   0x9   : > { %s918_s26 = smov (!%p138_p2), 55   ;;  %s919_s27 = smov (!%p138_p2), 54   ;;  %v544_v49 = vld [vmem:[%s1312_s2] sm:$0x7] (!%p138_p2) }
   0xd   : > { %s1315_s13 = smov (!%p161_p3, %s844_s13), 1 }
   0xe   : > { %s869_s14 = smul.u32 80, %s1315_s13 }
   0xf   : > { %s870_s30 = smul.u32 36, %s1315_s13 }
  0x10   : > { %s955_s17 = scalar_lea.vmem %s1310_s0, %s869_s14 }
  0x11   : > { %v889_v0 = vld [vmem:[%s955_s17 + $0x4] ss:$40 sps:$4 sm:$0xff]   ;;  %v891_v1 = vld [vmem:[%s955_s17] ss:$40 sps:$4 sm:$0xff]   ;;  %v1002_v6 = vld [vmem:[%s955_s17 + $0x10] ss:$40 sps:$4 sm:$0xff]   ;;  %s1300_s6 = scalar_lea.vmem %s1313_s3, %s870_s30 }
  0x12   : > { %233 = vrot.lane.b32.xlu0 %v889_v0, %s912_s18  ;;  %v892_v2 = vld [vmem:[%s955_s17 + $0x8] ss:$40 sps:$4 sm:$0xff]   ;;  %v962_v3 = vld [vmem:[%s955_s17 + $0xc] ss:$40 sps:$4 sm:$0xff]   ;;  %564 = vmatprep.subr.bf16.mxu0 %v889_v0  ;;  %v1012_v8 = vld [vmem:[%s955_s17 + $0x18] ss:$40 sps:$4 sm:$0xff]  }
  0x13   : > { %231 = vrot.lane.b32.xlu1 %v891_v1, %s912_s18  ;;  %565 = vmatpush1.bf16.msra.mxu0 %v891_v1  ;;  %v1007_v7 = vld [vmem:[%s955_s17 + $0x14] ss:$40 sps:$4 sm:$0xff]   ;;  %v1079_v11 = vld [vmem:[%s955_s17 + $0x20] ss:$40 sps:$4 sm:$0xff]   ;;  %v1084_v12 = vld [vmem:[%s955_s17 + $0x24] ss:$40 sps:$4 sm:$0xff]  }
  0x14   : > { %605 = vmatprep.subr.bf16.mxu1 %v962_v3  ;;  %v1074_v10 = vld [vmem:[%s955_s17 + $0x1c] ss:$40 sps:$4 sm:$0xff]  }
  0x15   : > { %606 = vmatpush1.bf16.msra.mxu1 %v892_v2 }
  0x16   : > { %235 = vrot.lane.b32.xlu0 %v892_v2, %s912_s18 }
  0x17   : > { %272 = vrot.lane.b32.xlu1 %v889_v0, %s913_s19 }
  0x1a   : > { %274 = vrot.lane.b32.xlu0 %v892_v2, %s913_s19 }
  0x1b   : > { %270 = vrot.lane.b32.xlu1 %v891_v1, %s913_s19 }
  0x1e   : > { %311 = vrot.lane.b32.xlu0 %v889_v0, %s914_s20 }
  0x1f   : > { %313 = vrot.lane.b32.xlu1 %v892_v2, %s914_s20 }
  0x22   : > { %309 = vrot.lane.b32.xlu0 %v891_v1, %s914_s20 }
  0x23   : > { %350 = vrot.lane.b32.xlu1 %v889_v0, %s915_s21 }
  0x26   : > { %352 = vrot.lane.b32.xlu0 %v892_v2, %s915_s21 }
  0x27   : > { %348 = vrot.lane.b32.xlu1 %v891_v1, %s915_s21 }
  0x2a   : > { %389 = vrot.lane.b32.xlu0 %v889_v0, %s916_s22 }
  0x2b   : > { %391 = vrot.lane.b32.xlu1 %v892_v2, %s916_s22 }
  0x2e   : > { %387 = vrot.lane.b32.xlu0 %v891_v1, %s916_s22 }
  0x2f   : > { %428 = vrot.lane.b32.xlu1 %v889_v0, %s917_s23 }
  0x32   : > { %430 = vrot.lane.b32.xlu0 %v892_v2, %s917_s23 }
  0x33   : > { %426 = vrot.lane.b32.xlu1 %v891_v1, %s917_s23 }
  0x36   : > { %467 = vrot.lane.b32.xlu0 %v889_v0, %s918_s26 }
  0x37   : > { %469 = vrot.lane.b32.xlu1 %v892_v2, %s918_s26 }
  0x3a   : > { %465 = vrot.lane.b32.xlu0 %v891_v1, %s918_s26 }
  0x3b   : > { %506 = vrot.lane.b32.xlu1 %v889_v0, %s919_s27 }
  0x3e   : > { %508 = vrot.lane.b32.xlu0 %v892_v2, %s919_s27 }
  0x3f   : > { %504 = vrot.lane.b32.xlu1 %v891_v1, %s919_s27 }
  0x42   : > { %237 = vrot.lane.b32.xlu0 %v962_v3, %s912_s18 }
  0x43   : > { %239 = vrot.lane.b32.xlu1 %v1002_v6, %s912_s18 }
  0x46   : > { %241 = vrot.lane.b32.xlu0 %v1007_v7, %s912_s18 }
  0x47   : > { %243 = vrot.lane.b32.xlu1 %v1012_v8, %s912_s18 }
  0x4a   : > { %276 = vrot.lane.b32.xlu0 %v962_v3, %s913_s19 }
  0x4b   : > { %278 = vrot.lane.b32.xlu1 %v1002_v6, %s913_s19 }
  0x4e   : > { %280 = vrot.lane.b32.xlu0 %v1007_v7, %s913_s19 }
  0x4f   : > { %282 = vrot.lane.b32.xlu1 %v1012_v8, %s913_s19 }
  0x52   : > { %315 = vrot.lane.b32.xlu0 %v962_v3, %s914_s20 }
  0x53   : > { %317 = vrot.lane.b32.xlu1 %v1002_v6, %s914_s20 }
  0x56   : > { %319 = vrot.lane.b32.xlu0 %v1007_v7, %s914_s20 }
  0x57   : > { %321 = vrot.lane.b32.xlu1 %v1012_v8, %s914_s20 }
  0x5a   : > { %354 = vrot.lane.b32.xlu0 %v962_v3, %s915_s21 }
  0x5b   : > { %356 = vrot.lane.b32.xlu1 %v1002_v6, %s915_s21 }
  0x5e   : > { %358 = vrot.lane.b32.xlu0 %v1007_v7, %s915_s21 }
  0x5f   : > { %360 = vrot.lane.b32.xlu1 %v1012_v8, %s915_s21 }
  0x62   : > { %393 = vrot.lane.b32.xlu0 %v962_v3, %s916_s22 }
  0x63   : > { %395 = vrot.lane.b32.xlu1 %v1002_v6, %s916_s22 }
  0x66   : > { %397 = vrot.lane.b32.xlu0 %v1007_v7, %s916_s22 }
  0x67   : > { %399 = vrot.lane.b32.xlu1 %v1012_v8, %s916_s22 }
  0x6a   : > { %432 = vrot.lane.b32.xlu0 %v962_v3, %s917_s23 }
  0x6b   : > { %434 = vrot.lane.b32.xlu1 %v1002_v6, %s917_s23 }
  0x6e   : > { %436 = vrot.lane.b32.xlu0 %v1007_v7, %s917_s23 }
  0x6f   : > { %438 = vrot.lane.b32.xlu1 %v1012_v8, %s917_s23 }
  0x72   : > { %471 = vrot.lane.b32.xlu0 %v962_v3, %s918_s26 }
  0x73   : > { %473 = vrot.lane.b32.xlu1 %v1002_v6, %s918_s26 }
  0x76   : > { %475 = vrot.lane.b32.xlu0 %v1007_v7, %s918_s26 }
  0x77   : > { %477 = vrot.lane.b32.xlu1 %v1012_v8, %s918_s26 }
  0x7a   : > { %510 = vrot.lane.b32.xlu0 %v962_v3, %s919_s27 }
  0x7b   : > { %512 = vrot.lane.b32.xlu1 %v1002_v6, %s919_s27 }
  0x7e   : > { %514 = vrot.lane.b32.xlu0 %v1007_v7, %s919_s27 }
  0x7f   : > { %516 = vrot.lane.b32.xlu1 %v1012_v8, %s919_s27 }
  0x82   : > { %245 = vrot.lane.b32.xlu0 %v1074_v10, %s912_s18 }
  0x83   : > { %247 = vrot.lane.b32.xlu1 %v1079_v11, %s912_s18 }
  0x84   : > { %v234_v13 = vpop.permute.xlu0 %233 }
  0x85   : > { %v232_v14 = vpop.permute.xlu1 %231 }
  0x86   : > { %249 = vrot.lane.b32.xlu0 %v1084_v12, %s912_s18  ;;  %v252_v18 = vsel %vm251_vm1, %v232_v14, %v234_v13 }
  0x87   : > { %284 = vrot.lane.b32.xlu1 %v1074_v10, %s913_s19 }
  0x88   : > { %v1092_v15 = vpop.permute.xlu0 %235 }
  0x89   : > { %v273_v16 = vpop.permute.xlu1 %272  ;;  %v253_v17 = vsel %vm251_vm1, %v234_v13, %v1092_v15 }
  0x8a   : > { %286 = vrot.lane.b32.xlu0 %v1079_v11, %s913_s19  ;;  %566 = vmatprep.subr.bf16.mxu0 %v253_v17 }
  0x8b   : > { %288 = vrot.lane.b32.xlu1 %v1084_v12, %s913_s19  ;;  %567 = vmatpush1.bf16.msra.mxu0 %v252_v18 }
  0x8c   : > { %v1101_v19 = vpop.permute.xlu0 %274 }
  0x8d   : > { %v271_v20 = vpop.permute.xlu1 %270  ;;  %v292_v21 = vsel %vm290_vm2, %v273_v16, %v1101_v19 }
  0x8e   : > { %323 = vrot.lane.b32.xlu0 %v1074_v10, %s914_s20  ;;  %568 = vmatprep.subr.bf16.mxu0 %v292_v21  ;;  %v291_v22 = vsel %vm290_vm2, %v271_v20, %v273_v16 }
  0x8f   : > { %325 = vrot.lane.b32.xlu1 %v1079_v11, %s914_s20  ;;  %569 = vmatpush1.bf16.msra.mxu0 %v291_v22 }
  0x90   : > { %v312_v23 = vpop.permute.xlu0 %311 }
  0x91   : > { %v1110_v24 = vpop.permute.xlu1 %313 }
  0x92   : > { %327 = vrot.lane.b32.xlu0 %v1084_v12, %s914_s20  ;;  %v331_v25 = vsel %vm329_vm3, %v312_v23, %v1110_v24 }
  0x93   : > { %362 = vrot.lane.b32.xlu1 %v1074_v10, %s915_s21  ;;  %570 = vmatprep.subr.bf16.mxu0 %v331_v25 }
  0x94   : > { %v310_v26 = vpop.permute.xlu0 %309 }
  0x95   : > { %v351_v27 = vpop.permute.xlu1 %350  ;;  %v330_v28 = vsel %vm329_vm3, %v310_v26, %v312_v23 }
  0x96   : > { %364 = vrot.lane.b32.xlu0 %v1079_v11, %s915_s21  ;;  %571 = vmatpush1.bf16.msra.mxu0 %v330_v28 }
  0x97   : > { %366 = vrot.lane.b32.xlu1 %v1084_v12, %s915_s21 }
  0x98   : > { %v1123_v29 = vpop.permute.xlu0 %352 }
  0x99   : > { %v349_v30 = vpop.permute.xlu1 %348  ;;  %v370_v31 = vsel %vm368_vm4, %v351_v27, %v1123_v29 }
  0x9a   : > { %401 = vrot.lane.b32.xlu0 %v1074_v10, %s916_s22  ;;  %572 = vmatprep.subr.bf16.mxu0 %v370_v31  ;;  %v369_v32 = vsel %vm368_vm4, %v349_v30, %v351_v27 }
  0x9b   : > { %403 = vrot.lane.b32.xlu1 %v1079_v11, %s916_s22  ;;  %573 = vmatpush1.bf16.msra.mxu0 %v369_v32 }
  0x9c   : > { %v390_v33 = vpop.permute.xlu0 %389 }
  0x9d   : > { %v1132_v34 = vpop.permute.xlu1 %391 }
  0x9e   : > { %405 = vrot.lane.b32.xlu0 %v1084_v12, %s916_s22  ;;  %v409_v35 = vsel %vm407_vm5, %v390_v33, %v1132_v34 }
  0x9f   : > { %440 = vrot.lane.b32.xlu1 %v1074_v10, %s917_s23  ;;  %574 = vmatprep.subr.bf16.mxu0 %v409_v35 }
  0xa0   : > { %v388_v36 = vpop.permute.xlu0 %387 }
  0xa1   : > { %v429_v37 = vpop.permute.xlu1 %428  ;;  %v408_v38 = vsel %vm407_vm5, %v388_v36, %v390_v33 }
  0xa2   : > { %442 = vrot.lane.b32.xlu0 %v1079_v11, %s917_s23  ;;  %575 = vmatpush1.bf16.msra.mxu0 %v408_v38 }
  0xa3   : > { %444 = vrot.lane.b32.xlu1 %v1084_v12, %s917_s23 }
  0xa4   : > { %v1145_v39 = vpop.permute.xlu0 %430 }
  0xa5   : > { %v427_v40 = vpop.permute.xlu1 %426  ;;  %v448_v41 = vsel %vm446_vm6, %v429_v37, %v1145_v39 }
  0xa6   : > { %479 = vrot.lane.b32.xlu0 %v1074_v10, %s918_s26  ;;  %576 = vmatprep.subr.bf16.mxu0 %v448_v41  ;;  %v447_v42 = vsel %vm446_vm6, %v427_v40, %v429_v37 }
  0xa7   : > { %481 = vrot.lane.b32.xlu1 %v1079_v11, %s918_s26  ;;  %577 = vmatpush1.bf16.msra.mxu0 %v447_v42 }
  0xa8   : > { %v468_v43 = vpop.permute.xlu0 %467 }
  0xa9   : > { %v1154_v44 = vpop.permute.xlu1 %469 }
  0xaa   : > { %483 = vrot.lane.b32.xlu0 %v1084_v12, %s918_s26  ;;  %v487_v45 = vsel %vm485_vm7, %v468_v43, %v1154_v44 }
  0xab   : > { %518 = vrot.lane.b32.xlu1 %v1074_v10, %s919_s27  ;;  %578 = vmatprep.subr.bf16.mxu0 %v487_v45 }
  0xac   : > { %v466_v46 = vpop.permute.xlu0 %465 }
  0xad   : > { %v507_v47 = vpop.permute.xlu1 %506  ;;  %v486_v48 = vsel %vm485_vm7, %v466_v46, %v468_v43 }
  0xae   : > { %520 = vrot.lane.b32.xlu0 %v1079_v11, %s919_s27  ;;  %579 = vmatpush1.bf16.msra.mxu0 %v486_v48 }
  0xaf   : > { %522 = vrot.lane.b32.xlu1 %v1084_v12, %s919_s27 }
  0xb0   : > { %v1170_v50 = vpop.permute.xlu0 %508 }
  0xb1   : > { %v505_v51 = vpop.permute.xlu1 %504  ;;  %v526_v52 = vsel %vm524_vm8, %v507_v47, %v1170_v50 }
  0xb2   : > { %580 = vmatprep.subr.bf16.mxu0 %v526_v52  ;;  %v525_v53 = vsel %vm524_vm8, %v505_v51, %v507_v47  ;;  %547 = vperm.xlu0 %888, %v544_v49  }
  0xb3   : > { %581 = vmatpush1.bf16.msra.mxu0 %v525_v53 }
  0xb4   : > { %v238_v54 = vpop.permute.xlu0 %237  ;;  %646 = vmatprep.subr.bf16.mxu0 %v1007_v7 }
  0xb5   : > { %v240_v55 = vpop.permute.xlu1 %239  ;;  %v254_v56 = vsel %vm251_vm1, %v1092_v15, %v238_v54 }
  0xb6   : > { %v255_v57 = vsel %vm251_vm1, %v238_v54, %v240_v55  ;;  %597 = vmatmul.mubr.bf16.vlgmr.msra.gmra.mrb[0].mxu0 %v985_v4 }
  0xb7   : > { %607 = vmatprep.subr.bf16.mxu1 %v255_v57  ;;  %647 = vmatpush1.bf16.msra.mxu0 %v1002_v6 }
  0xb8   : > { %608 = vmatpush1.bf16.msra.mxu1 %v254_v56  ;;  %v242_v58 = vpop.permute.xlu0 %241  ;;  %864 = vmatprep.mubr.msk.bf16.mxu0 %vm560_vm0, %v989_v5 }
  0xb9   : > { %v256_v59 = vsel %vm251_vm1, %v240_v55, %v242_v58  ;;  %v1184_v60 = vpop.permute.xlu1 %243 }
  0xba   : > { %v257_v61 = vsel %vm251_vm1, %v242_v58, %v1184_v60 }
  0xbb   : > { %648 = vmatprep.subr.bf16.mxu0 %v257_v61 }
  0xbc   : > { %649 = vmatpush1.bf16.msra.mxu0 %v256_v59  ;;  %v277_v62 = vpop.permute.xlu0 %276 }
  0xbd   : > { %v279_v63 = vpop.permute.xlu1 %278  ;;  %v293_v0 = vsel %vm290_vm2, %v1101_v19, %v277_v62 }
  0xbe   : > { %v294_v1 = vsel %vm290_vm2, %v277_v62, %v279_v63 }
  0xbf   : > { %609 = vmatprep.subr.bf16.mxu1 %v294_v1 }
  0xc0   : > { %610 = vmatpush1.bf16.msra.mxu1 %v293_v0  ;;  %v281_v2 = vpop.permute.xlu0 %280 }
  0xc1   : > { %v295_v3 = vsel %vm290_vm2, %v279_v63, %v281_v2  ;;  %v1192_v6 = vpop.permute.xlu1 %282 }
  0xc2   : > { %v296_v7 = vsel %vm290_vm2, %v281_v2, %v1192_v6 }
  0xc3   : > { %650 = vmatprep.subr.bf16.mxu0 %v296_v7 }
  0xc4   : > { %651 = vmatpush1.bf16.msra.mxu0 %v295_v3  ;;  %v316_v12 = vpop.permute.xlu0 %315 }
  0xc5   : > { %v318_v13 = vpop.permute.xlu1 %317  ;;  %v332_v14 = vsel %vm329_vm3, %v1110_v24, %v316_v12 }
  0xc6   : > { %v333_v15 = vsel %vm329_vm3, %v316_v12, %v318_v13 }
  0xc7   : > { %611 = vmatprep.subr.bf16.mxu1 %v333_v15 }
  0xc8   : > { %612 = vmatpush1.bf16.msra.mxu1 %v332_v14  ;;  %v320_v16 = vpop.permute.xlu0 %319 }
  0xc9   : > { %v334_v17 = vsel %vm329_vm3, %v318_v13, %v320_v16  ;;  %v1200_v18 = vpop.permute.xlu1 %321 }
  0xca   : > { %v335_v19 = vsel %vm329_vm3, %v320_v16, %v1200_v18 }
  0xcb   : > { %652 = vmatprep.subr.bf16.mxu0 %v335_v19 }
  0xcc   : > { %653 = vmatpush1.bf16.msra.mxu0 %v334_v17  ;;  %v355_v20 = vpop.permute.xlu0 %354 }
  0xcd   : > { %v357_v21 = vpop.permute.xlu1 %356  ;;  %v371_v22 = vsel %vm368_vm4, %v1123_v29, %v355_v20 }
  0xce   : > { %v372_v23 = vsel %vm368_vm4, %v355_v20, %v357_v21 }
  0xcf   : > { %613 = vmatprep.subr.bf16.mxu1 %v372_v23 }
  0xd0   : > { %614 = vmatpush1.bf16.msra.mxu1 %v371_v22  ;;  %v359_v24 = vpop.permute.xlu0 %358 }
  0xd1   : > { %v373_v25 = vsel %vm368_vm4, %v357_v21, %v359_v24  ;;  %v1208_v26 = vpop.permute.xlu1 %360 }
  0xd2   : > { %v374_v27 = vsel %vm368_vm4, %v359_v24, %v1208_v26 }
  0xd3   : > { %654 = vmatprep.subr.bf16.mxu0 %v374_v27 }
  0xd4   : > { %655 = vmatpush1.bf16.msra.mxu0 %v373_v25  ;;  %v394_v28 = vpop.permute.xlu0 %393 }
  0xd5   : > { %v396_v30 = vpop.permute.xlu1 %395  ;;  %v410_v31 = vsel %vm407_vm5, %v1132_v34, %v394_v28 }
  0xd6   : > { %v411_v29 = vsel %vm407_vm5, %v394_v28, %v396_v30 }
  0xd7   : > { %615 = vmatprep.subr.bf16.mxu1 %v411_v29 }
  0xd8   : > { %616 = vmatpush1.bf16.msra.mxu1 %v410_v31  ;;  %v398_v32 = vpop.permute.xlu0 %397 }
  0xd9   : > { %v412_v33 = vsel %vm407_vm5, %v396_v30, %v398_v32  ;;  %v1216_v35 = vpop.permute.xlu1 %399 }
  0xda   : > { %v413_v36 = vsel %vm407_vm5, %v398_v32, %v1216_v35 }
  0xdb   : > { %656 = vmatprep.subr.bf16.mxu0 %v413_v36 }
  0xdc   : > { %657 = vmatpush1.bf16.msra.mxu0 %v412_v33  ;;  %v433_v37 = vpop.permute.xlu0 %432 }
  0xdd   : > { %v435_v38 = vpop.permute.xlu1 %434  ;;  %v449_v40 = vsel %vm446_vm6, %v1145_v39, %v433_v37 }
  0xde   : > { %v450_v34 = vsel %vm446_vm6, %v433_v37, %v435_v38 }
  0xdf   : > { %617 = vmatprep.subr.bf16.mxu1 %v450_v34 }
  0xe0   : > { %618 = vmatpush1.bf16.msra.mxu1 %v449_v40  ;;  %v437_v41 = vpop.permute.xlu0 %436 }
  0xe1   : > { %v451_v42 = vsel %vm446_vm6, %v435_v38, %v437_v41  ;;  %v1224_v43 = vpop.permute.xlu1 %438 }
  0xe2   : > { %v452_v45 = vsel %vm446_vm6, %v437_v41, %v1224_v43 }
  0xe3   : > { %658 = vmatprep.subr.bf16.mxu0 %v452_v45 }
  0xe4   : > { %659 = vmatpush1.bf16.msra.mxu0 %v451_v42  ;;  %v472_v46 = vpop.permute.xlu0 %471 }
  0xe5   : > { %v474_v47 = vpop.permute.xlu1 %473  ;;  %v488_v48 = vsel %vm485_vm7, %v1154_v44, %v472_v46 }
  0xe6   : > { %v489_v39 = vsel %vm485_vm7, %v472_v46, %v474_v47 }
  0xe7   : > { %619 = vmatprep.subr.bf16.mxu1 %v489_v39 }
  0xe8   : > { %620 = vmatpush1.bf16.msra.mxu1 %v488_v48  ;;  %v476_v49 = vpop.permute.xlu0 %475 }
  0xe9   : > { %v490_v51 = vsel %vm485_vm7, %v474_v47, %v476_v49  ;;  %v1232_v52 = vpop.permute.xlu1 %477 }
  0xea   : > { %v491_v53 = vsel %vm485_vm7, %v476_v49, %v1232_v52 }
  0xeb   : > { %660 = vmatprep.subr.bf16.mxu0 %v491_v53 }
  0xec   : > { %661 = vmatpush1.bf16.msra.mxu0 %v490_v51  ;;  %v511_v54 = vpop.permute.xlu0 %510 }
  0xed   : > { %v513_v55 = vpop.permute.xlu1 %512  ;;  %v527_v56 = vsel %vm524_vm8, %v1170_v50, %v511_v54 }
  0xee   : > { %v528_v44 = vsel %vm524_vm8, %v511_v54, %v513_v55 }
  0xef   : > { %621 = vmatprep.subr.bf16.mxu1 %v528_v44 }
  0xf0   : > { %622 = vmatpush1.bf16.msra.mxu1 %v527_v56  ;;  %v515_v57 = vpop.permute.xlu0 %514 }
  0xf1   : > { %v529_v58 = vsel %vm524_vm8, %v513_v55, %v515_v57  ;;  %v1240_v59 = vpop.permute.xlu1 %516  ;;  %687 = vmatprep.subr.bf16.mxu1 %v1074_v10 }
  0xf2   : > { %v530_v61 = vsel %vm524_vm8, %v515_v57, %v1240_v59 }
  0xf3   : > { %662 = vmatprep.subr.bf16.mxu0 %v530_v61  ;;  %638 = vmatmul.mubr.bf16.vlgmr.msra.gmra.mrb[0].mxu1 %v985_v4 }
  0xf4   : > { %663 = vmatpush1.bf16.msra.mxu0 %v529_v58  ;;  %688 = vmatpush1.bf16.msra.mxu1 %v1012_v8  ;;  %v246_v50 = vpop.permute.xlu0 %245 }
  0xf5   : > { %v258_v62 = vsel %vm251_vm1, %v1184_v60, %v246_v50  ;;  %v248_v63 = vpop.permute.xlu1 %247  ;;  %728 = vmatprep.subr.bf16.mxu0 %v920_v9  ;;  %865 = vmatprep.mubr.msk.bf16.mxu1 %vm560_vm0, %v989_v5 }
  0xf6   : > { %v259_v10 = vsel %vm251_vm1, %v246_v50, %v248_v63 }
  0xf7   : > { %689 = vmatprep.subr.bf16.mxu1 %v259_v10  ;;  %679 = vmatmul.mubr.bf16.vlgmr.msra.gmra.mrb[4].mxu0 %v985_v4 }
  0xf8   : > { %690 = vmatpush1.bf16.msra.mxu1 %v258_v62  ;;  %729 = vmatpush1.bf16.msra.mxu0 %v1079_v11  ;;  %v250_v0 = vpop.permute.xlu0 %249 }
  0xf9   : > { %v260_v8 = vsel %vm251_vm1, %v248_v63, %v250_v0  ;;  %v285_v1 = vpop.permute.xlu1 %284  ;;  %730 = vmatprep.subr.bf16.mxu0 %v920_v9  ;;  %866 = vmatprep.mubr.msk.bf16.mxu0 %vm560_vm0, %v989_v5 }
  0xfa   : > { %v297_v7 = vsel %vm290_vm2, %v1192_v6, %v285_v1 }
  0xfc   : > { %731 = vmatpush1.bf16.msra.mxu0 %v260_v8  ;;  %v287_v60 = vpop.permute.xlu0 %286 }
  0xfd   : > { %v289_v2 = vpop.permute.xlu1 %288  ;;  %v298_v3 = vsel %vm290_vm2, %v285_v1, %v287_v60  ;;  %732 = vmatprep.subr.bf16.mxu0 %v920_v9 }
  0xfe   : > { %v299_v11 = vsel %vm290_vm2, %v287_v60, %v289_v2  ;;  %691 = vmatprep.subr.bf16.mxu1 %v298_v3 }
  0xff   : > { %692 = vmatpush1.bf16.msra.mxu1 %v297_v7 }
 0x100   : > { %733 = vmatpush1.bf16.msra.mxu0 %v299_v11  ;;  %v324_v12 = vpop.permute.xlu0 %323 }
 0x101   : > { %v336_v13 = vsel %vm329_vm3, %v1200_v18, %v324_v12  ;;  %v326_v5 = vpop.permute.xlu1 %325  ;;  %734 = vmatprep.subr.bf16.mxu0 %v920_v9 }
 0x102   : > { %v337_v14 = vsel %vm329_vm3, %v324_v12, %v326_v5 }
 0x103   : > { %693 = vmatprep.subr.bf16.mxu1 %v337_v14 }
 0x104   : > { %694 = vmatpush1.bf16.msra.mxu1 %v336_v13  ;;  %v328_v15 = vpop.permute.xlu0 %327 }
 0x105   : > { %v338_v16 = vsel %vm329_vm3, %v326_v5, %v328_v15  ;;  %v363_v6 = vpop.permute.xlu1 %362 }
 0x106   : > { %735 = vmatpush1.bf16.msra.mxu0 %v338_v16  ;;  %v375_v18 = vsel %vm368_vm4, %v1208_v26, %v363_v6 }
 0x107   : > { %736 = vmatprep.subr.bf16.mxu0 %v920_v9 }
 0x108   : > { %v365_v17 = vpop.permute.xlu0 %364 }
 0x109   : > { %v367_v19 = vpop.permute.xlu1 %366  ;;  %v376_v20 = vsel %vm368_vm4, %v363_v6, %v365_v17 }
 0x10a   : > { %v377_v21 = vsel %vm368_vm4, %v365_v17, %v367_v19  ;;  %695 = vmatprep.subr.bf16.mxu1 %v376_v20 }
 0x10b   : > { %737 = vmatpush1.bf16.msra.mxu0 %v377_v21  ;;  %696 = vmatpush1.bf16.msra.mxu1 %v375_v18 }
 0x10c   : > { %v402_v22 = vpop.permute.xlu0 %401  ;;  %738 = vmatprep.subr.bf16.mxu0 %v920_v9 }
 0x10d   : > { %v414_v23 = vsel %vm407_vm5, %v1216_v35, %v402_v22  ;;  %v404_v24 = vpop.permute.xlu1 %403 }
 0x10e   : > { %v415_v25 = vsel %vm407_vm5, %v402_v22, %v404_v24 }
 0x10f   : > { %697 = vmatprep.subr.bf16.mxu1 %v415_v25 }
 0x110   : > { %698 = vmatpush1.bf16.msra.mxu1 %v414_v23  ;;  %v406_v27 = vpop.permute.xlu0 %405 }
 0x111   : > { %v416_v28 = vsel %vm407_vm5, %v404_v24, %v406_v27  ;;  %v441_v26 = vpop.permute.xlu1 %440 }
 0x112   : > { %739 = vmatpush1.bf16.msra.mxu0 %v416_v28  ;;  %v453_v32 = vsel %vm446_vm6, %v1224_v43, %v441_v26 }
 0x113   : > { %740 = vmatprep.subr.bf16.mxu0 %v920_v9 }
 0x114   : > { %v443_v30 = vpop.permute.xlu0 %442 }
 0x115   : > { %v445_v31 = vpop.permute.xlu1 %444  ;;  %v454_v29 = vsel %vm446_vm6, %v441_v26, %v443_v30 }
 0x116   : > { %v455_v33 = vsel %vm446_vm6, %v443_v30, %v445_v31  ;;  %699 = vmatprep.subr.bf16.mxu1 %v454_v29 }
 0x117   : > { %741 = vmatpush1.bf16.msra.mxu0 %v455_v33  ;;  %700 = vmatpush1.bf16.msra.mxu1 %v453_v32 }
 0x118   : > { %v480_v35 = vpop.permute.xlu0 %479  ;;  %742 = vmatprep.subr.bf16.mxu0 %v920_v9 }
 0x119   : > { %v492_v36 = vsel %vm485_vm7, %v1232_v52, %v480_v35  ;;  %v482_v37 = vpop.permute.xlu1 %481 }
 0x11a   : > { %v493_v38 = vsel %vm485_vm7, %v480_v35, %v482_v37 }
 0x11b   : > { %701 = vmatprep.subr.bf16.mxu1 %v493_v38 }
 0x11c   : > { %702 = vmatpush1.bf16.msra.mxu1 %v492_v36  ;;  %v484_v40 = vpop.permute.xlu0 %483 }
 0x11d   : > { %v494_v34 = vsel %vm485_vm7, %v482_v37, %v484_v40  ;;  %v519_v41 = vpop.permute.xlu1 %518 }
 0x11e   : > { %743 = vmatpush1.bf16.msra.mxu0 %v494_v34  ;;  %v531_v46 = vsel %vm524_vm8, %v1240_v59, %v519_v41 }
 0x11f   : > { %744 = vmatprep.subr.bf16.mxu0 %v920_v9 }
 0x120   : > { %v521_v42 = vpop.permute.xlu0 %520 }
 0x121   : > { %v523_v43 = vpop.permute.xlu1 %522  ;;  %v532_v45 = vsel %vm524_vm8, %v519_v41, %v521_v42 }
 0x122   : > { %v533_v47 = vsel %vm524_vm8, %v521_v42, %v523_v43  ;;  %703 = vmatprep.subr.bf16.mxu1 %v532_v45 }
 0x123   : > { %745 = vmatpush1.bf16.msra.mxu0 %v533_v47  ;;  %704 = vmatpush1.bf16.msra.mxu1 %v531_v46 }
 0x126   : > { %720 = vmatmul.mubr.bf16.vlgmr.msra.gmra.mrb[4].mxu1 %v985_v4  ;;  %761 = vmatmul.mubr.bf16.vlgmr.msra.gmra.mrb[8].mxu0 %v985_v4 }
 0x131   : > { %v548_v48 = vpop.permute.xlu0 %547 }
 0x189   : > { %v598_v39 = vpop.f32.mrb[0].mxu0 }
 0x18a   : > { %v600_v9 = vpop.f32.mrb[1].mxu0  ;;  %v599_v49 = vadd.f32 %v598_v39, %v548_v48 }
 0x18b   : > { %v602_v51 = vpop.f32.mrb[2].mxu0  ;;  %v601_v52 = vadd.f32 %v600_v9, %v548_v48 }
 0x18c   : > { %v603_v53 = vpop.f32.mrb[3].mxu0 }
 0x18d   : > { %v776_v54 = vcombine.low %v599_v49, %v601_v52 }
 0x18f   : > { %784 = vst [vmem:[%s1300_s6] sm:$0x77] %v776_v54 }
 0x1c6   : > { %v639_v55 = vpop.f32.mrb[0].mxu1 }
 0x1c7   : > { %v640_v4 = vadd.f32 %v639_v55, %v548_v48  ;;  %v641_v56 = vpop.f32.mrb[1].mxu1 }
 0x1c8   : > { %v642_v44 = vadd.f32 %v641_v56, %v548_v48  ;;  %v643_v57 = vpop.f32.mrb[2].mxu1 }
 0x1c9   : > { %v644_v58 = vpop.f32.mrb[3].mxu1 }
 0x1ca   : > { %v777_v59 = vcombine.low %v640_v4, %v642_v44  ;;  %v680_v61 = vpop.f32.mrb[4].mxu0 }
 0x1cb   : > { %v681_v50 = vadd.f32 %v680_v61, %v548_v48  ;;  %v682_v62 = vpop.f32.mrb[5].mxu0 }
 0x1cc   : > { %785 = vst [vmem:[%s1300_s6 + $0x8] sm:$0x77] %v777_v59  ;;  %v683_v63 = vadd.f32 %v682_v62, %v548_v48  ;;  %v684_v10 = vpop.f32.mrb[6].mxu0 }
 0x1cd   : > { %v685_v0 = vpop.f32.mrb[7].mxu0 }
 0x1ce   : > { %v778_v8 = vcombine.low %v681_v50, %v683_v63 }
 0x1d0   : > { %786 = vst [vmem:[%s1300_s6 + $0x10] sm:$0x77] %v778_v8 }
 0x1f9   : > { %v721_v1 = vpop.f32.mrb[4].mxu1  ;;  %v762_v60 = vpop.f32.mrb[8].mxu0 }
 0x1fa   : > { %v722_v2 = vadd.f32 %v721_v1, %v548_v48  ;;  %v763_v3 = vadd.f32 %v762_v60, %v548_v48  ;;  %v723_v7 = vpop.f32.mrb[5].mxu1  ;;  %v764_v11 = vpop.f32.mrb[9].mxu0 }
 0x1fb   : > { %v724_v12 = vadd.f32 %v723_v7, %v548_v48  ;;  %v725_v13 = vpop.f32.mrb[6].mxu1  ;;  %v765_v5 = vpop.f32.mrb[10].mxu0 }
 0x1fc   : > { %788 = vst [vmem:[%s1300_s6 + $0x20] sm:$0x7] %v763_v3  ;;  %v726_v14 = vpop.f32.mrb[7].mxu1  ;;  %v766_v15 = vpop.f32.mrb[11].mxu0 }
 0x1fd   : > { %v779_v16 = vcombine.low %v722_v2, %v724_v12 }
 0x1ff   : > { %787 = vst [vmem:[%s1300_s6 + $0x18] sm:$0x77] %v779_v16 }
 0x200 PF: > { %s13_s12 = sadd.s32 1, %s910_s12  }
 0x201   : > { %p10_p4 = scmp.ge.s32.totalorder %s13_s12, 4  }
 0x203   :  { %12 = sbr.rel (!%p10_p4) target bundleno = 1 (0x1), region = 62 }

</bundles_post_ra>
